<compile_context>
chip_gen: v5e
topology: v5e:2x2
jax: 0.10.0
libtpu: 0.0.40
codegen_flags: <defaults>
</compile_context>

<pallas_src>
import functools

import jax
import jax.numpy as jnp
from jax import lax
from jax.experimental import pallas as pl
from jax.experimental.pallas import tpu as pltpu

EPS = 1e-5


# ---------------------------------------------------------------------------
# Kernels
# ---------------------------------------------------------------------------
def _conv3x3_from_window(win_ref, mask_ref, w_ref, *, C, W, s_blk, halo):
    """3x3 'same' conv of one lane block as 9 accumulated shifted matmuls.

    win_ref : (C, halo + s_blk + halo) bf16 assembled activation window
    mask_ref: (9, s_blk) bf16 per-tap validity masks ({0,1}; zero wherever the
              3x3 window leaves the image, which also neutralises clamped /
              cross-image halo lanes)
    w_ref   : (9, C, C) bf16 per-tap weights, tap t = kh*3 + kw
    Returns the (C, s_blk) f32 conv output (MXU accumulates in f32).
    """
    acc = jnp.zeros((C, s_blk), jnp.float32)
    for kh in range(3):
        for kw in range(3):
            t = kh * 3 + kw
            off = halo + (kh - 1) * W + (kw - 1)
            win = win_ref[:, pl.ds(off, s_blk)]
            if t != 4:  # centre tap mask is all-ones: skip the multiply
                win = win * mask_ref[pl.ds(t, 1), :]
            acc += jnp.dot(w_ref[t], win, preferred_element_type=jnp.float32)
    return acc


def _conv_stage_kernel(mask_ref, left_ref, mid_ref, right_ref, w_ref, ab_ref,
                       y_ref, sum_ref, sq_ref, win_ref,
                       *, C, W, s_blk, halo, pre_bn_relu):
    """One spatial block of: [optional y*scale+shift, ReLU] -> conv3x3 -> partial BN stats."""
    if pre_bn_relu:
        a = ab_ref[:, 0:1]
        b = ab_ref[:, 1:2]
        stage = lambda v: jnp.maximum(v * a + b, 0.0).astype(jnp.bfloat16)
    else:
        stage = lambda v: v.astype(jnp.bfloat16)

    # Assemble the contiguous window: [left halo | block | right halo].  Halo
    # lanes coming from a clamped neighbour fetch may hold out-of-image data;
    # every tap that could read them is zeroed by its mask, so no zero-padding
    # pass / padded scratch is needed.
    win_ref[:, 0:halo] = stage(left_ref[...])
    win_ref[:, halo:halo + s_blk] = stage(mid_ref[...])
    win_ref[:, halo + s_blk:halo + s_blk + halo] = stage(right_ref[...])

    y = _conv3x3_from_window(win_ref, mask_ref, w_ref,
                             C=C, W=W, s_blk=s_blk, halo=halo)
    y_ref[...] = y

    # Per-block partial BN statistics; combined in f32 by the wrapper so the
    # normalisation stays global over (N, H, W).
    sum_ref[...] = jnp.sum(y, axis=1, keepdims=True)[None]
    sq_ref[...] = jnp.sum(y * y, axis=1, keepdims=True)[None]


def _bn_residual_kernel(y_ref, x_ref, ab_ref, out_ref):
    """Pointwise epilogue: bn2 (folded affine) + residual add + final ReLU."""
    a = ab_ref[:, 0:1]
    b = ab_ref[:, 1:2]
    out_ref[...] = jnp.maximum(y_ref[...] * a + b + x_ref[...], 0.0)


# ---------------------------------------------------------------------------
# Wrapper
# ---------------------------------------------------------------------------
def _bn_affine(part_sum, part_sq, gamma, beta, count):
    """Combine per-block partial sums; fold training-mode BN into y*scale+shift."""
    s = jnp.sum(part_sum[:, :, 0], axis=0)
    sq = jnp.sum(part_sq[:, :, 0], axis=0)
    mean = s / count
    var = jnp.maximum(sq / count - mean * mean, 0.0)      # biased variance
    scale = gamma * lax.rsqrt(var + EPS)
    shift = beta - mean * scale
    return jnp.stack([scale, shift], axis=1).astype(jnp.float32)   # (C, 2)


def residual_block_pallas(x_nchw, params, *, s_blk=2048):
    """x_nchw: (N, C, H, W) float32, like the PyTorch module.  Returns NCHW."""
    N, C, H, W = x_nchw.shape
    S = N * H * W
    assert S % 128 == 0, "flattened spatial size must be a multiple of 128"
    s_blk = max(128, (min(s_blk, S) // 128) * 128)
    while S % s_blk:
        s_blk -= 128
    halo = ((W + 1 + 127) // 128) * 128          # halo rounded up to a lane tile
    assert s_blk >= halo and s_blk % halo == 0
    nblk = S // s_blk
    r_h = s_blk // halo                           # halo-sized tiles per block
    nhal = S // halo

    # NCHW -> (C, N*H*W): flattened spatial on the (fast) lane axis.
    x_cs = jnp.transpose(x_nchw, (1, 0, 2, 3)).reshape(C, S).astype(jnp.float32)

    # PyTorch OIHW (C, C, 3, 3) -> per-tap (9, C, C) bf16 MXU operands.  The
    # conv biases are dropped: training-mode BN cancels a per-channel constant.
    def tap_w(w):
        return (jnp.transpose(w.astype(jnp.float32), (2, 3, 0, 1))
                .reshape(9, C, C).astype(jnp.bfloat16))

    # Per-tap validity masks over the flattened (n, h, w) index, bf16 {0,1}.
    hh = jnp.arange(H)[:, None]
    ww = jnp.arange(W)[None, :]
    rows = []
    for kh in range(3):
        for kw in range(3):
            m = ((hh + kh - 1 >= 0) & (hh + kh - 1 < H) &
                 (ww + kw - 1 >= 0) & (ww + kw - 1 < W))
            rows.append(jnp.tile(m.reshape(-1), N))
    masks = jnp.stack(rows, axis=0).astype(jnp.bfloat16)          # (9, S)

    # Block specs; halo blocks come from the clamped neighbour block.
    mask_spec = pl.BlockSpec((9, s_blk), lambda j: (0, j))
    mid_spec = pl.BlockSpec((C, s_blk), lambda j: (0, j))
    left_spec = pl.BlockSpec((C, halo),
                             lambda j: (0, jnp.maximum(j * r_h - 1, 0)))
    right_spec = pl.BlockSpec((C, halo),
                              lambda j: (0, jnp.minimum((j + 1) * r_h, nhal - 1)))
    w_spec = pl.BlockSpec((9, C, C), lambda j: (0, 0, 0))
    ab_spec = pl.BlockSpec((C, 2), lambda j: (0, 0))
    stat_spec = pl.BlockSpec((1, C, 1), lambda j: (j, 0, 0))

    conv_out_shape = (jax.ShapeDtypeStruct((C, S), jnp.float32),
                      jax.ShapeDtypeStruct((nblk, C, 1), jnp.float32),
                      jax.ShapeDtypeStruct((nblk, C, 1), jnp.float32))
    win_scratch = pltpu.VMEM((C, s_blk + 2 * halo), jnp.bfloat16)

    # Scoped-VMEM sizing: double-buffered blocks + window scratch + headroom.
    blk_bytes = (9 * s_blk * 2 + C * s_blk * 4 + 2 * C * halo * 4
                 + 9 * C * C * 2 + C * 2 * 4 + C * s_blk * 4 + 2 * C * 4)
    vmem_limit = min(64 * 1024 * 1024,
                     max(4 * 1024 * 1024,
                         4 * blk_bytes + 2 * C * (s_blk + 2 * halo) * 2))
    cparams = pltpu.CompilerParams(
        dimension_semantics=("parallel",),        # blocks independent (v7x: 2 TCs)
        vmem_limit_bytes=vmem_limit)
    conv_cost = pl.CostEstimate(
        flops=2 * 9 * C * C * S + 8 * C * S, transcendentals=0,
        bytes_accessed=2 * C * S * 4 + 9 * S * 2 + 9 * C * C * 2)

    def conv_stage(pre_bn_relu):
        return pl.pallas_call(
            functools.partial(_conv_stage_kernel, C=C, W=W, s_blk=s_blk,
                              halo=halo, pre_bn_relu=pre_bn_relu),
            grid=(nblk,),
            in_specs=[mask_spec, left_spec, mid_spec, right_spec, w_spec, ab_spec],
            out_specs=(mid_spec, stat_spec, stat_spec),
            out_shape=conv_out_shape,
            scratch_shapes=[win_scratch],
            compiler_params=cparams,
            cost_estimate=conv_cost,
        )

    ab_unused = jnp.zeros((C, 2), jnp.float32)    # stage 1 has no pre-BN affine
    g1 = params["g1"].astype(jnp.float32)
    be1 = params["be1"].astype(jnp.float32)
    g2 = params["g2"].astype(jnp.float32)
    be2 = params["be2"].astype(jnp.float32)

    # Stage 1: conv1 + partial BN1 stats (pass A of the two-pass BN).
    y1, s1, q1 = conv_stage(False)(masks, x_cs, x_cs, x_cs,
                                   tap_w(params["w1"]), ab_unused)
    ab1 = _bn_affine(s1, q1, g1, be1, S)

    # Stage 2: bn1 + ReLU (recomputed on the halo) + conv2 + partial BN2 stats.
    y2, s2, q2 = conv_stage(True)(masks, y1, y1, y1,
                                  tap_w(params["w2"]), ab1)
    ab2 = _bn_affine(s2, q2, g2, be2, S)

    # Stage 3: bn2 + residual add + final ReLU (pointwise, lane-dense blocks).
    out_cs = pl.pallas_call(
        _bn_residual_kernel,
        grid=(nblk,),
        in_specs=[mid_spec, mid_spec, ab_spec],
        out_specs=mid_spec,
        out_shape=jax.ShapeDtypeStruct((C, S), jnp.float32),
        compiler_params=cparams,
        cost_estimate=pl.CostEstimate(flops=3 * C * S, transcendentals=0,
                                      bytes_accessed=3 * C * S * 4),
    )(y2, x_cs, ab2)

    return jnp.transpose(out_cs.reshape(C, N, H, W), (1, 0, 2, 3))


# ---------------------------------------------------------------------------
# Pure-JAX f32 reference (mirrors the PyTorch forward in train mode)
# ---------------------------------------------------------------------------
def residual_block_ref(x_nchw, params):
    def conv(x, w, b):
        y = lax.conv_general_dilated(
            x, w, (1, 1), ((1, 1), (1, 1)),
            dimension_numbers=("NCHW", "OIHW", "NCHW"),
            precision=lax.Precision.HIGHEST)
        return y + b[None, :, None, None]

    def bn(x, g, be):
        mean = jnp.mean(x, axis=(0, 2, 3), keepdims=True)
        var = jnp.mean((x - mean) ** 2, axis=(0, 2, 3), keepdims=True)
        return ((x - mean) * lax.rsqrt(var + EPS) * g[None, :, None, None]
                + be[None, :, None, None])

    h = jax.nn.relu(bn(conv(x_nchw, params["w1"], params["b1"]),
                       params["g1"], params["be1"]))
    o = bn(conv(h, params["w2"], params["b2"]), params["g2"], params["be2"])
    return jax.nn.relu(o + x_nchw)


if __name__ == "__main__":
    key = jax.random.PRNGKey(0)
    # ResidualBlock(32): the smallest residual block used inside the VAE.
    # C=32 is a multiple of 8/16 so (C, S) tiles are sublane-dense.
    N, C, H, W = 2, 32, 16, 16
    keys = jax.random.split(key, 9)

    x = jax.random.normal(keys[0], (N, C, H, W), jnp.float32)
    params = {
        # Conv2d(C, C, 3, padding=1): weight OIHW (C, C, 3, 3), bias (C,)
        "w1": 0.1 * jax.random.normal(keys[1], (C, C, 3, 3), jnp.float32),
        "b1": 0.1 * jax.random.normal(keys[2], (C,), jnp.float32),
        # BatchNorm2d(C): gamma (C,), beta (C,)
        "g1": 1.0 + 0.1 * jax.random.normal(keys[3], (C,), jnp.float32),
        "be1": 0.1 * jax.random.normal(keys[4], (C,), jnp.float32),
        "w2": 0.1 * jax.random.normal(keys[5], (C, C, 3, 3), jnp.float32),
        "b2": 0.1 * jax.random.normal(keys[6], (C,), jnp.float32),
        "g2": 1.0 + 0.1 * jax.random.normal(keys[7], (C,), jnp.float32),
        "be2": 0.1 * jax.random.normal(keys[8], (C,), jnp.float32),
    }

    # s_blk=128 exercises the multi-block spatial grid, halos and cross-image
    # masks at this small test shape (S = 512 -> 4 spatial blocks).
    run = jax.jit(functools.partial(residual_block_pallas, s_blk=128))
    out = jax.block_until_ready(run(x, params))
    ref = jax.block_until_ready(residual_block_ref(x, params))

    assert out.shape == (N, C, H, W) and out.dtype == jnp.float32
    err = float(jnp.max(jnp.abs(out - ref)))
    # Precision floor is set by the bf16 MXU operands (f32 accumulation); the
    # f32 reference also keeps the conv biases the kernel folds into BN.
    assert jnp.allclose(out, ref, atol=7.5e-2, rtol=5e-2), f"max abs err {err}"
    print("KERNEL_OK")
</pallas_src>

<mosaic_0001>
module attributes {stable_mosaic.version = 11 : i64} {
  func.func @_conv_stage_kernel(%arg0: i32, %arg1: memref<9x128xbf16, #tpu.memory_space<vmem>>, %arg2: memref<32x128xf32, #tpu.memory_space<vmem>>, %arg3: memref<32x128xf32, #tpu.memory_space<vmem>>, %arg4: memref<32x128xf32, #tpu.memory_space<vmem>>, %arg5: memref<9x32x32xbf16, #tpu.memory_space<vmem>>, %arg6: memref<32x2xf32, #tpu.memory_space<vmem>>, %arg7: memref<32x128xf32, #tpu.memory_space<vmem>>, %arg8: memref<1x32x1xf32, #tpu.memory_space<vmem>>, %arg9: memref<1x32x1xf32, #tpu.memory_space<vmem>>, %arg10: memref<32x384xbf16, #tpu.memory_space<vmem>>) attributes {dimension_semantics = [#tpu.dimension_semantics<parallel>], iteration_bounds = array<i64: 4>, scalar_prefetch = 0 : i64, scratch_operands = 1 : i64, tpu.core_type = #tpu.core_type<tc>, window_params = [{transform_indices = @transform_0, window_bounds = array<i64: 9, 128>}, {transform_indices = @transform_1, window_bounds = array<i64: 32, 128>}, {transform_indices = @transform_2, window_bounds = array<i64: 32, 128>}, {transform_indices = @transform_3, window_bounds = array<i64: 32, 128>}, {pipeline_mode = #tpu.pipeline_mode<synchronous>, transform_indices = @transform_4, window_bounds = array<i64: 9, 32, 32>}, {pipeline_mode = #tpu.pipeline_mode<synchronous>, transform_indices = @transform_5, window_bounds = array<i64: 32, 2>}, {transform_indices = @transform_6, window_bounds = array<i64: 32, 128>}, {transform_indices = @transform_7, window_bounds = array<i64: 1, 32, 1>}, {transform_indices = @transform_8, window_bounds = array<i64: 1, 32, 1>}]} {
    %c0 = arith.constant 0 : index
    %c0_0 = arith.constant 0 : index
    %0 = vector.load %arg2[%c0, %c0_0] : memref<32x128xf32, #tpu.memory_space<vmem>>, vector<32x128xf32>
    %1 = arith.truncf %0 : vector<32x128xf32> to vector<32x128xbf16>
    %c0_1 = arith.constant 0 : index
    %c0_2 = arith.constant 0 : index
    %2 = vector.load %arg10[%c0_1, %c0_2] : memref<32x384xbf16, #tpu.memory_space<vmem>>, vector<32x128xbf16>
    tpu.vector_store %arg10[%c0_1, %c0_2], %1 {strides = array<i32>} : memref<32x384xbf16, #tpu.memory_space<vmem>>, vector<32x128xbf16>,
    %c0_3 = arith.constant 0 : index
    %c0_4 = arith.constant 0 : index
    %3 = vector.load %arg3[%c0_3, %c0_4] : memref<32x128xf32, #tpu.memory_space<vmem>>, vector<32x128xf32>
    %4 = arith.truncf %3 : vector<32x128xf32> to vector<32x128xbf16>
    %c0_5 = arith.constant 0 : index
    %c128 = arith.constant 128 : index
    %5 = vector.load %arg10[%c0_5, %c128] : memref<32x384xbf16, #tpu.memory_space<vmem>>, vector<32x128xbf16>
    tpu.vector_store %arg10[%c0_5, %c128], %4 {strides = array<i32>} : memref<32x384xbf16, #tpu.memory_space<vmem>>, vector<32x128xbf16>,
    %c0_6 = arith.constant 0 : index
    %c0_7 = arith.constant 0 : index
    %6 = vector.load %arg4[%c0_6, %c0_7] : memref<32x128xf32, #tpu.memory_space<vmem>>, vector<32x128xf32>
    %7 = arith.truncf %6 : vector<32x128xf32> to vector<32x128xbf16>
    %c0_8 = arith.constant 0 : index
    %c256 = arith.constant 256 : index
    %8 = vector.load %arg10[%c0_8, %c256] : memref<32x384xbf16, #tpu.memory_space<vmem>>, vector<32x128xbf16>
    tpu.vector_store %arg10[%c0_8, %c256], %7 {strides = array<i32>} : memref<32x384xbf16, #tpu.memory_space<vmem>>, vector<32x128xbf16>,
    %cst = arith.constant 0.000000e+00 : f32
    %9 = vector.broadcast %cst : f32 to vector<32x128xf32>
    %c0_9 = arith.constant 0 : index
    %c111 = arith.constant 111 : index
    %10 = vector.load %arg10[%c0_9, %c111] : memref<32x384xbf16, #tpu.memory_space<vmem>>, vector<32x128xbf16>
    %c0_10 = arith.constant 0 : index
    %c0_11 = arith.constant 0 : index
    %11 = vector.load %arg1[%c0_10, %c0_11] : memref<9x128xbf16, #tpu.memory_space<vmem>>, vector<1x128xbf16>
    %12 = vector.broadcast %11 : vector<1x128xbf16> to vector<32x128xbf16>
    %13 = arith.mulf %10, %12 : vector<32x128xbf16>
    %c0_12 = arith.constant 0 : index
    %c0_13 = arith.constant 0 : index
    %c0_14 = arith.constant 0 : index
    %14 = vector.load %arg5[%c0_12, %c0_13, %c0_14] : memref<9x32x32xbf16, #tpu.memory_space<vmem>>, vector<1x32x32xbf16>
    %15 = vector.shape_cast %14 : vector<1x32x32xbf16> to vector<32x32xbf16>
    %cst_15 = arith.constant dense<0.000000e+00> : vector<32x128xf32>
    %16 = tpu.matmul %15, %13, %cst_15 {dimension_numbers = #tpu.dot_dimension_numbers<[1], [0], [0], [1], [0, 0, 1, 1], [], []>} : vector<32x32xbf16>, vector<32x128xbf16>, vector<32x128xf32> -> vector<32x128xf32>
    %17 = arith.addf %9, %16 : vector<32x128xf32>
    %c0_16 = arith.constant 0 : index
    %c112 = arith.constant 112 : index
    %18 = vector.load %arg10[%c0_16, %c112] : memref<32x384xbf16, #tpu.memory_space<vmem>>, vector<32x128xbf16>
    %c1 = arith.constant 1 : index
    %c0_17 = arith.constant 0 : index
    %19 = vector.load %arg1[%c1, %c0_17] : memref<9x128xbf16, #tpu.memory_space<vmem>>, vector<1x128xbf16>
    %20 = vector.broadcast %19 : vector<1x128xbf16> to vector<32x128xbf16>
    %21 = arith.mulf %18, %20 : vector<32x128xbf16>
    %c1_18 = arith.constant 1 : index
    %c0_19 = arith.constant 0 : index
    %c0_20 = arith.constant 0 : index
    %22 = vector.load %arg5[%c1_18, %c0_19, %c0_20] : memref<9x32x32xbf16, #tpu.memory_space<vmem>>, vector<1x32x32xbf16>
    %23 = vector.shape_cast %22 : vector<1x32x32xbf16> to vector<32x32xbf16>
    %cst_21 = arith.constant dense<0.000000e+00> : vector<32x128xf32>
    %24 = tpu.matmul %23, %21, %cst_21 {dimension_numbers = #tpu.dot_dimension_numbers<[1], [0], [0], [1], [0, 0, 1, 1], [], []>} : vector<32x32xbf16>, vector<32x128xbf16>, vector<32x128xf32> -> vector<32x128xf32>
    %25 = arith.addf %17, %24 : vector<32x128xf32>
    %c0_22 = arith.constant 0 : index
    %c113 = arith.constant 113 : index
    %26 = vector.load %arg10[%c0_22, %c113] : memref<32x384xbf16, #tpu.memory_space<vmem>>, vector<32x128xbf16>
    %c2 = arith.constant 2 : index
    %c0_23 = arith.constant 0 : index
    %27 = vector.load %arg1[%c2, %c0_23] : memref<9x128xbf16, #tpu.memory_space<vmem>>, vector<1x128xbf16>
    %28 = vector.broadcast %27 : vector<1x128xbf16> to vector<32x128xbf16>
    %29 = arith.mulf %26, %28 : vector<32x128xbf16>
    %c2_24 = arith.constant 2 : index
    %c0_25 = arith.constant 0 : index
    %c0_26 = arith.constant 0 : index
    %30 = vector.load %arg5[%c2_24, %c0_25, %c0_26] : memref<9x32x32xbf16, #tpu.memory_space<vmem>>, vector<1x32x32xbf16>
    %31 = vector.shape_cast %30 : vector<1x32x32xbf16> to vector<32x32xbf16>
    %cst_27 = arith.constant dense<0.000000e+00> : vector<32x128xf32>
    %32 = tpu.matmul %31, %29, %cst_27 {dimension_numbers = #tpu.dot_dimension_numbers<[1], [0], [0], [1], [0, 0, 1, 1], [], []>} : vector<32x32xbf16>, vector<32x128xbf16>, vector<32x128xf32> -> vector<32x128xf32>
    %33 = arith.addf %25, %32 : vector<32x128xf32>
    %c0_28 = arith.constant 0 : index
    %c127 = arith.constant 127 : index
    %34 = vector.load %arg10[%c0_28, %c127] : memref<32x384xbf16, #tpu.memory_space<vmem>>, vector<32x128xbf16>
    %c3 = arith.constant 3 : index
    %c0_29 = arith.constant 0 : index
    %35 = vector.load %arg1[%c3, %c0_29] : memref<9x128xbf16, #tpu.memory_space<vmem>>, vector<1x128xbf16>
    %36 = vector.broadcast %35 : vector<1x128xbf16> to vector<32x128xbf16>
    %37 = arith.mulf %34, %36 : vector<32x128xbf16>
    %c3_30 = arith.constant 3 : index
    %c0_31 = arith.constant 0 : index
    %c0_32 = arith.constant 0 : index
    %38 = vector.load %arg5[%c3_30, %c0_31, %c0_32] : memref<9x32x32xbf16, #tpu.memory_space<vmem>>, vector<1x32x32xbf16>
    %39 = vector.shape_cast %38 : vector<1x32x32xbf16> to vector<32x32xbf16>
    %cst_33 = arith.constant dense<0.000000e+00> : vector<32x128xf32>
    %40 = tpu.matmul %39, %37, %cst_33 {dimension_numbers = #tpu.dot_dimension_numbers<[1], [0], [0], [1], [0, 0, 1, 1], [], []>} : vector<32x32xbf16>, vector<32x128xbf16>, vector<32x128xf32> -> vector<32x128xf32>
    %41 = arith.addf %33, %40 : vector<32x128xf32>
    %c0_34 = arith.constant 0 : index
    %c128_35 = arith.constant 128 : index
    %42 = vector.load %arg10[%c0_34, %c128_35] : memref<32x384xbf16, #tpu.memory_space<vmem>>, vector<32x128xbf16>
    %c4 = arith.constant 4 : index
    %c0_36 = arith.constant 0 : index
    %c0_37 = arith.constant 0 : index
    %43 = vector.load %arg5[%c4, %c0_36, %c0_37] : memref<9x32x32xbf16, #tpu.memory_space<vmem>>, vector<1x32x32xbf16>
    %44 = vector.shape_cast %43 : vector<1x32x32xbf16> to vector<32x32xbf16>
    %cst_38 = arith.constant dense<0.000000e+00> : vector<32x128xf32>
    %45 = tpu.matmul %44, %42, %cst_38 {dimension_numbers = #tpu.dot_dimension_numbers<[1], [0], [0], [1], [0, 0, 1, 1], [], []>} : vector<32x32xbf16>, vector<32x128xbf16>, vector<32x128xf32> -> vector<32x128xf32>
    %46 = arith.addf %41, %45 : vector<32x128xf32>
    %c0_39 = arith.constant 0 : index
    %c129 = arith.constant 129 : index
    %47 = vector.load %arg10[%c0_39, %c129] : memref<32x384xbf16, #tpu.memory_space<vmem>>, vector<32x128xbf16>
    %c5 = arith.constant 5 : index
    %c0_40 = arith.constant 0 : index
    %48 = vector.load %arg1[%c5, %c0_40] : memref<9x128xbf16, #tpu.memory_space<vmem>>, vector<1x128xbf16>
    %49 = vector.broadcast %48 : vector<1x128xbf16> to vector<32x128xbf16>
    %50 = arith.mulf %47, %49 : vector<32x128xbf16>
    %c5_41 = arith.constant 5 : index
    %c0_42 = arith.constant 0 : index
    %c0_43 = arith.constant 0 : index
    %51 = vector.load %arg5[%c5_41, %c0_42, %c0_43] : memref<9x32x32xbf16, #tpu.memory_space<vmem>>, vector<1x32x32xbf16>
    %52 = vector.shape_cast %51 : vector<1x32x32xbf16> to vector<32x32xbf16>
    %cst_44 = arith.constant dense<0.000000e+00> : vector<32x128xf32>
    %53 = tpu.matmul %52, %50, %cst_44 {dimension_numbers = #tpu.dot_dimension_numbers<[1], [0], [0], [1], [0, 0, 1, 1], [], []>} : vector<32x32xbf16>, vector<32x128xbf16>, vector<32x128xf32> -> vector<32x128xf32>
    %54 = arith.addf %46, %53 : vector<32x128xf32>
    %c0_45 = arith.constant 0 : index
    %c143 = arith.constant 143 : index
    %55 = vector.load %arg10[%c0_45, %c143] : memref<32x384xbf16, #tpu.memory_space<vmem>>, vector<32x128xbf16>
    %c6 = arith.constant 6 : index
    %c0_46 = arith.constant 0 : index
    %56 = vector.load %arg1[%c6, %c0_46] : memref<9x128xbf16, #tpu.memory_space<vmem>>, vector<1x128xbf16>
    %57 = vector.broadcast %56 : vector<1x128xbf16> to vector<32x128xbf16>
    %58 = arith.mulf %55, %57 : vector<32x128xbf16>
    %c6_47 = arith.constant 6 : index
    %c0_48 = arith.constant 0 : index
    %c0_49 = arith.constant 0 : index
    %59 = vector.load %arg5[%c6_47, %c0_48, %c0_49] : memref<9x32x32xbf16, #tpu.memory_space<vmem>>, vector<1x32x32xbf16>
    %60 = vector.shape_cast %59 : vector<1x32x32xbf16> to vector<32x32xbf16>
    %cst_50 = arith.constant dense<0.000000e+00> : vector<32x128xf32>
    %61 = tpu.matmul %60, %58, %cst_50 {dimension_numbers = #tpu.dot_dimension_numbers<[1], [0], [0], [1], [0, 0, 1, 1], [], []>} : vector<32x32xbf16>, vector<32x128xbf16>, vector<32x128xf32> -> vector<32x128xf32>
    %62 = arith.addf %54, %61 : vector<32x128xf32>
    %c0_51 = arith.constant 0 : index
    %c144 = arith.constant 144 : index
    %63 = vector.load %arg10[%c0_51, %c144] : memref<32x384xbf16, #tpu.memory_space<vmem>>, vector<32x128xbf16>
    %c7 = arith.constant 7 : index
    %c0_52 = arith.constant 0 : index
    %64 = vector.load %arg1[%c7, %c0_52] : memref<9x128xbf16, #tpu.memory_space<vmem>>, vector<1x128xbf16>
    %65 = vector.broadcast %64 : vector<1x128xbf16> to vector<32x128xbf16>
    %66 = arith.mulf %63, %65 : vector<32x128xbf16>
    %c7_53 = arith.constant 7 : index
    %c0_54 = arith.constant 0 : index
    %c0_55 = arith.constant 0 : index
    %67 = vector.load %arg5[%c7_53, %c0_54, %c0_55] : memref<9x32x32xbf16, #tpu.memory_space<vmem>>, vector<1x32x32xbf16>
    %68 = vector.shape_cast %67 : vector<1x32x32xbf16> to vector<32x32xbf16>
    %cst_56 = arith.constant dense<0.000000e+00> : vector<32x128xf32>
    %69 = tpu.matmul %68, %66, %cst_56 {dimension_numbers = #tpu.dot_dimension_numbers<[1], [0], [0], [1], [0, 0, 1, 1], [], []>} : vector<32x32xbf16>, vector<32x128xbf16>, vector<32x128xf32> -> vector<32x128xf32>
    %70 = arith.addf %62, %69 : vector<32x128xf32>
    %c0_57 = arith.constant 0 : index
    %c145 = arith.constant 145 : index
    %71 = vector.load %arg10[%c0_57, %c145] : memref<32x384xbf16, #tpu.memory_space<vmem>>, vector<32x128xbf16>
    %c8 = arith.constant 8 : index
    %c0_58 = arith.constant 0 : index
    %72 = vector.load %arg1[%c8, %c0_58] : memref<9x128xbf16, #tpu.memory_space<vmem>>, vector<1x128xbf16>
    %73 = vector.broadcast %72 : vector<1x128xbf16> to vector<32x128xbf16>
    %74 = arith.mulf %71, %73 : vector<32x128xbf16>
    %c8_59 = arith.constant 8 : index
    %c0_60 = arith.constant 0 : index
    %c0_61 = arith.constant 0 : index
    %75 = vector.load %arg5[%c8_59, %c0_60, %c0_61] : memref<9x32x32xbf16, #tpu.memory_space<vmem>>, vector<1x32x32xbf16>
    %76 = vector.shape_cast %75 : vector<1x32x32xbf16> to vector<32x32xbf16>
    %cst_62 = arith.constant dense<0.000000e+00> : vector<32x128xf32>
    %77 = tpu.matmul %76, %74, %cst_62 {dimension_numbers = #tpu.dot_dimension_numbers<[1], [0], [0], [1], [0, 0, 1, 1], [], []>} : vector<32x32xbf16>, vector<32x128xbf16>, vector<32x128xf32> -> vector<32x128xf32>
    %78 = arith.addf %70, %77 : vector<32x128xf32>
    %c0_63 = arith.constant 0 : index
    %c0_64 = arith.constant 0 : index
    %79 = vector.load %arg7[%c0_63, %c0_64] : memref<32x128xf32, #tpu.memory_space<vmem>>, vector<32x128xf32>
    tpu.vector_store %arg7[%c0_63, %c0_64], %78 {strides = array<i32>} : memref<32x128xf32, #tpu.memory_space<vmem>>, vector<32x128xf32>,
    %cst_65 = arith.constant dense<0.000000e+00> : vector<32xf32>
    %80 = vector.multi_reduction <add>, %78, %cst_65 [1] : vector<32x128xf32> to vector<32xf32>
    %81 = vector.shape_cast %80 : vector<32xf32> to vector<32x1xf32>
    %82 = vector.shape_cast %81 : vector<32x1xf32> to vector<1x32x1xf32>
    %c0_66 = arith.constant 0 : index
    %c0_67 = arith.constant 0 : index
    %c0_68 = arith.constant 0 : index
    %83 = vector.load %arg8[%c0_66, %c0_67, %c0_68] : memref<1x32x1xf32, #tpu.memory_space<vmem>>, vector<1x32x1xf32>
    tpu.vector_store %arg8[%c0_66, %c0_67, %c0_68], %82 {strides = array<i32>} : memref<1x32x1xf32, #tpu.memory_space<vmem>>, vector<1x32x1xf32>,
    %84 = arith.mulf %78, %78 : vector<32x128xf32>
    %cst_69 = arith.constant dense<0.000000e+00> : vector<32xf32>
    %85 = vector.multi_reduction <add>, %84, %cst_69 [1] : vector<32x128xf32> to vector<32xf32>
    %86 = vector.shape_cast %85 : vector<32xf32> to vector<32x1xf32>
    %87 = vector.shape_cast %86 : vector<32x1xf32> to vector<1x32x1xf32>
    %c0_70 = arith.constant 0 : index
    %c0_71 = arith.constant 0 : index
    %c0_72 = arith.constant 0 : index
    %88 = vector.load %arg9[%c0_70, %c0_71, %c0_72] : memref<1x32x1xf32, #tpu.memory_space<vmem>>, vector<1x32x1xf32>
    tpu.vector_store %arg9[%c0_70, %c0_71, %c0_72], %87 {strides = array<i32>} : memref<1x32x1xf32, #tpu.memory_space<vmem>>, vector<1x32x1xf32>,
    return
  }
  func.func @transform_0(%arg0: i32) -> (i32, i32) {
    %c0_i32 = arith.constant 0 : i32
    %c0_i32_0 = arith.constant 0 : i32
    return %c0_i32, %arg0 : i32, i32
  }
  func.func @transform_1(%arg0: i32) -> (i32, i32) {
    %c1_i32 = arith.constant 1 : i32
    %0 = arith.muli %arg0, %c1_i32 : i32
    %c1_i32_0 = arith.constant 1 : i32
    %1 = arith.subi %0, %c1_i32_0 : i32
    %c0_i32 = arith.constant 0 : i32
    %2 = arith.maxsi %1, %c0_i32 : i32
    %c0_i32_1 = arith.constant 0 : i32
    %c0_i32_2 = arith.constant 0 : i32
    return %c0_i32_1, %2 : i32, i32
  }
  func.func @transform_2(%arg0: i32) -> (i32, i32) {
    %c0_i32 = arith.constant 0 : i32
    %c0_i32_0 = arith.constant 0 : i32
    return %c0_i32, %arg0 : i32, i32
  }
  func.func @transform_3(%arg0: i32) -> (i32, i32) {
    %c1_i32 = arith.constant 1 : i32
    %0 = arith.addi %arg0, %c1_i32 : i32
    %c1_i32_0 = arith.constant 1 : i32
    %1 = arith.muli %0, %c1_i32_0 : i32
    %c3_i32 = arith.constant 3 : i32
    %2 = arith.minsi %1, %c3_i32 : i32
    %c0_i32 = arith.constant 0 : i32
    %c0_i32_1 = arith.constant 0 : i32
    return %c0_i32, %2 : i32, i32
  }
  func.func @transform_4(%arg0: i32) -> (i32, i32, i32) {
    %c0_i32 = arith.constant 0 : i32
    %c0_i32_0 = arith.constant 0 : i32
    %c0_i32_1 = arith.constant 0 : i32
    %c0_i32_2 = arith.constant 0 : i32
    return %c0_i32, %c0_i32_0, %c0_i32_1 : i32, i32, i32
  }
  func.func @transform_5(%arg0: i32) -> (i32, i32) {
    %c0_i32 = arith.constant 0 : i32
    %c0_i32_0 = arith.constant 0 : i32
    %c0_i32_1 = arith.constant 0 : i32
    return %c0_i32, %c0_i32_0 : i32, i32
  }
  func.func @transform_6(%arg0: i32) -> (i32, i32) {
    %c0_i32 = arith.constant 0 : i32
    %c0_i32_0 = arith.constant 0 : i32
    return %c0_i32, %arg0 : i32, i32
  }
  func.func @transform_7(%arg0: i32) -> (i32, i32, i32) {
    %c0_i32 = arith.constant 0 : i32
    %c0_i32_0 = arith.constant 0 : i32
    %c0_i32_1 = arith.constant 0 : i32
    return %arg0, %c0_i32, %c0_i32_0 : i32, i32, i32
  }
  func.func @transform_8(%arg0: i32) -> (i32, i32, i32) {
    %c0_i32 = arith.constant 0 : i32
    %c0_i32_0 = arith.constant 0 : i32
    %c0_i32_1 = arith.constant 0 : i32
    return %arg0, %c0_i32, %c0_i32_0 : i32, i32, i32
  }
}

module attributes {stable_mosaic.version = 11 : i64} {
  func.func @_bn_residual_kernel(%arg0: i32, %arg1: memref<32x128xf32, #tpu.memory_space<vmem>>, %arg2: memref<32x128xf32, #tpu.memory_space<vmem>>, %arg3: memref<32x2xf32, #tpu.memory_space<vmem>>, %arg4: memref<32x128xf32, #tpu.memory_space<vmem>>) attributes {dimension_semantics = [#tpu.dimension_semantics<parallel>], iteration_bounds = array<i64: 4>, scalar_prefetch = 0 : i64, scratch_operands = 0 : i64, tpu.core_type = #tpu.core_type<tc>, window_params = [{transform_indices = @transform_0, window_bounds = array<i64: 32, 128>}, {transform_indices = @transform_1, window_bounds = array<i64: 32, 128>}, {pipeline_mode = #tpu.pipeline_mode<synchronous>, transform_indices = @transform_2, window_bounds = array<i64: 32, 2>}, {transform_indices = @transform_3, window_bounds = array<i64: 32, 128>}]} {
    %c0 = arith.constant 0 : index
    %c0_0 = arith.constant 0 : index
    %0 = vector.load %arg3[%c0, %c0_0] : memref<32x2xf32, #tpu.memory_space<vmem>>, vector<32x1xf32>
    %c0_1 = arith.constant 0 : index
    %c1 = arith.constant 1 : index
    %1 = vector.load %arg3[%c0_1, %c1] : memref<32x2xf32, #tpu.memory_space<vmem>>, vector<32x1xf32>
    %c0_2 = arith.constant 0 : index
    %c0_3 = arith.constant 0 : index
    %2 = vector.load %arg1[%c0_2, %c0_3] : memref<32x128xf32, #tpu.memory_space<vmem>>, vector<32x128xf32>
    %3 = vector.broadcast %0 : vector<32x1xf32> to vector<32x128xf32>
    %4 = arith.mulf %2, %3 : vector<32x128xf32>
    %5 = vector.broadcast %1 : vector<32x1xf32> to vector<32x128xf32>
    %6 = arith.addf %4, %5 : vector<32x128xf32>
    %c0_4 = arith.constant 0 : index
    %c0_5 = arith.constant 0 : index
    %7 = vector.load %arg2[%c0_4, %c0_5] : memref<32x128xf32, #tpu.memory_space<vmem>>, vector<32x128xf32>
    %8 = arith.addf %6, %7 : vector<32x128xf32>
    %cst = arith.constant 0.000000e+00 : f32
    %9 = vector.broadcast %cst : f32 to vector<32x128xf32>
    %10 = arith.maximumf %8, %9 : vector<32x128xf32>
    %c0_6 = arith.constant 0 : index
    %c0_7 = arith.constant 0 : index
    %11 = vector.load %arg4[%c0_6, %c0_7] : memref<32x128xf32, #tpu.memory_space<vmem>>, vector<32x128xf32>
    tpu.vector_store %arg4[%c0_6, %c0_7], %10 {strides = array<i32>} : memref<32x128xf32, #tpu.memory_space<vmem>>, vector<32x128xf32>,
    return
  }
  func.func @transform_0(%arg0: i32) -> (i32, i32) {
    %c0_i32 = arith.constant 0 : i32
    %c0_i32_0 = arith.constant 0 : i32
    return %c0_i32, %arg0 : i32, i32
  }
  func.func @transform_1(%arg0: i32) -> (i32, i32) {
    %c0_i32 = arith.constant 0 : i32
    %c0_i32_0 = arith.constant 0 : i32
    return %c0_i32, %arg0 : i32, i32
  }
  func.func @transform_2(%arg0: i32) -> (i32, i32) {
    %c0_i32 = arith.constant 0 : i32
    %c0_i32_0 = arith.constant 0 : i32
    %c0_i32_1 = arith.constant 0 : i32
    return %c0_i32, %c0_i32_0 : i32, i32
  }
  func.func @transform_3(%arg0: i32) -> (i32, i32) {
    %c0_i32 = arith.constant 0 : i32
    %c0_i32_0 = arith.constant 0 : i32
    return %c0_i32, %arg0 : i32, i32
  }
}

module attributes {stable_mosaic.version = 11 : i64} {
  func.func @_conv_stage_kernel(%arg0: i32, %arg1: memref<9x128xbf16, #tpu.memory_space<vmem>>, %arg2: memref<32x128xf32, #tpu.memory_space<vmem>>, %arg3: memref<32x128xf32, #tpu.memory_space<vmem>>, %arg4: memref<32x128xf32, #tpu.memory_space<vmem>>, %arg5: memref<9x32x32xbf16, #tpu.memory_space<vmem>>, %arg6: memref<32x2xf32, #tpu.memory_space<vmem>>, %arg7: memref<32x128xf32, #tpu.memory_space<vmem>>, %arg8: memref<1x32x1xf32, #tpu.memory_space<vmem>>, %arg9: memref<1x32x1xf32, #tpu.memory_space<vmem>>, %arg10: memref<32x384xbf16, #tpu.memory_space<vmem>>) attributes {dimension_semantics = [#tpu.dimension_semantics<parallel>], iteration_bounds = array<i64: 4>, scalar_prefetch = 0 : i64, scratch_operands = 1 : i64, tpu.core_type = #tpu.core_type<tc>, window_params = [{transform_indices = @transform_0, window_bounds = array<i64: 9, 128>}, {transform_indices = @transform_1, window_bounds = array<i64: 32, 128>}, {transform_indices = @transform_2, window_bounds = array<i64: 32, 128>}, {transform_indices = @transform_3, window_bounds = array<i64: 32, 128>}, {pipeline_mode = #tpu.pipeline_mode<synchronous>, transform_indices = @transform_4, window_bounds = array<i64: 9, 32, 32>}, {pipeline_mode = #tpu.pipeline_mode<synchronous>, transform_indices = @transform_5, window_bounds = array<i64: 32, 2>}, {transform_indices = @transform_6, window_bounds = array<i64: 32, 128>}, {transform_indices = @transform_7, window_bounds = array<i64: 1, 32, 1>}, {transform_indices = @transform_8, window_bounds = array<i64: 1, 32, 1>}]} {
    %c0 = arith.constant 0 : index
    %c0_0 = arith.constant 0 : index
    %0 = vector.load %arg6[%c0, %c0_0] : memref<32x2xf32, #tpu.memory_space<vmem>>, vector<32x1xf32>
    %c0_1 = arith.constant 0 : index
    %c1 = arith.constant 1 : index
    %1 = vector.load %arg6[%c0_1, %c1] : memref<32x2xf32, #tpu.memory_space<vmem>>, vector<32x1xf32>
    %c0_2 = arith.constant 0 : index
    %c0_3 = arith.constant 0 : index
    %2 = vector.load %arg2[%c0_2, %c0_3] : memref<32x128xf32, #tpu.memory_space<vmem>>, vector<32x128xf32>
    %3 = vector.broadcast %0 : vector<32x1xf32> to vector<32x128xf32>
    %4 = arith.mulf %2, %3 : vector<32x128xf32>
    %5 = vector.broadcast %1 : vector<32x1xf32> to vector<32x128xf32>
    %6 = arith.addf %4, %5 : vector<32x128xf32>
    %cst = arith.constant 0.000000e+00 : f32
    %7 = vector.broadcast %cst : f32 to vector<32x128xf32>
    %8 = arith.maximumf %6, %7 : vector<32x128xf32>
    %9 = arith.truncf %8 : vector<32x128xf32> to vector<32x128xbf16>
    %c0_4 = arith.constant 0 : index
    %c0_5 = arith.constant 0 : index
    %10 = vector.load %arg10[%c0_4, %c0_5] : memref<32x384xbf16, #tpu.memory_space<vmem>>, vector<32x128xbf16>
    tpu.vector_store %arg10[%c0_4, %c0_5], %9 {strides = array<i32>} : memref<32x384xbf16, #tpu.memory_space<vmem>>, vector<32x128xbf16>,
    %c0_6 = arith.constant 0 : index
    %c0_7 = arith.constant 0 : index
    %11 = vector.load %arg3[%c0_6, %c0_7] : memref<32x128xf32, #tpu.memory_space<vmem>>, vector<32x128xf32>
    %12 = vector.broadcast %0 : vector<32x1xf32> to vector<32x128xf32>
    %13 = arith.mulf %11, %12 : vector<32x128xf32>
    %14 = vector.broadcast %1 : vector<32x1xf32> to vector<32x128xf32>
    %15 = arith.addf %13, %14 : vector<32x128xf32>
    %cst_8 = arith.constant 0.000000e+00 : f32
    %16 = vector.broadcast %cst_8 : f32 to vector<32x128xf32>
    %17 = arith.maximumf %15, %16 : vector<32x128xf32>
    %18 = arith.truncf %17 : vector<32x128xf32> to vector<32x128xbf16>
    %c0_9 = arith.constant 0 : index
    %c128 = arith.constant 128 : index
    %19 = vector.load %arg10[%c0_9, %c128] : memref<32x384xbf16, #tpu.memory_space<vmem>>, vector<32x128xbf16>
    tpu.vector_store %arg10[%c0_9, %c128], %18 {strides = array<i32>} : memref<32x384xbf16, #tpu.memory_space<vmem>>, vector<32x128xbf16>,
    %c0_10 = arith.constant 0 : index
    %c0_11 = arith.constant 0 : index
    %20 = vector.load %arg4[%c0_10, %c0_11] : memref<32x128xf32, #tpu.memory_space<vmem>>, vector<32x128xf32>
    %21 = vector.broadcast %0 : vector<32x1xf32> to vector<32x128xf32>
    %22 = arith.mulf %20, %21 : vector<32x128xf32>
    %23 = vector.broadcast %1 : vector<32x1xf32> to vector<32x128xf32>
    %24 = arith.addf %22, %23 : vector<32x128xf32>
    %cst_12 = arith.constant 0.000000e+00 : f32
    %25 = vector.broadcast %cst_12 : f32 to vector<32x128xf32>
    %26 = arith.maximumf %24, %25 : vector<32x128xf32>
    %27 = arith.truncf %26 : vector<32x128xf32> to vector<32x128xbf16>
    %c0_13 = arith.constant 0 : index
    %c256 = arith.constant 256 : index
    %28 = vector.load %arg10[%c0_13, %c256] : memref<32x384xbf16, #tpu.memory_space<vmem>>, vector<32x128xbf16>
    tpu.vector_store %arg10[%c0_13, %c256], %27 {strides = array<i32>} : memref<32x384xbf16, #tpu.memory_space<vmem>>, vector<32x128xbf16>,
    %cst_14 = arith.constant 0.000000e+00 : f32
    %29 = vector.broadcast %cst_14 : f32 to vector<32x128xf32>
    %c0_15 = arith.constant 0 : index
    %c111 = arith.constant 111 : index
    %30 = vector.load %arg10[%c0_15, %c111] : memref<32x384xbf16, #tpu.memory_space<vmem>>, vector<32x128xbf16>
    %c0_16 = arith.constant 0 : index
    %c0_17 = arith.constant 0 : index
    %31 = vector.load %arg1[%c0_16, %c0_17] : memref<9x128xbf16, #tpu.memory_space<vmem>>, vector<1x128xbf16>
    %32 = vector.broadcast %31 : vector<1x128xbf16> to vector<32x128xbf16>
    %33 = arith.mulf %30, %32 : vector<32x128xbf16>
    %c0_18 = arith.constant 0 : index
    %c0_19 = arith.constant 0 : index
    %c0_20 = arith.constant 0 : index
    %34 = vector.load %arg5[%c0_18, %c0_19, %c0_20] : memref<9x32x32xbf16, #tpu.memory_space<vmem>>, vector<1x32x32xbf16>
    %35 = vector.shape_cast %34 : vector<1x32x32xbf16> to vector<32x32xbf16>
    %cst_21 = arith.constant dense<0.000000e+00> : vector<32x128xf32>
    %36 = tpu.matmul %35, %33, %cst_21 {dimension_numbers = #tpu.dot_dimension_numbers<[1], [0], [0], [1], [0, 0, 1, 1], [], []>} : vector<32x32xbf16>, vector<32x128xbf16>, vector<32x128xf32> -> vector<32x128xf32>
    %37 = arith.addf %29, %36 : vector<32x128xf32>
    %c0_22 = arith.constant 0 : index
    %c112 = arith.constant 112 : index
    %38 = vector.load %arg10[%c0_22, %c112] : memref<32x384xbf16, #tpu.memory_space<vmem>>, vector<32x128xbf16>
    %c1_23 = arith.constant 1 : index
    %c0_24 = arith.constant 0 : index
    %39 = vector.load %arg1[%c1_23, %c0_24] : memref<9x128xbf16, #tpu.memory_space<vmem>>, vector<1x128xbf16>
    %40 = vector.broadcast %39 : vector<1x128xbf16> to vector<32x128xbf16>
    %41 = arith.mulf %38, %40 : vector<32x128xbf16>
    %c1_25 = arith.constant 1 : index
    %c0_26 = arith.constant 0 : index
    %c0_27 = arith.constant 0 : index
    %42 = vector.load %arg5[%c1_25, %c0_26, %c0_27] : memref<9x32x32xbf16, #tpu.memory_space<vmem>>, vector<1x32x32xbf16>
    %43 = vector.shape_cast %42 : vector<1x32x32xbf16> to vector<32x32xbf16>
    %cst_28 = arith.constant dense<0.000000e+00> : vector<32x128xf32>
    %44 = tpu.matmul %43, %41, %cst_28 {dimension_numbers = #tpu.dot_dimension_numbers<[1], [0], [0], [1], [0, 0, 1, 1], [], []>} : vector<32x32xbf16>, vector<32x128xbf16>, vector<32x128xf32> -> vector<32x128xf32>
    %45 = arith.addf %37, %44 : vector<32x128xf32>
    %c0_29 = arith.constant 0 : index
    %c113 = arith.constant 113 : index
    %46 = vector.load %arg10[%c0_29, %c113] : memref<32x384xbf16, #tpu.memory_space<vmem>>, vector<32x128xbf16>
    %c2 = arith.constant 2 : index
    %c0_30 = arith.constant 0 : index
    %47 = vector.load %arg1[%c2, %c0_30] : memref<9x128xbf16, #tpu.memory_space<vmem>>, vector<1x128xbf16>
    %48 = vector.broadcast %47 : vector<1x128xbf16> to vector<32x128xbf16>
    %49 = arith.mulf %46, %48 : vector<32x128xbf16>
    %c2_31 = arith.constant 2 : index
    %c0_32 = arith.constant 0 : index
    %c0_33 = arith.constant 0 : index
    %50 = vector.load %arg5[%c2_31, %c0_32, %c0_33] : memref<9x32x32xbf16, #tpu.memory_space<vmem>>, vector<1x32x32xbf16>
    %51 = vector.shape_cast %50 : vector<1x32x32xbf16> to vector<32x32xbf16>
    %cst_34 = arith.constant dense<0.000000e+00> : vector<32x128xf32>
    %52 = tpu.matmul %51, %49, %cst_34 {dimension_numbers = #tpu.dot_dimension_numbers<[1], [0], [0], [1], [0, 0, 1, 1], [], []>} : vector<32x32xbf16>, vector<32x128xbf16>, vector<32x128xf32> -> vector<32x128xf32>
    %53 = arith.addf %45, %52 : vector<32x128xf32>
    %c0_35 = arith.constant 0 : index
    %c127 = arith.constant 127 : index
    %54 = vector.load %arg10[%c0_35, %c127] : memref<32x384xbf16, #tpu.memory_space<vmem>>, vector<32x128xbf16>
    %c3 = arith.constant 3 : index
    %c0_36 = arith.constant 0 : index
    %55 = vector.load %arg1[%c3, %c0_36] : memref<9x128xbf16, #tpu.memory_space<vmem>>, vector<1x128xbf16>
    %56 = vector.broadcast %55 : vector<1x128xbf16> to vector<32x128xbf16>
    %57 = arith.mulf %54, %56 : vector<32x128xbf16>
    %c3_37 = arith.constant 3 : index
    %c0_38 = arith.constant 0 : index
    %c0_39 = arith.constant 0 : index
    %58 = vector.load %arg5[%c3_37, %c0_38, %c0_39] : memref<9x32x32xbf16, #tpu.memory_space<vmem>>, vector<1x32x32xbf16>
    %59 = vector.shape_cast %58 : vector<1x32x32xbf16> to vector<32x32xbf16>
    %cst_40 = arith.constant dense<0.000000e+00> : vector<32x128xf32>
    %60 = tpu.matmul %59, %57, %cst_40 {dimension_numbers = #tpu.dot_dimension_numbers<[1], [0], [0], [1], [0, 0, 1, 1], [], []>} : vector<32x32xbf16>, vector<32x128xbf16>, vector<32x128xf32> -> vector<32x128xf32>
    %61 = arith.addf %53, %60 : vector<32x128xf32>
    %c0_41 = arith.constant 0 : index
    %c128_42 = arith.constant 128 : index
    %62 = vector.load %arg10[%c0_41, %c128_42] : memref<32x384xbf16, #tpu.memory_space<vmem>>, vector<32x128xbf16>
    %c4 = arith.constant 4 : index
    %c0_43 = arith.constant 0 : index
    %c0_44 = arith.constant 0 : index
    %63 = vector.load %arg5[%c4, %c0_43, %c0_44] : memref<9x32x32xbf16, #tpu.memory_space<vmem>>, vector<1x32x32xbf16>
    %64 = vector.shape_cast %63 : vector<1x32x32xbf16> to vector<32x32xbf16>
    %cst_45 = arith.constant dense<0.000000e+00> : vector<32x128xf32>
    %65 = tpu.matmul %64, %62, %cst_45 {dimension_numbers = #tpu.dot_dimension_numbers<[1], [0], [0], [1], [0, 0, 1, 1], [], []>} : vector<32x32xbf16>, vector<32x128xbf16>, vector<32x128xf32> -> vector<32x128xf32>
    %66 = arith.addf %61, %65 : vector<32x128xf32>
    %c0_46 = arith.constant 0 : index
    %c129 = arith.constant 129 : index
    %67 = vector.load %arg10[%c0_46, %c129] : memref<32x384xbf16, #tpu.memory_space<vmem>>, vector<32x128xbf16>
    %c5 = arith.constant 5 : index
    %c0_47 = arith.constant 0 : index
    %68 = vector.load %arg1[%c5, %c0_47] : memref<9x128xbf16, #tpu.memory_space<vmem>>, vector<1x128xbf16>
    %69 = vector.broadcast %68 : vector<1x128xbf16> to vector<32x128xbf16>
    %70 = arith.mulf %67, %69 : vector<32x128xbf16>
    %c5_48 = arith.constant 5 : index
    %c0_49 = arith.constant 0 : index
    %c0_50 = arith.constant 0 : index
    %71 = vector.load %arg5[%c5_48, %c0_49, %c0_50] : memref<9x32x32xbf16, #tpu.memory_space<vmem>>, vector<1x32x32xbf16>
    %72 = vector.shape_cast %71 : vector<1x32x32xbf16> to vector<32x32xbf16>
    %cst_51 = arith.constant dense<0.000000e+00> : vector<32x128xf32>
    %73 = tpu.matmul %72, %70, %cst_51 {dimension_numbers = #tpu.dot_dimension_numbers<[1], [0], [0], [1], [0, 0, 1, 1], [], []>} : vector<32x32xbf16>, vector<32x128xbf16>, vector<32x128xf32> -> vector<32x128xf32>
    %74 = arith.addf %66, %73 : vector<32x128xf32>
    %c0_52 = arith.constant 0 : index
    %c143 = arith.constant 143 : index
    %75 = vector.load %arg10[%c0_52, %c143] : memref<32x384xbf16, #tpu.memory_space<vmem>>, vector<32x128xbf16>
    %c6 = arith.constant 6 : index
    %c0_53 = arith.constant 0 : index
    %76 = vector.load %arg1[%c6, %c0_53] : memref<9x128xbf16, #tpu.memory_space<vmem>>, vector<1x128xbf16>
    %77 = vector.broadcast %76 : vector<1x128xbf16> to vector<32x128xbf16>
    %78 = arith.mulf %75, %77 : vector<32x128xbf16>
    %c6_54 = arith.constant 6 : index
    %c0_55 = arith.constant 0 : index
    %c0_56 = arith.constant 0 : index
    %79 = vector.load %arg5[%c6_54, %c0_55, %c0_56] : memref<9x32x32xbf16, #tpu.memory_space<vmem>>, vector<1x32x32xbf16>
    %80 = vector.shape_cast %79 : vector<1x32x32xbf16> to vector<32x32xbf16>
    %cst_57 = arith.constant dense<0.000000e+00> : vector<32x128xf32>
    %81 = tpu.matmul %80, %78, %cst_57 {dimension_numbers = #tpu.dot_dimension_numbers<[1], [0], [0], [1], [0, 0, 1, 1], [], []>} : vector<32x32xbf16>, vector<32x128xbf16>, vector<32x128xf32> -> vector<32x128xf32>
    %82 = arith.addf %74, %81 : vector<32x128xf32>
    %c0_58 = arith.constant 0 : index
    %c144 = arith.constant 144 : index
    %83 = vector.load %arg10[%c0_58, %c144] : memref<32x384xbf16, #tpu.memory_space<vmem>>, vector<32x128xbf16>
    %c7 = arith.constant 7 : index
    %c0_59 = arith.constant 0 : index
    %84 = vector.load %arg1[%c7, %c0_59] : memref<9x128xbf16, #tpu.memory_space<vmem>>, vector<1x128xbf16>
    %85 = vector.broadcast %84 : vector<1x128xbf16> to vector<32x128xbf16>
    %86 = arith.mulf %83, %85 : vector<32x128xbf16>
    %c7_60 = arith.constant 7 : index
    %c0_61 = arith.constant 0 : index
    %c0_62 = arith.constant 0 : index
    %87 = vector.load %arg5[%c7_60, %c0_61, %c0_62] : memref<9x32x32xbf16, #tpu.memory_space<vmem>>, vector<1x32x32xbf16>
    %88 = vector.shape_cast %87 : vector<1x32x32xbf16> to vector<32x32xbf16>
    %cst_63 = arith.constant dense<0.000000e+00> : vector<32x128xf32>
    %89 = tpu.matmul %88, %86, %cst_63 {dimension_numbers = #tpu.dot_dimension_numbers<[1], [0], [0], [1], [0, 0, 1, 1], [], []>} : vector<32x32xbf16>, vector<32x128xbf16>, vector<32x128xf32> -> vector<32x128xf32>
    %90 = arith.addf %82, %89 : vector<32x128xf32>
    %c0_64 = arith.constant 0 : index
    %c145 = arith.constant 145 : index
    %91 = vector.load %arg10[%c0_64, %c145] : memref<32x384xbf16, #tpu.memory_space<vmem>>, vector<32x128xbf16>
    %c8 = arith.constant 8 : index
    %c0_65 = arith.constant 0 : index
    %92 = vector.load %arg1[%c8, %c0_65] : memref<9x128xbf16, #tpu.memory_space<vmem>>, vector<1x128xbf16>
    %93 = vector.broadcast %92 : vector<1x128xbf16> to vector<32x128xbf16>
    %94 = arith.mulf %91, %93 : vector<32x128xbf16>
    %c8_66 = arith.constant 8 : index
    %c0_67 = arith.constant 0 : index
    %c0_68 = arith.constant 0 : index
    %95 = vector.load %arg5[%c8_66, %c0_67, %c0_68] : memref<9x32x32xbf16, #tpu.memory_space<vmem>>, vector<1x32x32xbf16>
    %96 = vector.shape_cast %95 : vector<1x32x32xbf16> to vector<32x32xbf16>
    %cst_69 = arith.constant dense<0.000000e+00> : vector<32x128xf32>
    %97 = tpu.matmul %96, %94, %cst_69 {dimension_numbers = #tpu.dot_dimension_numbers<[1], [0], [0], [1], [0, 0, 1, 1], [], []>} : vector<32x32xbf16>, vector<32x128xbf16>, vector<32x128xf32> -> vector<32x128xf32>
    %98 = arith.addf %90, %97 : vector<32x128xf32>
    %c0_70 = arith.constant 0 : index
    %c0_71 = arith.constant 0 : index
    %99 = vector.load %arg7[%c0_70, %c0_71] : memref<32x128xf32, #tpu.memory_space<vmem>>, vector<32x128xf32>
    tpu.vector_store %arg7[%c0_70, %c0_71], %98 {strides = array<i32>} : memref<32x128xf32, #tpu.memory_space<vmem>>, vector<32x128xf32>,
    %cst_72 = arith.constant dense<0.000000e+00> : vector<32xf32>
    %100 = vector.multi_reduction <add>, %98, %cst_72 [1] : vector<32x128xf32> to vector<32xf32>
    %101 = vector.shape_cast %100 : vector<32xf32> to vector<32x1xf32>
    %102 = vector.shape_cast %101 : vector<32x1xf32> to vector<1x32x1xf32>
    %c0_73 = arith.constant 0 : index
    %c0_74 = arith.constant 0 : index
    %c0_75 = arith.constant 0 : index
    %103 = vector.load %arg8[%c0_73, %c0_74, %c0_75] : memref<1x32x1xf32, #tpu.memory_space<vmem>>, vector<1x32x1xf32>
    tpu.vector_store %arg8[%c0_73, %c0_74, %c0_75], %102 {strides = array<i32>} : memref<1x32x1xf32, #tpu.memory_space<vmem>>, vector<1x32x1xf32>,
    %104 = arith.mulf %98, %98 : vector<32x128xf32>
    %cst_76 = arith.constant dense<0.000000e+00> : vector<32xf32>
    %105 = vector.multi_reduction <add>, %104, %cst_76 [1] : vector<32x128xf32> to vector<32xf32>
    %106 = vector.shape_cast %105 : vector<32xf32> to vector<32x1xf32>
    %107 = vector.shape_cast %106 : vector<32x1xf32> to vector<1x32x1xf32>
    %c0_77 = arith.constant 0 : index
    %c0_78 = arith.constant 0 : index
    %c0_79 = arith.constant 0 : index
    %108 = vector.load %arg9[%c0_77, %c0_78, %c0_79] : memref<1x32x1xf32, #tpu.memory_space<vmem>>, vector<1x32x1xf32>
    tpu.vector_store %arg9[%c0_77, %c0_78, %c0_79], %107 {strides = array<i32>} : memref<1x32x1xf32, #tpu.memory_space<vmem>>, vector<1x32x1xf32>,
    return
  }
  func.func @transform_0(%arg0: i32) -> (i32, i32) {
    %c0_i32 = arith.constant 0 : i32
    %c0_i32_0 = arith.constant 0 : i32
    return %c0_i32, %arg0 : i32, i32
  }
  func.func @transform_1(%arg0: i32) -> (i32, i32) {
    %c1_i32 = arith.constant 1 : i32
    %0 = arith.muli %arg0, %c1_i32 : i32
    %c1_i32_0 = arith.constant 1 : i32
    %1 = arith.subi %0, %c1_i32_0 : i32
    %c0_i32 = arith.constant 0 : i32
    %2 = arith.maxsi %1, %c0_i32 : i32
    %c0_i32_1 = arith.constant 0 : i32
    %c0_i32_2 = arith.constant 0 : i32
    return %c0_i32_1, %2 : i32, i32
  }
  func.func @transform_2(%arg0: i32) -> (i32, i32) {
    %c0_i32 = arith.constant 0 : i32
    %c0_i32_0 = arith.constant 0 : i32
    return %c0_i32, %arg0 : i32, i32
  }
  func.func @transform_3(%arg0: i32) -> (i32, i32) {
    %c1_i32 = arith.constant 1 : i32
    %0 = arith.addi %arg0, %c1_i32 : i32
    %c1_i32_0 = arith.constant 1 : i32
    %1 = arith.muli %0, %c1_i32_0 : i32
    %c3_i32 = arith.constant 3 : i32
    %2 = arith.minsi %1, %c3_i32 : i32
    %c0_i32 = arith.constant 0 : i32
    %c0_i32_1 = arith.constant 0 : i32
    return %c0_i32, %2 : i32, i32
  }
  func.func @transform_4(%arg0: i32) -> (i32, i32, i32) {
    %c0_i32 = arith.constant 0 : i32
    %c0_i32_0 = arith.constant 0 : i32
    %c0_i32_1 = arith.constant 0 : i32
    %c0_i32_2 = arith.constant 0 : i32
    return %c0_i32, %c0_i32_0, %c0_i32_1 : i32, i32, i32
  }
  func.func @transform_5(%arg0: i32) -> (i32, i32) {
    %c0_i32 = arith.constant 0 : i32
    %c0_i32_0 = arith.constant 0 : i32
    %c0_i32_1 = arith.constant 0 : i32
    return %c0_i32, %c0_i32_0 : i32, i32
  }
  func.func @transform_6(%arg0: i32) -> (i32, i32) {
    %c0_i32 = arith.constant 0 : i32
    %c0_i32_0 = arith.constant 0 : i32
    return %c0_i32, %arg0 : i32, i32
  }
  func.func @transform_7(%arg0: i32) -> (i32, i32, i32) {
    %c0_i32 = arith.constant 0 : i32
    %c0_i32_0 = arith.constant 0 : i32
    %c0_i32_1 = arith.constant 0 : i32
    return %arg0, %c0_i32, %c0_i32_0 : i32, i32, i32
  }
  func.func @transform_8(%arg0: i32) -> (i32, i32, i32) {
    %c0_i32 = arith.constant 0 : i32
    %c0_i32_0 = arith.constant 0 : i32
    %c0_i32_1 = arith.constant 0 : i32
    return %arg0, %c0_i32, %c0_i32_0 : i32, i32, i32
  }
}

</mosaic_0001>

<bundles_post_ra>
// kernel: residual_block_pallas.5
= control target key start
LH: loop header
LB: loop body
LE: loop exit
PB: predicated region body
PF: predicated region fallthrough
CT: control target
= control target key end

     0   :  { %s568_s12 = smov 0   ;;  %s570_s13 = smov 0   ;;  %s663_s0 = inlined_call_operand.vmem [shape: f32[32,512], index: 0, kind: input, shape index: {}]   ;;  %s664_s1 = inlined_call_operand.vmem [shape: f32[32,512], index: 1, kind: input, shape index: {}]   ;;  %s665_s2 = inlined_call_operand.vmem [shape: f32[32,2], index: 2, kind: input, shape index: {}]   ;;  %s666_s3 = inlined_call_operand.vmem [shape: f32[32,512], index: 3, kind: output, shape index: {}]  }
   0x1   :  { %s572_s14 = smov 0  }
   0x2 LB: > { %s475_s15 = sadd.s32 4294967295, %s544_s14   ;;  %s585_s16 = sadd.s32 1, %s544_s14   ;;  %s544_s14 = sphi %s572_s14, %s671_s14   ;;  %s540_s13 = sphi %s570_s13, %s670_s13   ;;  %s536_s12 = sphi %s568_s12, %s669_s12  }
   0x3   : > { %s17_s17 = ssub.s32 %s544_s14, %s585_s16  ;;  %s20_s18 = sadd.s32 1, %s540_s13 }
   0x4   : > { %p18_p0 = scmp.eq.s32.totalorder %s17_s17, 0  ;;  %p27_p1 = scmp.ne.s32.totalorder %s540_s13, %s536_s12 }
   0x5   : > { %p28_p2 = scmp.eq.s32.totalorder %s544_s14, 0  ;;  %p104_p3 = scmp.eq.s32.totalorder %s475_s15, 3 }
   0x6   : > { %s596_s19 = scalar_select %p18_p0, %s540_s13, %s20_s18  }
   0x7   : > { %p598_p4 = por %p28_p2, %p27_p1  ;;  %p602_p5 = por %p104_p3, %p27_p1 }
   0x8   : > { %p478_p6 = scmp.ge.s32.totalorder %s544_s14, 4 }
   0xa   : > { %129 = sbr.rel (%p478_p6) target bundleno = 31 (0x1f), region = 20 }
   0xf   : > { %132 = sbr.rel (!%p598_p4) target bundleno = 23 (0x17), region = 24  ;;  %s134_s22 = sand.u32 (%p598_p4), 1, %s540_s13  }
  0x10   : > { %s480_s23 = sshll.u32 (%p598_p4), %s544_s14, 3  ;;  %s479_s24 = sshll.u32 (%p598_p4), %s134_s22, 5 }
  0x11   : > { %s138_s27 = scalar_lea.vmem (%p598_p4), %s663_s0, %s480_s23  ;;  %s136_s28 = scalar_lea.vmem (%p598_p4), [#allocation2], %s479_s24 }
  0x12   : > { %v173_v0 = vld [vmem:[%s138_s27] sm:$0xff] (%p598_p4) }
  0x13   : > { %v175_v1 = vld [vmem:[%s138_s27 + $0x20] sm:$0xff] (%p598_p4)  ;;  %174 = vst [vmem:[%s136_s28] sm:$0xff] (%p598_p4), %v173_v0 }
  0x14   : > { %v177_v2 = vld [vmem:[%s138_s27 + $0x40] sm:$0xff]  ;;  %176 = vst [vmem:[%s136_s28 + $0x8] sm:$0xff] %v175_v1 }
  0x15   : > { %v179_v3 = vld [vmem:[%s138_s27 + $0x60] sm:$0xff]  ;;  %178 = vst [vmem:[%s136_s28 + $0x10] sm:$0xff] %v177_v2 }
  0x16   : > { %180 = vst [vmem:[%s136_s28 + $0x18] sm:$0xff] %v179_v3 }
  0x17 PF: > { %186 = sbr.rel (!%p598_p4) target bundleno = 31 (0x1f), region = 62  ;;  %s188_s29 = sand.u32 (%p598_p4), 1, %s540_s13  }
  0x18   : > { %s482_s30 = sshll.u32 (%p598_p4), %s544_s14, 3  ;;  %s481_s4 = sshll.u32 (%p598_p4), %s188_s29, 5 }
  0x19   : > { %s192_s7 = scalar_lea.vmem (%p598_p4), %s664_s1, %s482_s30  ;;  %s190_s8 = scalar_lea.vmem (%p598_p4), [#allocation3], %s481_s4 }
  0x1a   : > { %v227_v4 = vld [vmem:[%s192_s7] sm:$0xff] (%p598_p4) }
  0x1b   : > { %v229_v5 = vld [vmem:[%s192_s7 + $0x20] sm:$0xff] (%p598_p4)  ;;  %228 = vst [vmem:[%s190_s8] sm:$0xff] (%p598_p4), %v227_v4 }
  0x1c   : > { %v231_v6 = vld [vmem:[%s192_s7 + $0x40] sm:$0xff]  ;;  %230 = vst [vmem:[%s190_s8 + $0x8] sm:$0xff] %v229_v5 }
  0x1d   : > { %v233_v7 = vld [vmem:[%s192_s7 + $0x60] sm:$0xff]  ;;  %232 = vst [vmem:[%s190_s8 + $0x10] sm:$0xff] %v231_v6 }
  0x1e   : > { %234 = vst [vmem:[%s190_s8 + $0x18] sm:$0xff] %v233_v7 }
  0x1f PF: > { %p483_p7 = scmp.ge.s32.totalorder %s544_s14, 1  ;;  %p239_p8 = scmp.lt.s32.totalorder %s544_s14, 5 }
  0x21   : > { %p240_p9 = pnand %p483_p7, %p239_p8 }
  0x22   : > { %s246_s24 = sand.u32 (!%p240_p9), 1, %s536_s12  }
  0x23   : > { %243 = sbr.rel (%p240_p9) target bundleno = 190 (0xbe), region = 100  ;;  %s484_s25 = sshll.u32 (!%p240_p9), %s246_s24, 5 }
  0x24   : > { %s248_s26 = scalar_lea.vmem (!%p240_p9), [#allocation2], %s484_s25  ;;  %s255_s27 = scalar_lea.vmem (!%p240_p9), [#allocation3], %s484_s25 }
  0x25   : > { %s636_s28 = scalar_lea.vmem (!%p240_p9), [#allocation4], %s484_s25 }
  0x28   : > { %v281_v8 = vld [vmem:[%s665_s2 + $0x10] sm:$0xff]  ;;  %v279_v9 = vld [vmem:[%s665_s2] sm:$0xff]  ;;  %v546_v10 = vmov 0   ;;  %v547_v11 = vmov 1   ;;  %v282_v12 = vld [vmem:[%s665_s2 + $0x18] sm:$0xff]  ;;  %s488_s12 = sshll.u32 (%p602_p5), %s475_s15, 3 }
  0x29   : > { %518 = vset.pattern.permute.xlu1 %v546_v10  ;;  %517 = vset.pattern.permute.xlu0 %v546_v10  ;;  %v280_v13 = vld [vmem:[%s665_s2 + $0x8] sm:$0xff]  ;;  %v283_v15 = vld [vmem:[%s248_s26] sm:$0xff]  ;;  %v285_v30 = vld [vmem:[%s248_s26 + $0x10] sm:$0xff]  ;;  %s355_s4 = scalar_lea.vmem (%p602_p5), %s666_s3, %s488_s12 }
  0x2a   : > { %299 = vperm.xlu1 %518, %v281_v8   ;;  %289 = vperm.xlu0 %517, %v279_v9   ;;  %v331_v19 = vld [vmem:[%s255_s27] sm:$0xff]  ;;  %v284_v22 = vld [vmem:[%s248_s26 + $0x8] sm:$0xff]  ;;  %v286_v31 = vld [vmem:[%s248_s26 + $0x18] sm:$0xff] }
  0x2b   : > { %519 = vset.pattern.permute.xlu2 %v547_v11  ;;  %v332_v28 = vld [vmem:[%s255_s27 + $0x8] sm:$0xff]  ;;  %v334_v37 = vld [vmem:[%s255_s27 + $0x18] sm:$0xff]  ;;  %v333_v39 = vld [vmem:[%s255_s27 + $0x10] sm:$0xff] }
  0x2c   : > { %312 = vperm.xlu2 %519, %v279_v9  }
  0x32   : > { %304 = vperm.xlu1 %518, %v282_v12   ;;  %294 = vperm.xlu0 %517, %v280_v13  }
  0x34   : > { %316 = vperm.xlu2 %519, %v280_v13  }
  0x3a   : > { %521 = vset.pattern.permute.xlu1 %v547_v11  ;;  %520 = vset.pattern.permute.xlu0 %v547_v11 }
  0x3b   : > { %324 = vperm.xlu1 %521, %v282_v12   ;;  %320 = vperm.xlu0 %520, %v281_v8  }
  0x86   : > { %v313_v14 = vpop.permute.xlu2 %312 }
  0x8e   : > { %v317_v24 = vpop.permute.xlu2 %316 }
  0x9c   : > { %v300_v16 = vpop.permute.xlu1 %299  ;;  %v290_v17 = vpop.permute.xlu0 %289 }
  0x9d   : > { %v307_v18 = vmul.f32 %v290_v17, %v283_v15  ;;  %v309_v34 = vmul.f32 %v300_v16, %v285_v30 }
  0x9f   : > { %v327_v20 = vadd.f32 %v313_v14, %v307_v18 }
  0xa1   : > { %v335_v21 = vadd.f32 %v331_v19, %v327_v20 }
  0xa3   : > { %v339_v23 = vmax.f32 %v335_v21, 0.0 }
  0xa4   : > { %v305_v25 = vpop.permute.xlu1 %304  ;;  %v295_v26 = vpop.permute.xlu0 %294 }
  0xa5   : > { %343 = vst [vmem:[%s636_s28] sm:$0xff] %v339_v23  ;;  %v308_v27 = vmul.f32 %v295_v26, %v284_v22  ;;  %v310_v35 = vmul.f32 %v305_v25, %v286_v31 }
  0xa7   : > { %v328_v29 = vadd.f32 %v317_v24, %v308_v27 }
  0xa9   : > { %v336_v32 = vadd.f32 %v332_v28, %v328_v29 }
  0xab   : > { %v340_v33 = vmax.f32 %v336_v32, 0.0 }
  0xac   : > { %v390_v46 = vld [vmem:[%s636_s28] sm:$0xff] (%p602_p5) }
  0xad   : > { %344 = vst [vmem:[%s636_s28 + $0x8] sm:$0xff] %v340_v33  ;;  %v325_v36 = vpop.permute.xlu1 %324  ;;  %v321_v38 = vpop.permute.xlu0 %320 }
  0xae   : > { %v330_v40 = vadd.f32 %v325_v36, %v310_v35  ;;  %v329_v41 = vadd.f32 %v321_v38, %v309_v34  ;;  %391 = vst [vmem:[%s355_s4] sm:$0xff] (%p602_p5), %v390_v46 }
  0xb0   : > { %v338_v42 = vadd.f32 %v334_v37, %v330_v40  ;;  %v337_v43 = vadd.f32 %v333_v39, %v329_v41 }
  0xb1   : > { %353 = sbr.rel (!%p602_p5) target bundleno = 190 (0xbe), region = 112 }
  0xb2   : > { %v342_v44 = vmax.f32 %v338_v42, 0.0  ;;  %v341_v45 = vmax.f32 %v337_v43, 0.0 }
  0xb4   : > { %346 = vst [vmem:[%s636_s28 + $0x18] sm:$0xff] %v342_v44  ;;  %v392_v47 = vld [vmem:[%s636_s28 + $0x8] sm:$0xff] (%p602_p5) }
  0xb5   : > { %345 = vst [vmem:[%s636_s28 + $0x10] sm:$0xff] %v341_v45 }
  0xb6   : > { %393 = vst [vmem:[%s355_s4 + $0x20] sm:$0xff] %v392_v47 }
  0xbb   : > { %v396_v49 = vld [vmem:[%s636_s28 + $0x18] sm:$0xff] }
  0xbc   : > { %v394_v48 = vld [vmem:[%s636_s28 + $0x10] sm:$0xff]  ;;  %397 = vst [vmem:[%s355_s4 + $0x60] sm:$0xff] %v396_v49 }
  0xbd   : > { %395 = vst [vmem:[%s355_s4 + $0x40] sm:$0xff] %v394_v48 }
  0xbe PF: > { %p10_p10 = scmp.ge.s32.totalorder %s585_s16, 6   ;;  %s669_s12 = smov %s540_s13 }
  0xbf   : > { %s670_s13 = smov %s596_s19  ;;  %s671_s14 = smov %s585_s16 }
  0xc0   :  { %12 = sbr.rel (!%p10_p10) target bundleno = 2 (0x2), region = 189 }

// kernel: residual_block_pallas.4
= control target key start
LH: loop header
LB: loop body
LE: loop exit
PB: predicated region body
PF: predicated region fallthrough
CT: control target
= control target key end

     0   :  { %s2457_s0 = inlined_call_operand.vmem [shape: bf16[9,512], index: 0, kind: input, shape index: {}]   ;;  %s2458_s1 = inlined_call_operand.vmem [shape: f32[32,512], index: 1, kind: input, shape index: {}, may-alias: {1,2,3}]   ;;  %s2459_s2 = inlined_call_operand.vmem [shape: f32[32,512], index: 2, kind: input, shape index: {}, may-alias: {1,2,3}]   ;;  %s2460_s3 = inlined_call_operand.vmem [shape: f32[32,512], index: 3, kind: input, shape index: {}, may-alias: {1,2,3}]   ;;  %s2461_s4 = inlined_call_operand.vmem [shape: bf16[9,32,32], index: 4, kind: input, shape index: {}]   ;;  %s2462_s5 = inlined_call_operand.vmem [shape: f32[32,2], index: 5, kind: input, shape index: {}]   ;;  %s2463_s6 = inlined_call_operand.vmem [shape: f32[32,512], index: 6, kind: output, shape index: {0}]   ;;  %s2464_s7 = inlined_call_operand.vmem [shape: f32[4,32,1], index: 7, kind: output, shape index: {1}]   ;;  %s2465_s8 = inlined_call_operand.vmem [shape: f32[4,32,1], index: 8, kind: output, shape index: {2}]  }
   0x1   :  { %2469 = sst [smem:[#allocation13_spill]] %s2463_s6 }
   0x2   :  { %2470 = sst [smem:[#allocation14_spill]] %s2464_s7 }
   0x3   :  { %2471 = sst [smem:[#allocation15_spill]] %s2465_s8 }
   0x4   :  { %s2075_s27 = smov 0   ;;  %s2077_s28 = smov 0  }
   0x5   :  { %s2079_s29 = smov 0   ;;  %s2081_s30 = smov 0  }
   0x6   :  { %s2083_s9 = smov 0   ;;  %s2085_s10 = smov 0  }
   0x7   :  { %s2087_s11 = smov 0  }
   0x8 LB: > { %s2111_s12 = sadd.s32 4294967295, %s2018_s11   ;;  %s2114_s13 = sadd.s32 1, %s2018_s11   ;;  %s2018_s11 = sphi %s2087_s11, %s2485_s11   ;;  %s2014_s10 = sphi %s2085_s10, %s2494_s10   ;;  %s2010_s9 = sphi %s2083_s9, %s2493_s9   ;;  %s2006_s30 = sphi %s2081_s30, %s2492_s30   ;;  %s2002_s29 = sphi %s2079_s29, %s2491_s29   ;;  %s1998_s28 = sphi %s2077_s28, %s2490_s28   ;;  %s1994_s27 = sphi %s2075_s27, %s2489_s27  }
   0x9   : > { %2472 = sst [smem:[#allocation8_spill]] %s2114_s13  ;;  %s23_s14 = ssub.s32 %s2018_s11, %s2114_s13 }
   0xa   : > { %s26_s15 = sadd.s32 1, %s2014_s10  ;;  %p24_p0 = scmp.eq.s32.totalorder %s23_s14, 0 }
   0xb   : > { %p33_p1 = scmp.ne.s32.totalorder %s2014_s10, %s2010_s9  ;;  %p34_p2 = scmp.eq.s32.totalorder %s2018_s11, 0 }
   0xc   : > { %p50_p3 = scmp.gt.s32.totalorder %s2111_s12, 0  ;;  %s1714_s18 = sadd.s32 4294967295, %s2114_s13 }
   0xd   : > { %s2124_s16 = scalar_select %p24_p0, %s2014_s10, %s26_s15  }
   0xe   : > { %p2131_p4 = por %p34_p2, %p33_p1  ;;  %p53_p5 = scmp.gt.s32.totalorder %s1714_s18, 0 }
   0xf   : > { %2473 = sst [smem:[#allocation9_spill]] %s2124_s16  ;;  %s58_s20 = sadd.s32 1, %s2006_s30 }
  0x10   : > { %s2137_s19 = scalar_select %p50_p3, %s2111_s12, 0 }
  0x11   : > { %p65_p6 = scmp.ne.s32.totalorder %s2006_s30, %s2002_s29  ;;  %p108_p7 = scmp.lt.s32.totalorder %s2114_s13, 3 }
  0x12   : > { %s2496_s18 = smov (!%p53_p5, %s1714_s18), 0  ;;  %s110_s22 = sadd.s32 1, %s2114_s13 }
  0x13   : > { %p2145_p8 = por %p65_p6, %p34_p2  ;;  %s55_s23 = ssub.s32 %s2137_s19, %s2496_s18 }
  0x14   : > { %p111_p9 = scmp.lt.s32.totalorder %s110_s22, 3  ;;  %p56_p10 = scmp.eq.s32.totalorder %s55_s23, 0 }
  0x15   : > { %s2152_s24 = scalar_select %p108_p7, %s2114_s13, 3 }
  0x16   : > { %s2155_s25 = scalar_select %p56_p10, %s2006_s30, %s58_s20  }
  0x17   : > { %s2498_s22 = smov (!%p111_p9, %s110_s22), 3  ;;  %p123_p11 = scmp.ne.s32.totalorder %s1998_s28, %s1994_s27 }
  0x18   : > { %2476 = sst [smem:[#allocation10_spill]] %s2155_s25  ;;  %p195_p12 = scmp.eq.s32.totalorder %s2111_s12, 3 }
  0x19   : > { %s113_s26 = ssub.s32 %s2152_s24, %s2498_s22  ;;  %s116_s14 = sadd.s32 1, %s1998_s28 }
  0x1a   : > { %p114_p13 = scmp.eq.s32.totalorder %s113_s26, 0  ;;  %p2164_p0 = por %p123_p11, %p34_p2 }
  0x1b   : > { %p2171_p3 = por %p195_p12, %p33_p1  ;;  %p1716_p5 = scmp.ge.s32.totalorder %s2018_s11, 4 }
  0x1c   : > { %s2176_s23 = scalar_select %p114_p13, %s1998_s28, %s116_s14  }
  0x1d   : > { %s2478_s18 = scalar_select %p2171_p3, 1, 0 }
  0x1e   : > { %2480 = sst [smem:[#allocation12_spill]] %s2176_s23  ;;  %275 = sbr.rel (%p1716_p5) target bundleno = 65 (0x41), region = 24 }
  0x1f   : > { %2479 = sst [smem:[#allocation11_spill]] %s2478_s18 }
  0x23   : > { %278 = sbr.rel (!%p2131_p4) target bundleno = 41 (0x29), region = 28  ;;  %s280_s20 = sand.u32 (%p2131_p4), 1, %s2014_s10  }
  0x24   : > { %s1718_s22 = sshll.u32 (%p2131_p4), %s2018_s11, 2  ;;  %s1717_s26 = sshll.u32 (%p2131_p4), %s280_s20, 3 }
  0x25   : > { %s284_s13 = scalar_lea.vmem (%p2131_p4), %s2457_s0, %s1718_s22  ;;  %s282_s6 = scalar_lea.vmem (%p2131_p4), [#allocation3], %s1717_s26 }
  0x26   : > { %v301_v0 = vld [vmem:[%s284_s13] sm:$0xf] (%p2131_p4)  ;;  %v303_v1 = vld [vmem:[%s284_s13 + $0x10] sm:$0xf] (%p2131_p4) }
  0x27   : > { %302 = vst [vmem:[%s282_s6] sm:$0xf] (%p2131_p4), %v301_v0 }
  0x28   : > { %304 = vst [vmem:[%s282_s6 + $0x4] sm:$0xf] %v303_v1 }
  0x29 PF: > { %332 = sbr.rel (!%p2145_p8) target bundleno = 49 (0x31), region = 69  ;;  %s334_s14 = sand.u32 (%p2145_p8), 1, %s2006_s30  }
  0x2a   : > { %s1721_s23 = sshll.u32 (%p2145_p8), %s2137_s19, 3  ;;  %s1719_s18 = sshll.u32 (%p2145_p8), %s334_s14, 5 }
  0x2b   : > { %s341_s7 = scalar_lea.vmem (%p2145_p8), %s2458_s1, %s1721_s23  ;;  %s336_s13 = scalar_lea.vmem (%p2145_p8), [#allocation4], %s1719_s18 }
  0x2c   : > { %v376_v2 = vld [vmem:[%s341_s7] sm:$0xff] (%p2145_p8) }
  0x2d   : > { %v378_v3 = vld [vmem:[%s341_s7 + $0x20] sm:$0xff] (%p2145_p8)  ;;  %377 = vst [vmem:[%s336_s13] sm:$0xff] (%p2145_p8), %v376_v2 }
  0x2e   : > { %v380_v4 = vld [vmem:[%s341_s7 + $0x40] sm:$0xff]  ;;  %379 = vst [vmem:[%s336_s13 + $0x8] sm:$0xff] %v378_v3 }
  0x2f   : > { %v382_v5 = vld [vmem:[%s341_s7 + $0x60] sm:$0xff]  ;;  %381 = vst [vmem:[%s336_s13 + $0x10] sm:$0xff] %v380_v4 }
  0x30   : > { %383 = vst [vmem:[%s336_s13 + $0x18] sm:$0xff] %v382_v5 }
  0x31 PF: > { %389 = sbr.rel (!%p2131_p4) target bundleno = 57 (0x39), region = 107  ;;  %s391_s6 = sand.u32 (%p2131_p4), 1, %s2014_s10  }
  0x32   : > { %s1723_s16 = sshll.u32 (%p2131_p4), %s2018_s11, 3  ;;  %s1722_s19 = sshll.u32 (%p2131_p4), %s391_s6, 5 }
  0x33   : > { %s395_s25 = scalar_lea.vmem (%p2131_p4), %s2459_s2, %s1723_s16  ;;  %s393_s7 = scalar_lea.vmem (%p2131_p4), [#allocation5], %s1722_s19 }
  0x34   : > { %v430_v6 = vld [vmem:[%s395_s25] sm:$0xff] (%p2131_p4) }
  0x35   : > { %v432_v7 = vld [vmem:[%s395_s25 + $0x20] sm:$0xff] (%p2131_p4)  ;;  %431 = vst [vmem:[%s393_s7] sm:$0xff] (%p2131_p4), %v430_v6 }
  0x36   : > { %v434_v8 = vld [vmem:[%s395_s25 + $0x40] sm:$0xff]  ;;  %433 = vst [vmem:[%s393_s7 + $0x8] sm:$0xff] %v432_v7 }
  0x37   : > { %v436_v9 = vld [vmem:[%s395_s25 + $0x60] sm:$0xff]  ;;  %435 = vst [vmem:[%s393_s7 + $0x10] sm:$0xff] %v434_v8 }
  0x38   : > { %437 = vst [vmem:[%s393_s7 + $0x18] sm:$0xff] %v436_v9 }
  0x39 PF: > { %443 = sbr.rel (!%p2164_p0) target bundleno = 65 (0x41), region = 145  ;;  %s445_s17 = sand.u32 (%p2164_p0), 1, %s1998_s28  }
  0x3a   : > { %s1725_s18 = sshll.u32 (%p2164_p0), %s2152_s24, 3  ;;  %s1724_s23 = sshll.u32 (%p2164_p0), %s445_s17, 5 }
  0x3b   : > { %s452_s14 = scalar_lea.vmem (%p2164_p0), %s2460_s3, %s1725_s18  ;;  %s447_s20 = scalar_lea.vmem (%p2164_p0), [#allocation6], %s1724_s23 }
  0x3c   : > { %v487_v10 = vld [vmem:[%s452_s14] sm:$0xff] (%p2164_p0) }
  0x3d   : > { %v489_v11 = vld [vmem:[%s452_s14 + $0x20] sm:$0xff] (%p2164_p0)  ;;  %488 = vst [vmem:[%s447_s20] sm:$0xff] (%p2164_p0), %v487_v10 }
  0x3e   : > { %v491_v12 = vld [vmem:[%s452_s14 + $0x40] sm:$0xff]  ;;  %490 = vst [vmem:[%s447_s20 + $0x8] sm:$0xff] %v489_v11 }
  0x3f   : > { %v493_v13 = vld [vmem:[%s452_s14 + $0x60] sm:$0xff]  ;;  %492 = vst [vmem:[%s447_s20 + $0x10] sm:$0xff] %v491_v12 }
  0x40   : > { %494 = vst [vmem:[%s447_s20 + $0x18] sm:$0xff] %v493_v13 }
  0x41 PF: > { %p1726_p1 = scmp.ge.s32.totalorder %s2018_s11, 1  ;;  %p499_p2 = scmp.lt.s32.totalorder %s2018_s11, 5 }
  0x43   : > { %p500_p4 = pnand %p1726_p1, %p499_p2 }
  0x44   : > { %s506_s13 = sand.u32 (!%p500_p4), 1, %s2010_s9   ;;  %s2022_s17 = smov (!%p500_p4), 112  }
  0x45   : > { %503 = sbr.rel (%p500_p4) target bundleno = 707 (0x2c3), region = 183  ;;  %s1727_s19 = sshll.u32 (!%p500_p4), %s506_s13, 3 }
  0x46   : > { %s2218_s11 = scalar_lea.vmem (!%p500_p4), [#allocation3], %s1727_s19  ;;  %s2023_s18 = smov (!%p500_p4), 113  }
  0x47   : > { %s2024_s23 = smov (!%p500_p4), 111   ;;  %s2025_s22 = smov (!%p500_p4), 127  }
  0x48   : > { %s2026_s26 = smov (!%p500_p4), 16   ;;  %s2027_s14 = smov (!%p500_p4), 15  }
  0x49   : > { %s2028_s20 = smov (!%p500_p4), 17   ;;  %s2029_s24 = smov (!%p500_p4), 1  }
  0x4a   : > { %v600_v14 = vld [vmem:[%s2462_s5 + $0x10] sm:$0xff]  ;;  %v2020_v15 = vmov 1   ;;  %v2021_v16 = vmov 0   ;;  %v598_v17 = vld [vmem:[%s2462_s5] sm:$0xff]  ;;  %v601_v20 = vld [vmem:[%s2462_s5 + $0x18] sm:$0xff]  ;;  %s513_s15 = sand.u32 1, %s2002_s29  }
  0x4b   : > { %1961 = vset.pattern.permute.xlu1 %v2020_v15  ;;  %1960 = vset.pattern.permute.xlu0 %v2021_v16  ;;  %v714_v18 = vld [vmem:[%s2218_s11] sm:$0x1]  ;;  %v599_v22 = vld [vmem:[%s2462_s5 + $0x8] sm:$0xff]  ;;  %v879_v23 = vld [vmem:[%s2218_s11] sm:$0x2]  ;;  %s527_s6 = sand.u32 1, %s1994_s27  }
  0x4c   : > { %639 = vperm.xlu1 %1961, %v600_v14   ;;  %618 = vperm.xlu0 %1960, %v600_v14   ;;  %v748_v19 = vshrl.u32 %v714_v18, 16  ;;  %v962_v25 = vshrl.u32 %v879_v23, 16  ;;  %v881_v26 = vpack.i.b16 %v879_v23, %v879_v23  ;;  %v716_v27 = vpack.i.b16 %v714_v18, %v714_v18  ;;  %v1200_v28 = vld [vmem:[%s2218_s11] sm:$0x8]  ;;  %v1365_v35 = vld [vmem:[%s2218_s11 + $0x4] sm:$0x1] }
  0x4d   : > { %1962 = vset.pattern.permute.xlu2 %v2021_v16  ;;  %v1283_v32 = vshrl.u32 %v1200_v28, 16  ;;  %v1202_v39 = vpack.i.b16 %v1200_v28, %v1200_v28  ;;  %v1108_v40 = vld [vmem:[%s2218_s11] sm:$0x4]  ;;  %v1367_v42 = vpack.i.b16 %v1365_v35, %v1365_v35  ;;  %s2243_s16 = sshll.u32 %s506_s13, 5  ;;  %s1728_s19 = sshll.u32 %s513_s15, 5  ;;  %vm796_vm0 = vcmask 130048  }
  0x4e   : > { %608 = vperm.xlu2 %1962, %v598_v17   ;;  %v749_v21 = vpack.i.b16 %v748_v19, %v748_v19  ;;  %v963_v30 = vpack.i.b16 %v962_v25, %v962_v25  ;;  %v883_v31 = vperm.slane %v881_v26, 1  ;;  %v718_v33 = vperm.slane %v716_v27, 0  ;;  %s1730_s11 = sshll.u32 %s527_s6, 5  ;;  %s2245_s8 = scalar_lea.vmem [#allocation4], %s1728_s19 }
  0x4f   : > { %v1284_v37 = vpack.i.b16 %v1283_v32, %v1283_v32  ;;  %v1110_v44 = vshrl.u32 %v1108_v40, 16  ;;  %v1204_v45 = vperm.slane %v1202_v39, 3  ;;  %v1369_v46 = vperm.slane %v1367_v42, 0  ;;  %v604_v53 = vld [vmem:[%s2245_s8 + $0x10] sm:$0xff]  ;;  %s2249_s21 = scalar_lea.vmem [#allocation5], %s2243_s16  ;;  %s2252_s25 = scalar_lea.vmem [#allocation6], %s1730_s11 }
  0x50   : > { %v751_v24 = vperm.slane %v749_v21, 0  ;;  %v965_v34 = vperm.slane %v963_v30, 1  ;;  %v884_v36 = vunpack.c.l.bf16 %v883_v31  ;;  %v727_v38 = vunpack.c.l.bf16 %v718_v33  ;;  %v664_v54 = vld [vmem:[%s2249_s21 + $0x10] sm:$0xff]  ;;  %v605_v4 = vld [vmem:[%s2245_s8 + $0x18] sm:$0xff]  ;;  %v663_v16 = vld [vmem:[%s2249_s21 + $0x8] sm:$0xff]  ;;  %s2403_s11 = scalar_lea.vmem [#allocation7], %s2243_s16 }
  0x51   : > { %v1286_v43 = vperm.slane %v1284_v37, 3  ;;  %v1111_v48 = vpack.i.b16 %v1110_v44, %v1110_v44  ;;  %v1205_v49 = vunpack.c.l.bf16 %v1204_v45  ;;  %v1370_v50 = vunpack.c.l.bf16 %v1369_v46  ;;  %v688_v55 = vld [vmem:[%s2252_s25 + $0x10] sm:$0xff]  ;;  %v665_v5 = vld [vmem:[%s2249_s21 + $0x18] sm:$0xff]  ;;  %v602_v21 = vld [vmem:[%s2245_s8] sm:$0xff]  ;;  %p587_p6 = scmp.lt.s32.totalorder %s2111_s12, 3  ;;  %s2481_s27 = sld [smem:[#allocation14_spill]] }
  0x52   : > { %v752_v29 = vunpack.c.l.bf16 %v751_v24  ;;  %v966_v41 = vunpack.c.l.bf16 %v965_v34  ;;  %v689_v6 = vld [vmem:[%s2252_s25 + $0x18] sm:$0xff]  ;;  %v686_v23 = vld [vmem:[%s2252_s25] sm:$0xff]  ;;  %vm801_vm1 = vcmask 261120   ;;  %vm849_vm2 = vcmask 138240   ;;  %s2482_s7 = sld [smem:[#allocation15_spill]] }
  0x53   : > { %v1287_v47 = vunpack.c.l.bf16 %v1286_v43  ;;  %v1113_v51 = vperm.slane %v1111_v48, 2  ;;  %vm928_vm3 = vcmask 121856   ;;  %vm1010_vm4 = vcmask 7168   ;;  %s588_s16 = scalar_select %p587_p6, %s2111_s12, 3 }
  0x54   : > { %643 = vperm.xlu1 %1961, %v601_v20   ;;  %623 = vperm.xlu0 %1960, %v601_v20   ;;  %v687_v20 = vld [vmem:[%s2252_s25 + $0x8] sm:$0xff]  ;;  %vm1166_vm5 = vcmask 1039360   ;;  %vm1249_vm6 = vcmask 924672   ;;  %vm1331_vm7 = vcmask 916480   ;;  %vm1414_vm8 = vcmask 908288  }
  0x55   : > { %v1122_v52 = vunpack.c.l.bf16 %v1113_v51 }
  0x56   : > { %613 = vperm.xlu2 %1962, %v599_v22  }
  0x5c   : > { %1963 = vset.pattern.permute.xlu0 %v2020_v15  ;;  %635 = vperm.xlu1 %1961, %v599_v22   ;;  %v603_v15 = vld [vmem:[%s2245_s8 + $0x8] sm:$0xff]  ;;  %v662_v22 = vld [vmem:[%s2249_s21] sm:$0xff]  ;;  %s1870_s8 = sshll.u32 %s588_s16, 5 }
  0x5d   : > { %631 = vperm.xlu0 %1963, %v598_v17   ;;  %s591_s29 = scalar_lea.vmem %s2481_s27, %s1870_s8 }
  0x5e   : > { %754 = vrot.lane.b32.xlu2 %v752_v29, %s2022_s17 }
  0x64   : > { %886 = vrot.lane.b32.xlu1 %v884_v36, %s2023_s18 }
  0x65   : > { %729 = vrot.lane.b32.xlu0 %v727_v38, %s2024_s23 }
  0x66   : > { %968 = vrot.lane.b32.xlu2 %v966_v41, %s2025_s22 }
  0x6c   : > { %1289 = vrot.lane.b32.xlu1 %v1287_v47, %s2026_s26 }
  0x6d   : > { %1207 = vrot.lane.b32.xlu0 %v1205_v49, %s2027_s14 }
  0x6e   : > { %1372 = vrot.lane.b32.xlu2 %v1370_v50, %s2028_s20 }
  0x74   : > { %1124 = vrot.lane.b32.xlu1 %v1122_v52, %s2029_s24 }
  0xa8   : > { %v609_v61 = vpop.permute.xlu2 %608 }
  0xa9   : > { %v626_v34 = vmul.f32 %v609_v61, %v602_v21  ;;  %v666_v35 = vmul.f32 %v662_v22, %v609_v61  ;;  %v690_v36 = vmul.f32 %v686_v23, %v609_v61 }
  0xb0   : > { %v614_v24 = vpop.permute.xlu2 %613 }
  0xb1   : > { %v627_v28 = vmul.f32 %v614_v24, %v603_v15  ;;  %v667_v29 = vmul.f32 %v663_v16, %v614_v24  ;;  %v691_v30 = vmul.f32 %v687_v20, %v614_v24 }
  0xbe   : > { %v640_v56 = vpop.permute.xlu1 %639  ;;  %v619_v57 = vpop.permute.xlu0 %618 }
  0xbf   : > { %v628_v58 = vmul.f32 %v619_v57, %v604_v53  ;;  %v668_v59 = vmul.f32 %v664_v54, %v619_v57  ;;  %v692_v60 = vmul.f32 %v688_v55, %v619_v57 }
  0xc1   : > { %v648_v62 = vadd.f32 %v640_v56, %v628_v58  ;;  %v672_v63 = vadd.f32 %v668_v59, %v640_v56  ;;  %v696_v0 = vadd.f32 %v692_v60, %v640_v56 }
  0xc3   : > { %v652_v1 = vmax.f32 %v648_v62, 0.0  ;;  %v676_v2 = vmax.f32 %v672_v63, 0.0  ;;  %v700_v3 = vmax.f32 %v696_v0, 0.0  ;;  %v755_v63 = vpop.permute.xlu2 %754 }
  0xc5   : > { %v656_v7 = vpack.c.bf16 %v652_v1, %v652_v1  ;;  %v680_v8 = vpack.c.bf16 %v676_v2, %v676_v2  ;;  %v704_v9 = vpack.c.bf16 %v700_v3, %v700_v3 }
  0xc6   : > { %v644_v10 = vpop.permute.xlu1 %643  ;;  %v624_v11 = vpop.permute.xlu0 %623 }
  0xc7   : > { %660 = vst [vmem:[#allocation2 + $0x18] sm:$0xf] %v656_v7  ;;  %v629_v12 = vmul.f32 %v624_v11, %v605_v4  ;;  %v669_v13 = vmul.f32 %v665_v5, %v624_v11  ;;  %v693_v14 = vmul.f32 %v689_v6, %v624_v11 }
  0xc8   : > { %684 = vst [vmem:[#allocation2 + $0x1c] sm:$0xf] %v680_v8 }
  0xc9   : > { %708 = vst [vmem:[#allocation2 + $0x20] sm:$0xf] %v704_v9  ;;  %v649_v17 = vadd.f32 %v644_v10, %v629_v12  ;;  %v673_v18 = vadd.f32 %v669_v13, %v644_v10  ;;  %v697_v19 = vadd.f32 %v693_v14, %v644_v10 }
  0xcb   : > { %v653_v25 = vmax.f32 %v649_v17, 0.0  ;;  %v677_v26 = vmax.f32 %v673_v18, 0.0  ;;  %v701_v27 = vmax.f32 %v697_v19, 0.0  ;;  %v969_v23 = vpop.permute.xlu2 %968 }
  0xcd   : > { %v657_v31 = vpack.c.bf16 %v653_v25, %v653_v25  ;;  %v681_v32 = vpack.c.bf16 %v677_v26, %v677_v26  ;;  %v705_v33 = vpack.c.bf16 %v701_v27, %v701_v27 }
  0xce   : > { %v636_v37 = vpop.permute.xlu1 %635 }
  0xcf   : > { %661 = vst [vmem:[#allocation2 + $0x24] sm:$0xf] %v657_v31  ;;  %v647_v38 = vadd.f32 %v636_v37, %v627_v28  ;;  %v671_v39 = vadd.f32 %v667_v29, %v636_v37  ;;  %v695_v40 = vadd.f32 %v691_v30, %v636_v37  ;;  %v632_v41 = vpop.permute.xlu0 %631  ;;  %v712_v54 = vld [vmem:[#allocation2 + $0x18] sm:$0xff] }
  0xd0   : > { %685 = vst [vmem:[#allocation2 + $0x28] sm:$0xf] %v681_v32  ;;  %v646_v42 = vadd.f32 %v632_v41, %v626_v34  ;;  %v670_v43 = vadd.f32 %v666_v35, %v632_v41  ;;  %v694_v44 = vadd.f32 %v690_v36, %v632_v41  ;;  %v724_v58 = vunpack.c.h.bf16 %v712_v54 }
  0xd1   : > { %709 = vst [vmem:[#allocation2 + $0x2c] sm:$0xf] %v705_v33  ;;  %v651_v45 = vmax.f32 %v647_v38, 0.0  ;;  %v675_v46 = vmax.f32 %v671_v39, 0.0  ;;  %v699_v47 = vmax.f32 %v695_v40, 0.0  ;;  %v723_v59 = vunpack.c.l.bf16 %v712_v54 }
  0xd2   : > { %v650_v48 = vmax.f32 %v646_v42, 0.0  ;;  %v674_v49 = vmax.f32 %v670_v43, 0.0  ;;  %v698_v50 = vmax.f32 %v694_v44, 0.0  ;;  %v762_v0 = vmul.f32 %v755_v63, %v724_v58 }
  0xd3   : > { %v655_v51 = vpack.c.bf16 %v651_v45, %v651_v45  ;;  %v679_v52 = vpack.c.bf16 %v675_v46, %v675_v46  ;;  %v703_v53 = vpack.c.bf16 %v699_v47, %v699_v47  ;;  %v761_v2 = vmul.f32 %v755_v63, %v723_v59 }
  0xd4   : > { %v654_v55 = vpack.c.bf16 %v650_v48, %v650_v48  ;;  %v678_v56 = vpack.c.bf16 %v674_v49, %v674_v49  ;;  %v702_v57 = vpack.c.bf16 %v698_v50, %v698_v50  ;;  %v975_v29 = vmul.f32 %v969_v23, %v723_v59  ;;  %v1106_v49 = vld [vmem:[#allocation2 + $0x1c] sm:$0xff] }
  0xd5   : > { %659 = vst [vmem:[#allocation2 + $0xc] sm:$0xf] %v655_v51  ;;  %v976_v38 = vmul.f32 %v969_v23, %v724_v58 }
  0xd6   : > { %683 = vst [vmem:[#allocation2 + $0x10] sm:$0xf] %v679_v52  ;;  %v887_v9 = vpop.permute.xlu1 %886 }
  0xd7   : > { %707 = vst [vmem:[#allocation2 + $0x14] sm:$0xf] %v703_v53  ;;  %v713_v60 = vld [vmem:[#allocation2 + $0x24] sm:$0xff]  ;;  %v894_v16 = vmul.f32 %v887_v9, %v724_v58  ;;  %v730_v20 = vpop.permute.xlu0 %729  ;;  %v893_v28 = vmul.f32 %v887_v9, %v723_v59 }
  0xd8   : > { %658 = vst [vmem:[#allocation2] sm:$0xf] %v654_v55  ;;  %v726_v61 = vunpack.c.h.bf16 %v713_v60  ;;  %v725_v62 = vunpack.c.l.bf16 %v713_v60  ;;  %v736_v24 = vmul.f32 %v730_v20, %v723_v59  ;;  %v737_v36 = vmul.f32 %v730_v20, %v724_v58  ;;  %v1107_v50 = vld [vmem:[#allocation2 + $0x28] sm:$0xff] }
  0xd9   : > { %682 = vst [vmem:[#allocation2 + $0x4] sm:$0xf] %v678_v56  ;;  %v2282_v55 = vunpack.c.h.bf16 %v1106_v49  ;;  %v1121_v56 = vunpack.c.h.bf16 %v1107_v50 }
  0xda   : > { %706 = vst [vmem:[#allocation2 + $0x8] sm:$0xf] %v702_v57  ;;  %v764_v1 = vmul.f32 %v755_v63, %v726_v61  ;;  %v763_v3 = vmul.f32 %v755_v63, %v725_v62  ;;  %v896_v11 = vmul.f32 %v887_v9, %v726_v61  ;;  %v738_v25 = vmul.f32 %v730_v20, %v725_v62 }
  0xdb   : > { %v895_v26 = vmul.f32 %v887_v9, %v725_v62  ;;  %v977_v27 = vmul.f32 %v969_v23, %v725_v62  ;;  %v978_v35 = vmul.f32 %v969_v23, %v726_v61  ;;  %v739_v37 = vmul.f32 %v730_v20, %v726_v61 }
  0xdc   : > { %v768_v4 = vpack.c.bf16 %v764_v1, %v762_v0  ;;  %v767_v5 = vpack.c.bf16 %v763_v3, %v761_v2  ;;  %v900_v19 = vpack.c.bf16 %v896_v11, %v894_v16  ;;  %v742_v30 = vpack.c.bf16 %v738_v25, %v736_v24 }
  0xdd   : > { %v711_v6 = vld [vmem:[#allocation2 + $0xc] sm:$0xff]  ;;  %v899_v31 = vpack.c.bf16 %v895_v26, %v893_v28  ;;  %v981_v32 = vpack.c.bf16 %v977_v27, %v975_v29  ;;  %v982_v40 = vpack.c.bf16 %v978_v35, %v976_v38  ;;  %v743_v41 = vpack.c.bf16 %v739_v37, %v737_v36  ;;  %v1373_v38 = vpop.permute.xlu2 %1372 }
  0xde   : > { %794 = vrot.lane.b32.xlu2 %v768_v4, %s2026_s26  ;;  %792 = vrot.lane.b32.xlu1 %v767_v5, %s2026_s26  ;;  %v2266_v7 = vunpack.c.h.bf16 %v711_v6  ;;  %v721_v8 = vunpack.c.l.bf16 %v711_v6  ;;  %v2279_v48 = vpop.permute.xlu1 %1289  ;;  %v1118_v3 = vunpack.c.l.bf16 %v1106_v49  ;;  %v1120_v4 = vunpack.c.l.bf16 %v1107_v50 }
  0xdf   : > { %v1208_v52 = vpop.permute.xlu0 %1207 }
  0xe0   : > { %v710_v10 = vld [vmem:[#allocation2] sm:$0xff]  ;;  %v760_v13 = vmul.f32 %v755_v63, %v2266_v7  ;;  %v759_v15 = vmul.f32 %v755_v63, %v721_v8  ;;  %v892_v34 = vmul.f32 %v887_v9, %v2266_v7  ;;  %v734_v43 = vmul.f32 %v730_v20, %v721_v8 }
  0xe1   : > { %v720_v12 = vunpack.c.h.bf16 %v710_v10  ;;  %v719_v14 = vunpack.c.l.bf16 %v710_v10  ;;  %v891_v45 = vmul.f32 %v887_v9, %v721_v8  ;;  %v973_v47 = vmul.f32 %v969_v23, %v721_v8  ;;  %v1104_v11 = vld [vmem:[#allocation2 + $0x4] sm:$0xff] }
  0xe2   : > { %v1215_v57 = vmul.f32 %v1208_v52, %v2282_v55  ;;  %v1217_v58 = vmul.f32 %v1208_v52, %v1121_v56  ;;  %v974_v60 = vmul.f32 %v969_v23, %v2266_v7  ;;  %v735_v62 = vmul.f32 %v730_v20, %v2266_v7 }
  0xe3   : > { %v758_v17 = vmul.f32 %v755_v63, %v720_v12  ;;  %v757_v18 = vmul.f32 %v755_v63, %v719_v14  ;;  %v890_v33 = vmul.f32 %v887_v9, %v720_v12  ;;  %v732_v42 = vmul.f32 %v730_v20, %v719_v14 }
  0xe4   : > { %v889_v44 = vmul.f32 %v887_v9, %v719_v14  ;;  %v971_v46 = vmul.f32 %v969_v23, %v719_v14  ;;  %v972_v59 = vmul.f32 %v969_v23, %v720_v12  ;;  %v733_v61 = vmul.f32 %v730_v20, %v720_v12  ;;  %v1105_v12 = vld [vmem:[#allocation2 + $0x10] sm:$0xff] }
  0xe5   : > { %v766_v21 = vpack.c.bf16 %v760_v13, %v758_v17  ;;  %v765_v22 = vpack.c.bf16 %v759_v15, %v757_v18  ;;  %v898_v39 = vpack.c.bf16 %v892_v34, %v890_v33  ;;  %v740_v51 = vpack.c.bf16 %v734_v43, %v732_v42 }
  0xe6   : > { %926 = vrot.lane.b32.xlu1 %v900_v19, %s2027_s14  ;;  %v897_v53 = vpack.c.bf16 %v891_v45, %v889_v44  ;;  %v979_v54 = vpack.c.bf16 %v973_v47, %v971_v46  ;;  %v1221_v63 = vpack.c.bf16 %v1217_v58, %v1215_v57  ;;  %v1125_v0 = vpop.permute.xlu1 %1124  ;;  %v980_v1 = vpack.c.bf16 %v974_v60, %v972_v59 }
  0xe7   : > { %790 = vrot.lane.b32.xlu0 %v766_v21, %s2026_s26  ;;  %788 = vrot.lane.b32.xlu2 %v765_v22, %s2026_s26  ;;  %v741_v2 = vpack.c.bf16 %v735_v62, %v733_v61  ;;  %v1131_v5 = vmul.f32 %v1125_v0, %v1118_v3  ;;  %v1133_v6 = vmul.f32 %v1125_v0, %v1120_v4  ;;  %v1115_v14 = vunpack.c.h.bf16 %v1104_v11 }
  0xe8   : > { %v1214_v8 = vmul.f32 %v1208_v52, %v1118_v3  ;;  %v1216_v9 = vmul.f32 %v1208_v52, %v1120_v4  ;;  %v1296_v10 = vmul.f32 %v2279_v48, %v1118_v3  ;;  %v1298_v7 = vmul.f32 %v2279_v48, %v1120_v4 }
  0xe9   : > { %v1137_v13 = vpack.c.bf16 %v1133_v6, %v1131_v5  ;;  %v1117_v15 = vunpack.c.h.bf16 %v1105_v12  ;;  %v1211_v18 = vmul.f32 %v1208_v52, %v1115_v14  ;;  %v1297_v20 = vmul.f32 %v2279_v48, %v2282_v55  ;;  %v1875_v5 = vld [vmem:[%s2461_s4 + $0x18] sm:$0xff]  ;;  %v1874_v6 = vld [vmem:[%s2461_s4 + $0x10] sm:$0xff] }
  0xea   : > { %v1220_v16 = vpack.c.bf16 %v1216_v9, %v1214_v8  ;;  %v1302_v17 = vpack.c.bf16 %v1298_v7, %v1296_v10  ;;  %v1299_v21 = vmul.f32 %v2279_v48, %v1121_v56  ;;  %v1132_v22 = vmul.f32 %v1125_v0, %v2282_v55  ;;  %v1802_v8 = vld [vmem:[#allocation2 + $0x4] sm:$0xf]  ;;  %v1880_v9 = vld [vmem:[#allocation2 + $0xc] sm:$0xf0] }
  0xeb   : > { %v1213_v19 = vmul.f32 %v1208_v52, %v1117_v15  ;;  %v1134_v23 = vmul.f32 %v1125_v0, %v1121_v56  ;;  %v1114_v27 = vunpack.c.l.bf16 %v1104_v11  ;;  %v1116_v28 = vunpack.c.l.bf16 %v1105_v12 }
  0xec   : > { %v1303_v25 = vpack.c.bf16 %v1299_v21, %v1297_v20  ;;  %v1128_v42 = vmul.f32 %v1125_v0, %v1115_v14  ;;  %v1130_v43 = vmul.f32 %v1125_v0, %v1117_v15  ;;  %v1380_v44 = vmul.f32 %v1373_v38, %v2282_v55 }
  0xed   : > { %v1219_v24 = vpack.c.bf16 %v1213_v19, %v1211_v18  ;;  %v1138_v26 = vpack.c.bf16 %v1134_v23, %v1132_v22  ;;  %v1127_v29 = vmul.f32 %v1125_v0, %v1114_v27  ;;  %v1292_v33 = vmul.f32 %v2279_v48, %v1114_v27  ;;  %v1882_v19 = vld [vmem:[%s2461_s4 + $0x40] sm:$0xff] }
  0xee   : > { %845 = vrot.lane.b32.xlu1 %v742_v30, %s2028_s20  ;;  %v1129_v30 = vmul.f32 %v1125_v0, %v1116_v28  ;;  %v1294_v34 = vmul.f32 %v2279_v48, %v1116_v28  ;;  %v1136_v47 = vpack.c.bf16 %v1130_v43, %v1128_v42  ;;  %v1381_v49 = vmul.f32 %v1373_v38, %v1120_v4  ;;  %v1872_v23 = vld [vmem:[%s2461_s4] sm:$0xff]  ;;  %v1879_v43 = vld [vmem:[%s2461_s4 + $0x38] sm:$0xff] }
  0xef   : > { %924 = vrot.lane.b32.xlu0 %v899_v31, %s2027_s14  ;;  %1006 = vrot.lane.b32.xlu2 %v981_v32, %s2029_s24  ;;  %v1210_v31 = vmul.f32 %v1208_v52, %v1114_v27  ;;  %v1212_v32 = vmul.f32 %v1208_v52, %v1116_v28  ;;  %v1375_v50 = vmul.f32 %v1373_v38, %v1114_v27 }
  0xf0   : > { %v1135_v35 = vpack.c.bf16 %v1129_v30, %v1127_v29  ;;  %v1300_v37 = vpack.c.bf16 %v1294_v34, %v1292_v33  ;;  %v1379_v52 = vmul.f32 %v1373_v38, %v1118_v3  ;;  %v1378_v55 = vmul.f32 %v1373_v38, %v1117_v15  ;;  %v1878_v30 = vld [vmem:[%s2461_s4 + $0x30] sm:$0xff] }
  0xf1   : > { %v1218_v36 = vpack.c.bf16 %v1212_v32, %v1210_v31  ;;  %v1803_v7 = vor.u32 %v1880_v9, %v1802_v8  ;;  %v1883_v31 = vld [vmem:[%s2461_s4 + $0x48] sm:$0xff] }
  0xf6   : > { %922 = vrot.lane.b32.xlu1 %v898_v39, %s2027_s14  ;;  %v1382_v39 = vmul.f32 %v1373_v38, %v1121_v56 }
  0xf7   : > { %1008 = vrot.lane.b32.xlu0 %v982_v40, %s2029_s24  ;;  %847 = vrot.lane.b32.xlu2 %v743_v41, %s2028_s20  ;;  %v1293_v40 = vmul.f32 %v2279_v48, %v1115_v14  ;;  %v1295_v41 = vmul.f32 %v2279_v48, %v1117_v15  ;;  %v1376_v48 = vmul.f32 %v1373_v38, %v1115_v14 }
  0xf8   : > { %v1386_v45 = vpack.c.bf16 %v1382_v39, %v1380_v44 }
  0xf9   : > { %v1301_v46 = vpack.c.bf16 %v1295_v41, %v1293_v40  ;;  %v1384_v56 = vpack.c.bf16 %v1378_v55, %v1376_v48 }
  0xfe   : > { %841 = vrot.lane.b32.xlu1 %v740_v51, %s2028_s20  ;;  %v1377_v51 = vmul.f32 %v1373_v38, %v1116_v28  ;;  %v1877_v38 = vld [vmem:[%s2461_s4 + $0x28] sm:$0xff] }
  0xff   : > { %920 = vrot.lane.b32.xlu0 %v897_v53, %s2027_s14  ;;  %1002 = vrot.lane.b32.xlu2 %v979_v54, %s2029_s24  ;;  %v1385_v53 = vpack.c.bf16 %v1381_v49, %v1379_v52  ;;  %v1884_v49 = vld [vmem:[%s2461_s4 + $0x50] sm:$0xff]  ;;  %s2484_s14 = sld [smem:[#allocation13_spill]] (%p2171_p3) }
 0x100   : > { %v1383_v54 = vpack.c.bf16 %v1377_v51, %v1375_v50  ;;  %v1886_v51 = vld [vmem:[%s2461_s4 + $0x60] sm:$0xff] }
 0x106   : > { %1247 = vrot.lane.b32.xlu1 %v1221_v63, %s2023_s18  ;;  %v1881_v63 = vld [vmem:[#allocation2 + $0x24] sm:$0xf0] }
 0x107   : > { %1004 = vrot.lane.b32.xlu0 %v980_v1, %s2029_s24  ;;  %843 = vrot.lane.b32.xlu2 %v741_v2, %s2028_s20  ;;  %v1806_v2 = vld [vmem:[#allocation2 + $0x1c] sm:$0xf] }
 0x108   : > { %v1807_v4 = vor.u32 %v1881_v63, %v1806_v2  ;;  %v1890_v63 = vld [vmem:[%s2461_s4 + $0x80] sm:$0xff] }
 0x10e   : > { %1162 = vrot.lane.b32.xlu1 %v1137_v13, %s2025_s22 }
 0x10f   : > { %1245 = vrot.lane.b32.xlu0 %v1220_v16, %s2023_s18  ;;  %1327 = vrot.lane.b32.xlu2 %v1302_v17, %s2022_s17 }
 0x116   : > { %1243 = vrot.lane.b32.xlu1 %v1219_v24, %s2023_s18 }
 0x117   : > { %1329 = vrot.lane.b32.xlu0 %v1303_v25, %s2022_s17  ;;  %1164 = vrot.lane.b32.xlu2 %v1138_v26, %s2025_s22  ;;  %v1876_v26 = vld [vmem:[%s2461_s4 + $0x20] sm:$0xff] }
 0x11e   : > { %1158 = vrot.lane.b32.xlu1 %v1135_v35, %s2025_s22 }
 0x11f   : > { %1241 = vrot.lane.b32.xlu0 %v1218_v36, %s2023_s18  ;;  %1323 = vrot.lane.b32.xlu2 %v1300_v37, %s2022_s17  ;;  %v1873_v36 = vld [vmem:[%s2461_s4 + $0x8] sm:$0xff] }
 0x126   : > { %1412 = vrot.lane.b32.xlu1 %v1386_v45, %s2024_s23 }
 0x127   : > { %1325 = vrot.lane.b32.xlu0 %v1301_v46, %s2022_s17  ;;  %1160 = vrot.lane.b32.xlu2 %v1136_v47, %s2025_s22  ;;  %s596_s17 = scalar_lea.vmem %s2482_s7, %s1870_s8 }
 0x12f   : > { %1410 = vrot.lane.b32.xlu0 %v1385_v53, %s2024_s23  ;;  %1406 = vrot.lane.b32.xlu2 %v1383_v54, %s2024_s23  ;;  %v1888_v54 = vld [vmem:[%s2461_s4 + $0x70] sm:$0xff] }
 0x137   : > { %1408 = vrot.lane.b32.xlu0 %v1384_v56, %s2024_s23  ;;  %v1885_v56 = vld [vmem:[%s2461_s4 + $0x58] sm:$0xff]  ;;  %s1867_s23 = sshll.u32 (%p2171_p3), %s2111_s12, 3 }
 0x138   : > { %v795_v57 = vpop.permute.xlu2 %794  ;;  %s1499_s20 = scalar_lea.vmem (%p2171_p3), %s2484_s14, %s1867_s23 }
 0x141   : > { %v789_v58 = vpop.permute.xlu2 %788 }
 0x149   : > { %v1007_v59 = vpop.permute.xlu2 %1006 }
 0x150   : > { %v793_v60 = vpop.permute.xlu1 %792 }
 0x151   : > { %v798_v61 = vsel %vm796_vm0, %v793_v60, %v795_v57  ;;  %v848_v62 = vpop.permute.xlu2 %847 }
 0x152   : > { %814 = vmatpush.bf16.msra.mxu0 %v798_v61  ;;  %1892 = vmatpush.bf16.msra.mxu1 %v798_v61 }
 0x158   : > { %v927_v0 = vpop.permute.xlu1 %926 }
 0x159   : > { %v791_v1 = vpop.permute.xlu0 %790  ;;  %v1003_v10 = vpop.permute.xlu2 %1002 }
 0x15a   : > { %v797_v3 = vsel %vm796_vm0, %v789_v58, %v791_v1  ;;  %v1887_v58 = vld [vmem:[%s2461_s4 + $0x68] sm:$0xff] }
 0x15b   : > { %815 = vmatpush.bf16.msra.mxu0 %v797_v3  ;;  %1893 = vmatpush.bf16.msra.mxu1 %v797_v3 }
 0x15e   : > { %1749 = vmatmul.msk.bf16.vlgmr.msra.gmra.mxu1 %vm801_vm1, %v1875_v5  ;;  %1748 = vmatmul.msk.bf16.vlgmr.msra.gmra.mxu0 %vm801_vm1, %v1874_v6 }
 0x15f   : > { %1087 = vmatpush.bf16.msrb.mxu0 %v1807_v4 }
 0x160   : > { %v846_v11 = vpop.permute.xlu1 %845 }
 0x161   : > { %v925_v12 = vpop.permute.xlu0 %924  ;;  %v851_v13 = vsel %vm849_vm2, %v846_v11, %v848_v62  ;;  %v844_v15 = vpop.permute.xlu2 %843  ;;  %v1889_v62 = vld [vmem:[%s2461_s4 + $0x78] sm:$0xff] }
 0x162   : > { %v930_v14 = vsel %vm928_vm3, %v925_v12, %v927_v0  ;;  %866 = vmatpush.bf16.msrb.mxu1 %v851_v13  ;;  %v1891_v0 = vld [vmem:[%s2461_s4 + $0x88] sm:$0xff] }
 0x163   : > { %1088 = vmatpush.bf16.msrb.mxu0 %v1803_v7  ;;  %945 = vmatpush.bf16.msra.mxu2 %v930_v14 }
 0x168   : > { %v923_v16 = vpop.permute.xlu1 %922 }
 0x169   : > { %v1009_v17 = vpop.permute.xlu0 %1008  ;;  %v1328_v24 = vpop.permute.xlu2 %1327 }
 0x16a   : > { %v1012_v18 = vsel %vm1010_vm4, %v1007_v59, %v1009_v17 }
 0x16b   : > { %1027 = vmatpush.bf16.msra.mxu3 %v1012_v18 }
 0x16e   : > { %1808 = vmatmul.msk.bf16.vlgmr.msrb.gmra.mxu0 %vm801_vm1, %v1882_v19 }
 0x170   : > { %v842_v20 = vpop.permute.xlu1 %841 }
 0x171   : > { %v921_v21 = vpop.permute.xlu0 %920  ;;  %v850_v22 = vsel %vm849_vm2, %v842_v20, %v844_v15  ;;  %v1165_v32 = vpop.permute.xlu2 %1164 }
 0x172   : > { %v929_v25 = vsel %vm928_vm3, %v921_v21, %v923_v16  ;;  %867 = vmatpush.bf16.msrb.mxu1 %v850_v22 }
 0x173   : > { %946 = vmatpush.bf16.msra.mxu2 %v929_v25 }
 0x175   : > { %1758 = vmatmul.msk.bf16.vlgmr.msrb.gmra.mxu1 %vm801_vm1, %v1872_v23 }
 0x176   : > { %1772 = vmatmul.msk.bf16.vlgmr.msra.gmra.mxu2 %vm801_vm1, %v1876_v26 }
 0x178   : > { %v1248_v27 = vpop.permute.xlu1 %1247 }
 0x179   : > { %v1005_v28 = vpop.permute.xlu0 %1004  ;;  %v1324_v39 = vpop.permute.xlu2 %1323 }
 0x17a   : > { %v1011_v29 = vsel %vm1010_vm4, %v1003_v10, %v1005_v28 }
 0x17b   : > { %1028 = vmatpush.bf16.msra.mxu3 %v1011_v29 }
 0x17e   : > { %1786 = vmatmul.msk.bf16.vlgmr.msra.gmra.mxu3 %vm801_vm1, %v1878_v30  ;;  %1809 = vmatmul.msk.bf16.gmra.mxu0 %vm801_vm1, %v1883_v31 }
 0x180   : > { %v1163_v33 = vpop.permute.xlu1 %1162 }
 0x181   : > { %v1246_v34 = vpop.permute.xlu0 %1245  ;;  %v1168_v35 = vsel %vm1166_vm5, %v1163_v33, %v1165_v32  ;;  %v1161_v44 = vpop.permute.xlu2 %1160 }
 0x182   : > { %v1251_v37 = vsel %vm1249_vm6, %v1246_v34, %v1248_v27  ;;  %1183 = vmatpush.bf16.msra.mxu1 %v1168_v35 }
 0x183   : > { %1266 = vmatpush.bf16.msrb.mxu2 %v1251_v37 }
 0x185   : > { %1759 = vmatmul.msk.bf16.gmra.mxu1 %vm801_vm1, %v1873_v36 }
 0x186   : > { %1773 = vmatmul.msk.bf16.gmra.mxu2 %vm801_vm1, %v1877_v38 }
 0x188   : > { %v1244_v40 = vpop.permute.xlu1 %1243 }
 0x189   : > { %v1330_v41 = vpop.permute.xlu0 %1329  ;;  %v1407_v59 = vpop.permute.xlu2 %1406 }
 0x18a   : > { %v1333_v42 = vsel %vm1331_vm7, %v1328_v24, %v1330_v41 }
 0x18b   : > { %1348 = vmatpush.bf16.msrb.mxu3 %v1333_v42 }
 0x18e   : > { %1787 = vmatmul.msk.bf16.gmra.mxu3 %vm801_vm1, %v1879_v43 }
 0x190   : > { %v1159_v45 = vpop.permute.xlu1 %1158 }
 0x191   : > { %v1242_v46 = vpop.permute.xlu0 %1241  ;;  %v1167_v47 = vsel %vm1166_vm5, %v1159_v45, %v1161_v44 }
 0x192   : > { %v1250_v50 = vsel %vm1249_vm6, %v1242_v46, %v1244_v40  ;;  %1184 = vmatpush.bf16.msra.mxu1 %v1167_v47 }
 0x193   : > { %1267 = vmatpush.bf16.msrb.mxu2 %v1250_v50 }
 0x195   : > { %1822 = vmatmul.msk.bf16.vlgmr.msra.gmra.mxu1 %vm801_vm1, %v1884_v49 }
 0x196   : > { %1836 = vmatmul.msk.bf16.vlgmr.msrb.gmra.mxu2 %vm801_vm1, %v1886_v51 }
 0x198   : > { %v1413_v48 = vpop.permute.xlu1 %1412 }
 0x199   : > { %v1326_v52 = vpop.permute.xlu0 %1325 }
 0x19a   : > { %v1332_v53 = vsel %vm1331_vm7, %v1324_v39, %v1326_v52 }
 0x19b   : > { %1349 = vmatpush.bf16.msrb.mxu3 %v1332_v53 }
 0x19e   : > { %1850 = vmatmul.msk.bf16.vlgmr.msrb.gmra.mxu3 %vm801_vm1, %v1888_v54 }
 0x1a1   : > { %v1411_v55 = vpop.permute.xlu0 %1410 }
 0x1a2   : > { %v1416_v57 = vsel %vm1414_vm8, %v1411_v55, %v1413_v48 }
 0x1a3   : > { %1431 = vmatpush.bf16.msra.mxu0 %v1416_v57 }
 0x1a5   : > { %1823 = vmatmul.msk.bf16.gmra.mxu1 %vm801_vm1, %v1885_v56 }
 0x1a6   : > { %1837 = vmatmul.msk.bf16.gmra.mxu2 %vm801_vm1, %v1887_v58 }
 0x1a9   : > { %v1409_v60 = vpop.permute.xlu0 %1408 }
 0x1aa   : > { %v1415_v61 = vsel %vm1414_vm8, %v1407_v59, %v1409_v60 }
 0x1ab   : > { %1432 = vmatpush.bf16.msra.mxu0 %v1415_v61 }
 0x1ae   : > { %1851 = vmatmul.msk.bf16.gmra.mxu3 %vm801_vm1, %v1889_v62  ;;  %1864 = vmatmul.msk.bf16.vlgmr.msra.gmra.mxu0 %vm801_vm1, %v1890_v63 }
 0x1be   : > { %1865 = vmatmul.msk.bf16.gmra.mxu0 %vm801_vm1, %v1891_v0 }
 0x1db   : > { %v822_v1 = vpop.f32.mrf.mxu1  ;;  %v817_v3 = vpop.f32.mrf.mxu0 }
 0x1e3   : > { %v824_v2 = vpop.f32.mrf.mxu1  ;;  %v819_v6 = vpop.f32.mrf.mxu0 }
 0x1eb   : > { %v1090_v7 = vpop.f32.mrf.mxu0 }
 0x1f2   : > { %v869_v4 = vpop.f32.mrf.mxu1 }
 0x1f3   : > { %v1092_v14 = vpop.f32.mrf.mxu0  ;;  %v870_v20 = vadd.f32 %v869_v4, %v817_v3 }
 0x1f9   : > { %v948_v5 = vpop.f32.mrf.mxu2 }
 0x1fa   : > { %v871_v8 = vpop.f32.mrf.mxu1  ;;  %v958_v22 = vadd.f32 %v948_v5, %v870_v20 }
 0x1fb   : > { %v1095_v18 = vpop.f32.mrf.mxu0  ;;  %v872_v27 = vadd.f32 %v871_v8, %v819_v6 }
 0x201   : > { %v950_v9 = vpop.f32.mrf.mxu2  ;;  %v1030_v10 = vpop.f32.mrf.mxu3 }
 0x202   : > { %v874_v11 = vpop.f32.mrf.mxu1  ;;  %v1040_v24 = vadd.f32 %v1030_v10, %v958_v22  ;;  %v959_v29 = vadd.f32 %v950_v9, %v872_v27 }
 0x203   : > { %v1097_v26 = vpop.f32.mrf.mxu0  ;;  %v875_v38 = vadd.f32 %v874_v11, %v822_v1 }
 0x204   : > { %v1100_v28 = vadd.f32 %v1090_v7, %v1040_v24 }
 0x209   : > { %v1032_v12 = vpop.f32.mrf.mxu3  ;;  %v953_v13 = vpop.f32.mrf.mxu2 }
 0x20a   : > { %v876_v16 = vpop.f32.mrf.mxu1  ;;  %v1041_v32 = vadd.f32 %v1032_v12, %v959_v29  ;;  %v960_v41 = vadd.f32 %v953_v13, %v875_v38 }
 0x20b   : > { %v877_v50 = vadd.f32 %v876_v16, %v824_v2 }
 0x20c   : > { %v1101_v39 = vadd.f32 %v1092_v14, %v1041_v32 }
 0x211   : > { %v1035_v15 = vpop.f32.mrf.mxu3  ;;  %v955_v17 = vpop.f32.mrf.mxu2 }
 0x212   : > { %v1186_v21 = vpop.f32.mrf.mxu1  ;;  %v1042_v43 = vadd.f32 %v1035_v15, %v960_v41  ;;  %v961_v48 = vadd.f32 %v955_v17, %v877_v50 }
 0x213   : > { %v1196_v30 = vadd.f32 %v1186_v21, %v1100_v28 }
 0x214   : > { %v1102_v51 = vadd.f32 %v1095_v18, %v1042_v43 }
 0x219   : > { %v1037_v19 = vpop.f32.mrf.mxu3  ;;  %v1269_v23 = vpop.f32.mrf.mxu2 }
 0x21a   : > { %v1188_v31 = vpop.f32.mrf.mxu1  ;;  %v1279_v33 = vadd.f32 %v1269_v23, %v1196_v30  ;;  %v1043_v56 = vadd.f32 %v1037_v19, %v961_v48 }
 0x21b   : > { %v1197_v42 = vadd.f32 %v1188_v31, %v1101_v39 }
 0x21c   : > { %v1103_v61 = vadd.f32 %v1097_v26, %v1043_v56 }
 0x221   : > { %v1351_v25 = vpop.f32.mrf.mxu3  ;;  %v1271_v34 = vpop.f32.mrf.mxu2 }
 0x222   : > { %v1361_v35 = vadd.f32 %v1351_v25, %v1279_v33  ;;  %v1280_v44 = vadd.f32 %v1271_v34, %v1197_v42  ;;  %v1191_v45 = vpop.f32.mrf.mxu1 }
 0x223   : > { %v1198_v55 = vadd.f32 %v1191_v45, %v1102_v51 }
 0x229   : > { %v1353_v36 = vpop.f32.mrf.mxu3  ;;  %v1274_v47 = vpop.f32.mrf.mxu2 }
 0x22a   : > { %v1362_v46 = vadd.f32 %v1353_v36, %v1280_v44  ;;  %v1281_v57 = vadd.f32 %v1274_v47, %v1198_v55  ;;  %v1193_v59 = vpop.f32.mrf.mxu1 }
 0x22b   : > { %v1434_v37 = vpop.f32.mrf.mxu0  ;;  %v1199_v0 = vadd.f32 %v1193_v59, %v1103_v61 }
 0x22c   : > { %v1444_v40 = vadd.f32 %v1434_v37, %v1361_v35 }
 0x22e   : > { %1448 = vst [vmem:[%s2403_s11] sm:$0xff] %v1444_v40  ;;  %1452 = vadd.xlane.f32.xlu1 %v1444_v40  ;;  %v1465_v53 = vmul.f32 %v1444_v40, %v1444_v40 }
 0x231   : > { %v1356_v54 = vpop.f32.mrf.mxu3  ;;  %v1276_v63 = vpop.f32.mrf.mxu2 }
 0x232   : > { %v1363_v58 = vadd.f32 %v1356_v54, %v1281_v57  ;;  %v1282_v2 = vadd.f32 %v1276_v63, %v1199_v0 }
 0x233   : > { %v1436_v49 = vpop.f32.mrf.mxu0 }
 0x234   : > { %v1445_v52 = vadd.f32 %v1436_v49, %v1362_v46 }
 0x235   : > { %v1534_v17 = vld [vmem:[%s2403_s11] sm:$0xff] (%p2171_p3) }
 0x236   : > { %1449 = vst [vmem:[%s2403_s11 + $0x8] sm:$0xff] %v1445_v52  ;;  %1469 = vadd.xlane.f32.xlu1 %v1465_v53  ;;  %1454 = vadd.xlane.f32.xlu2 %v1445_v52  ;;  %v1466_v9 = vmul.f32 %v1445_v52, %v1445_v52 }
 0x237   : > { %1535 = vst [vmem:[%s1499_s20] sm:$0xff] (%p2171_p3), %v1534_v17 }
 0x239   : > { %v1358_v1 = vpop.f32.mrf.mxu3 }
 0x23a   : > { %v1364_v3 = vadd.f32 %v1358_v1, %v1282_v2 }
 0x23b   : > { %v1439_v60 = vpop.f32.mrf.mxu0 }
 0x23c   : > { %v1446_v62 = vadd.f32 %v1439_v60, %v1363_v58 }
 0x23d   : > { %v1536_v18 = vld [vmem:[%s2403_s11 + $0x8] sm:$0xff] (%p2171_p3) }
 0x23e   : > { %1450 = vst [vmem:[%s2403_s11 + $0x10] sm:$0xff] %v1446_v62  ;;  %1456 = vadd.xlane.f32.xlu0 %v1446_v62  ;;  %v1467_v6 = vmul.f32 %v1446_v62, %v1446_v62 }
 0x23f   : > { %1537 = vst [vmem:[%s1499_s20 + $0x20] sm:$0xff] (%p2171_p3), %v1536_v18 }
 0x243   : > { %v1441_v4 = vpop.f32.mrf.mxu0 }
 0x244   : > { %v1447_v5 = vadd.f32 %v1441_v4, %v1364_v3 }
 0x245   : > { %v1538_v19 = vld [vmem:[%s2403_s11 + $0x10] sm:$0xff] (%p2171_p3) }
 0x246   : > { %1451 = vst [vmem:[%s2403_s11 + $0x18] sm:$0xff] %v1447_v5  ;;  %1473 = vadd.xlane.f32.xlu0 %v1467_v6  ;;  %1458 = vadd.xlane.f32.xlu2 %v1447_v5  ;;  %v1468_v8 = vmul.f32 %v1447_v5, %v1447_v5 }
 0x247   : > { %1539 = vst [vmem:[%s1499_s20 + $0x40] sm:$0xff] (%p2171_p3), %v1538_v19 }
 0x248   : > { %1475 = vadd.xlane.f32.xlu1 %v1468_v8 }
 0x24d   : > { %v1540_v20 = vld [vmem:[%s2403_s11 + $0x18] sm:$0xff] (%p2171_p3) }
 0x24e   : > { %1471 = vadd.xlane.f32.xlu2 %v1466_v9  ;;  %1541 = vst [vmem:[%s1499_s20 + $0x60] sm:$0xff] (%p2171_p3), %v1540_v20 }
 0x2a1   : > { %v1453_v10 = vpop.xlane.xlu1 %1452 }
 0x2a2   : > { %1461 = vst.msk [vmem:[%s591_s29] sm:$0xff] %vm1010_vm4, %v1453_v10 }
 0x2a9   : > { %v1470_v7 = vpop.xlane.xlu1 %1469  ;;  %v1455_v11 = vpop.xlane.xlu2 %1454 }
 0x2aa   : > { %1477 = vst.msk [vmem:[%s596_s17] sm:$0xff] %vm1010_vm4, %v1470_v7 }
 0x2ab   : > { %1462 = vst.msk [vmem:[%s591_s29 + $0x8] sm:$0xff] %vm1010_vm4, %v1455_v11 }
 0x2b1   : > { %v1457_v12 = vpop.xlane.xlu0 %1456 }
 0x2b2   : > { %1463 = vst.msk [vmem:[%s591_s29 + $0x10] sm:$0xff] %vm1010_vm4, %v1457_v12 }
 0x2b9   : > { %v1474_v13 = vpop.xlane.xlu0 %1473  ;;  %v1459_v14 = vpop.xlane.xlu2 %1458 }
 0x2ba   : > { %1479 = vst.msk [vmem:[%s596_s17 + $0x10] sm:$0xff] %vm1010_vm4, %v1474_v13 }
 0x2bb   : > { %1464 = vst.msk [vmem:[%s591_s29 + $0x18] sm:$0xff] %vm1010_vm4, %v1459_v14  ;;  %v1476_v15 = vpop.xlane.xlu1 %1475 }
 0x2bc   : > { %1480 = vst.msk [vmem:[%s596_s17 + $0x18] sm:$0xff] %vm1010_vm4, %v1476_v15 }
 0x2be   : > { %1497 = sbr.rel (!%p2171_p3) target bundleno = 707 (0x2c3), region = 203 }
 0x2c1   : > { %v1472_v16 = vpop.xlane.xlu2 %1471 }
 0x2c2   : > { %1478 = vst.msk [vmem:[%s596_s17 + $0x8] sm:$0xff] %vm1010_vm4, %v1472_v16 }
 0x2c3 PF: > { %s2485_s11 = sld [smem:[#allocation8_spill]]  ;;  %s2489_s27 = smov %s1998_s28 }
 0x2c4   : > { %s2486_s24 = sld [smem:[#allocation12_spill]]  ;;  %s2491_s29 = smov %s2006_s30 }
 0x2c5   : > { %s2487_s15 = sld [smem:[#allocation10_spill]]  ;;  %s2493_s9 = smov %s2014_s10 }
 0x2c6   : > { %s2488_s12 = sld [smem:[#allocation9_spill]] }
 0x2c9   : > { %p16_p7 = scmp.ge.s32.totalorder %s2485_s11, 6  }
 0x2ca   : > { %s2490_s28 = smov %s2486_s24 }
 0x2cb   : > { %s2492_s30 = smov %s2487_s15  ;;  %18 = sbr.rel (!%p16_p7) target bundleno = 8 (0x8), region = 328 }
 0x2cc   : > { %s2494_s10 = smov %s2488_s12 }

// kernel: residual_block_pallas.3
= control target key start
LH: loop header
LB: loop body
LE: loop exit
PB: predicated region body
PF: predicated region fallthrough
CT: control target
= control target key end

     0   :  { %s2404_s0 = inlined_call_operand.vmem [shape: bf16[9,512], index: 0, kind: input, shape index: {}]   ;;  %s2405_s1 = inlined_call_operand.vmem [shape: f32[32,512], index: 1, kind: input, shape index: {}, may-alias: {1,2,3}]   ;;  %s2406_s2 = inlined_call_operand.vmem [shape: f32[32,512], index: 2, kind: input, shape index: {}, may-alias: {1,2,3}]   ;;  %s2407_s3 = inlined_call_operand.vmem [shape: f32[32,512], index: 3, kind: input, shape index: {}, may-alias: {1,2,3}]   ;;  %s2408_s4 = inlined_call_operand.vmem [shape: bf16[9,32,32], index: 4, kind: input, shape index: {}]   ;;  %s2409_s5 = inlined_call_operand.vmem [shape: f32[32,2], index: 5, kind: input, shape index: {}]   ;;  %s2410_s6 = inlined_call_operand.vmem [shape: f32[32,512], index: 6, kind: output, shape index: {0}]   ;;  %s2411_s7 = inlined_call_operand.vmem [shape: f32[4,32,1], index: 7, kind: output, shape index: {1}]   ;;  %s2412_s8 = inlined_call_operand.vmem [shape: f32[4,32,1], index: 8, kind: output, shape index: {2}]  }
   0x1   :  { %2416 = sst [smem:[#allocation13_spill]] %s2410_s6 }
   0x2   :  { %2417 = sst [smem:[#allocation14_spill]] %s2412_s8 }
   0x3   :  { %s1991_s27 = smov 0   ;;  %s1993_s28 = smov 0  }
   0x4   :  { %s1995_s29 = smov 0   ;;  %s1997_s30 = smov 0  }
   0x5   :  { %s1999_s9 = smov 0   ;;  %s2001_s5 = smov 0  }
   0x6   :  { %s2003_s10 = smov 0  }
   0x7 LB: > { %s2027_s11 = sadd.s32 4294967295, %s1936_s10   ;;  %s2030_s12 = sadd.s32 1, %s1936_s10   ;;  %s1936_s10 = sphi %s2003_s10, %s2430_s10   ;;  %s1932_s5 = sphi %s2001_s5, %s2439_s5   ;;  %s1928_s9 = sphi %s1999_s9, %s2438_s9   ;;  %s1924_s30 = sphi %s1997_s30, %s2437_s30   ;;  %s1920_s29 = sphi %s1995_s29, %s2436_s29   ;;  %s1916_s28 = sphi %s1993_s28, %s2435_s28   ;;  %s1912_s27 = sphi %s1991_s27, %s2434_s27  }
   0x8   : > { %2418 = sst [smem:[#allocation8_spill]] %s2030_s12  ;;  %s23_s13 = ssub.s32 %s1936_s10, %s2030_s12 }
   0x9   : > { %s26_s14 = sadd.s32 1, %s1932_s5  ;;  %p24_p0 = scmp.eq.s32.totalorder %s23_s13, 0 }
   0xa   : > { %p33_p1 = scmp.ne.s32.totalorder %s1932_s5, %s1928_s9  ;;  %p34_p2 = scmp.eq.s32.totalorder %s1936_s10, 0 }
   0xb   : > { %p50_p3 = scmp.gt.s32.totalorder %s2027_s11, 0  ;;  %s1638_s17 = sadd.s32 4294967295, %s2030_s12 }
   0xc   : > { %s2040_s15 = scalar_select %p24_p0, %s1932_s5, %s26_s14  }
   0xd   : > { %p2047_p4 = por %p34_p2, %p33_p1  ;;  %p53_p5 = scmp.gt.s32.totalorder %s1638_s17, 0 }
   0xe   : > { %2419 = sst [smem:[#allocation9_spill]] %s2040_s15  ;;  %s58_s19 = sadd.s32 1, %s1924_s30 }
   0xf   : > { %s2053_s18 = scalar_select %p50_p3, %s2027_s11, 0 }
  0x10   : > { %p65_p6 = scmp.ne.s32.totalorder %s1924_s30, %s1920_s29  ;;  %p108_p7 = scmp.lt.s32.totalorder %s2030_s12, 3 }
  0x11   : > { %s2441_s17 = smov (!%p53_p5, %s1638_s17), 0  ;;  %s110_s21 = sadd.s32 1, %s2030_s12 }
  0x12   : > { %p2061_p8 = por %p65_p6, %p34_p2  ;;  %s55_s22 = ssub.s32 %s2053_s18, %s2441_s17 }
  0x13   : > { %p111_p9 = scmp.lt.s32.totalorder %s110_s21, 3  ;;  %p56_p10 = scmp.eq.s32.totalorder %s55_s22, 0 }
  0x14   : > { %s2068_s23 = scalar_select %p108_p7, %s2030_s12, 3 }
  0x15   : > { %s2071_s24 = scalar_select %p56_p10, %s1924_s30, %s58_s19  }
  0x16   : > { %s2443_s21 = smov (!%p111_p9, %s110_s21), 3  ;;  %p123_p11 = scmp.ne.s32.totalorder %s1916_s28, %s1912_s27 }
  0x17   : > { %2422 = sst [smem:[#allocation10_spill]] %s2071_s24  ;;  %p195_p12 = scmp.eq.s32.totalorder %s2027_s11, 3 }
  0x18   : > { %s113_s25 = ssub.s32 %s2068_s23, %s2443_s21  ;;  %s116_s26 = sadd.s32 1, %s1916_s28 }
  0x19   : > { %p114_p13 = scmp.eq.s32.totalorder %s113_s25, 0  ;;  %p2080_p0 = por %p123_p11, %p34_p2 }
  0x1a   : > { %p2087_p3 = por %p195_p12, %p33_p1  ;;  %p1640_p5 = scmp.ge.s32.totalorder %s1936_s10, 4 }
  0x1b   : > { %s2092_s17 = scalar_select %p114_p13, %s1916_s28, %s116_s26  }
  0x1c   : > { %s2424_s14 = scalar_select %p2087_p3, 1, 0 }
  0x1d   : > { %2426 = sst [smem:[#allocation12_spill]] %s2092_s17  ;;  %275 = sbr.rel (%p1640_p5) target bundleno = 64 (0x40), region = 24 }
  0x1e   : > { %2425 = sst [smem:[#allocation11_spill]] %s2424_s14 }
  0x22   : > { %278 = sbr.rel (!%p2047_p4) target bundleno = 40 (0x28), region = 28  ;;  %s280_s19 = sand.u32 (%p2047_p4), 1, %s1932_s5  }
  0x23   : > { %s1642_s21 = sshll.u32 (%p2047_p4), %s1936_s10, 2  ;;  %s1641_s22 = sshll.u32 (%p2047_p4), %s280_s19, 3 }
  0x24   : > { %s284_s24 = scalar_lea.vmem (%p2047_p4), %s2404_s0, %s1642_s21  ;;  %s282_s12 = scalar_lea.vmem (%p2047_p4), [#allocation3], %s1641_s22 }
  0x25   : > { %v301_v0 = vld [vmem:[%s284_s24] sm:$0xf] (%p2047_p4)  ;;  %v303_v1 = vld [vmem:[%s284_s24 + $0x10] sm:$0xf] (%p2047_p4) }
  0x26   : > { %302 = vst [vmem:[%s282_s12] sm:$0xf] (%p2047_p4), %v301_v0 }
  0x27   : > { %304 = vst [vmem:[%s282_s12 + $0x4] sm:$0xf] %v303_v1 }
  0x28 PF: > { %332 = sbr.rel (!%p2061_p8) target bundleno = 48 (0x30), region = 69  ;;  %s334_s26 = sand.u32 (%p2061_p8), 1, %s1924_s30  }
  0x29   : > { %s1645_s17 = sshll.u32 (%p2061_p8), %s2053_s18, 3  ;;  %s1643_s6 = sshll.u32 (%p2061_p8), %s334_s26, 5 }
  0x2a   : > { %s341_s8 = scalar_lea.vmem (%p2061_p8), %s2405_s1, %s1645_s17  ;;  %s336_s15 = scalar_lea.vmem (%p2061_p8), [#allocation4], %s1643_s6 }
  0x2b   : > { %v376_v2 = vld [vmem:[%s341_s8] sm:$0xff] (%p2061_p8) }
  0x2c   : > { %v378_v3 = vld [vmem:[%s341_s8 + $0x20] sm:$0xff] (%p2061_p8)  ;;  %377 = vst [vmem:[%s336_s15] sm:$0xff] (%p2061_p8), %v376_v2 }
  0x2d   : > { %v380_v4 = vld [vmem:[%s341_s8 + $0x40] sm:$0xff]  ;;  %379 = vst [vmem:[%s336_s15 + $0x8] sm:$0xff] %v378_v3 }
  0x2e   : > { %v382_v5 = vld [vmem:[%s341_s8 + $0x60] sm:$0xff]  ;;  %381 = vst [vmem:[%s336_s15 + $0x10] sm:$0xff] %v380_v4 }
  0x2f   : > { %383 = vst [vmem:[%s336_s15 + $0x18] sm:$0xff] %v382_v5 }
  0x30 PF: > { %389 = sbr.rel (!%p2047_p4) target bundleno = 56 (0x38), region = 107  ;;  %s391_s12 = sand.u32 (%p2047_p4), 1, %s1932_s5  }
  0x31   : > { %s1647_s18 = sshll.u32 (%p2047_p4), %s1936_s10, 3  ;;  %s1646_s20 = sshll.u32 (%p2047_p4), %s391_s12, 5 }
  0x32   : > { %s395_s17 = scalar_lea.vmem (%p2047_p4), %s2406_s2, %s1647_s18  ;;  %s393_s6 = scalar_lea.vmem (%p2047_p4), [#allocation5], %s1646_s20 }
  0x33   : > { %v430_v6 = vld [vmem:[%s395_s17] sm:$0xff] (%p2047_p4) }
  0x34   : > { %v432_v7 = vld [vmem:[%s395_s17 + $0x20] sm:$0xff] (%p2047_p4)  ;;  %431 = vst [vmem:[%s393_s6] sm:$0xff] (%p2047_p4), %v430_v6 }
  0x35   : > { %v434_v8 = vld [vmem:[%s395_s17 + $0x40] sm:$0xff]  ;;  %433 = vst [vmem:[%s393_s6 + $0x8] sm:$0xff] %v432_v7 }
  0x36   : > { %v436_v9 = vld [vmem:[%s395_s17 + $0x60] sm:$0xff]  ;;  %435 = vst [vmem:[%s393_s6 + $0x10] sm:$0xff] %v434_v8 }
  0x37   : > { %437 = vst [vmem:[%s393_s6 + $0x18] sm:$0xff] %v436_v9 }
  0x38 PF: > { %443 = sbr.rel (!%p2080_p0) target bundleno = 64 (0x40), region = 145  ;;  %s445_s8 = sand.u32 (%p2080_p0), 1, %s1916_s28  }
  0x39   : > { %s1649_s16 = sshll.u32 (%p2080_p0), %s2068_s23, 3  ;;  %s1648_s21 = sshll.u32 (%p2080_p0), %s445_s8, 5 }
  0x3a   : > { %s452_s26 = scalar_lea.vmem (%p2080_p0), %s2407_s3, %s1649_s16  ;;  %s447_s19 = scalar_lea.vmem (%p2080_p0), [#allocation6], %s1648_s21 }
  0x3b   : > { %v487_v10 = vld [vmem:[%s452_s26] sm:$0xff] (%p2080_p0) }
  0x3c   : > { %v489_v11 = vld [vmem:[%s452_s26 + $0x20] sm:$0xff] (%p2080_p0)  ;;  %488 = vst [vmem:[%s447_s19] sm:$0xff] (%p2080_p0), %v487_v10 }
  0x3d   : > { %v491_v12 = vld [vmem:[%s452_s26 + $0x40] sm:$0xff]  ;;  %490 = vst [vmem:[%s447_s19 + $0x8] sm:$0xff] %v489_v11 }
  0x3e   : > { %v493_v13 = vld [vmem:[%s452_s26 + $0x60] sm:$0xff]  ;;  %492 = vst [vmem:[%s447_s19 + $0x10] sm:$0xff] %v491_v12 }
  0x3f   : > { %494 = vst [vmem:[%s447_s19 + $0x18] sm:$0xff] %v493_v13 }
  0x40 PF: > { %p1650_p1 = scmp.ge.s32.totalorder %s1936_s10, 1  ;;  %p499_p2 = scmp.lt.s32.totalorder %s1936_s10, 5 }
  0x42   : > { %p500_p4 = pnand %p1650_p1, %p499_p2 }
  0x43   : > { %s506_s23 = sand.u32 (!%p500_p4), 1, %s1928_s9   ;;  %s1938_s9 = smov (!%p500_p4), 111  }
  0x44   : > { %503 = sbr.rel (%p500_p4) target bundleno = 687 (0x2af), region = 183  ;;  %s1651_s13 = sshll.u32 (!%p500_p4), %s506_s23, 3 }
  0x45   : > { %s2126_s15 = sshll.u32 (!%p500_p4), %s506_s23, 5  ;;  %s2129_s18 = scalar_lea.vmem (!%p500_p4), [#allocation3], %s1651_s13 }
  0x46   : > { %s522_s12 = scalar_lea.vmem (!%p500_p4), [#allocation5], %s2126_s15  ;;  %s1939_s10 = smov (!%p500_p4), 112  }
  0x47   : > { %s1940_s20 = smov (!%p500_p4), 17   ;;  %s1941_s24 = smov (!%p500_p4), 127  }
  0x48   : > { %s1942_s14 = smov (!%p500_p4), 113   ;;  %s1943_s17 = smov (!%p500_p4), 16  }
  0x49   : > { %v610_v14 = vld [vmem:[%s522_s12] sm:$0xff]  ;;  %v611_v15 = vld [vmem:[%s522_s12 + $0x8] sm:$0xff]  ;;  %v612_v16 = vld [vmem:[%s522_s12 + $0x10] sm:$0xff]  ;;  %s1944_s6 = smov 15   ;;  %s1945_s8 = smov 1   ;;  %vm720_vm0 = vcmask 130048  }
  0x4a   : > { %v613_v17 = vld [vmem:[%s522_s12 + $0x18] sm:$0xff]  ;;  %v614_v18 = vpack.c.bf16 %v610_v14, %v610_v14  ;;  %v615_v19 = vpack.c.bf16 %v611_v15, %v611_v15  ;;  %v616_v20 = vpack.c.bf16 %v612_v16, %v612_v16  ;;  %s513_s16 = sand.u32 1, %s1920_s29   ;;  %s527_s25 = sand.u32 1, %s1912_s27   ;;  %vm852_vm1 = vcmask 121856  }
  0x4b   : > { %v638_v21 = vld [vmem:[%s2129_s18] sm:$0x1]  ;;  %v617_v22 = vpack.c.bf16 %v613_v17, %v613_v17  ;;  %v803_v25 = vld [vmem:[%s2129_s18] sm:$0x2]  ;;  %v1289_v30 = vld [vmem:[%s2129_s18 + $0x4] sm:$0x1] }
  0x4c   : > { %v640_v23 = vpack.i.b16 %v638_v21, %v638_v21  ;;  %v672_v24 = vshrl.u32 %v638_v21, 16  ;;  %618 = vst [vmem:[#allocation2 + $0x4] sm:$0xf] %v614_v18  ;;  %v886_v26 = vshrl.u32 %v803_v25, 16  ;;  %v805_v33 = vpack.i.b16 %v803_v25, %v803_v25  ;;  %v1124_v35 = vld [vmem:[%s2129_s18] sm:$0x8] }
  0x4d   : > { %619 = vst [vmem:[#allocation2 + $0x10] sm:$0xf] %v615_v19  ;;  %v1291_v34 = vpack.i.b16 %v1289_v30, %v1289_v30  ;;  %v1207_v38 = vshrl.u32 %v1124_v35, 16  ;;  %v1032_v44 = vld [vmem:[%s2129_s18] sm:$0x4]  ;;  %v1126_v46 = vpack.i.b16 %v1124_v35, %v1124_v35  ;;  %s1652_s21 = sshll.u32 %s513_s16, 5 }
  0x4e   : > { %v642_v27 = vperm.slane %v640_v23, 0  ;;  %v673_v28 = vpack.i.b16 %v672_v24, %v672_v24  ;;  %620 = vst [vmem:[#allocation2 + $0x1c] sm:$0xf] %v616_v20  ;;  %v887_v29 = vpack.i.b16 %v886_v26, %v886_v26  ;;  %v807_v40 = vperm.slane %v805_v33, 1  ;;  %s515_s22 = scalar_lea.vmem [#allocation4], %s1652_s21  ;;  %s1654_s26 = sshll.u32 %s527_s25, 5 }
  0x4f   : > { %621 = vst [vmem:[#allocation2 + $0x28] sm:$0xf] %v617_v22  ;;  %v1293_v39 = vperm.slane %v1291_v34, 0  ;;  %v1208_v43 = vpack.i.b16 %v1207_v38, %v1207_v38  ;;  %v1034_v48 = vshrl.u32 %v1032_v44, 16  ;;  %v1128_v49 = vperm.slane %v1126_v46, 3  ;;  %v600_v55 = vld [vmem:[%s515_s22 + $0x10] sm:$0xff] }
  0x50   : > { %v651_v31 = vunpack.c.l.bf16 %v642_v27  ;;  %v675_v32 = vperm.slane %v673_v28, 0  ;;  %v889_v37 = vperm.slane %v887_v29, 1  ;;  %v808_v45 = vunpack.c.l.bf16 %v807_v40  ;;  %v601_v56 = vld [vmem:[%s515_s22 + $0x18] sm:$0xff]  ;;  %v598_v59 = vld [vmem:[%s515_s22] sm:$0xff]  ;;  %v599_v60 = vld [vmem:[%s515_s22 + $0x8] sm:$0xff]  ;;  %s529_s19 = scalar_lea.vmem [#allocation6], %s1654_s26 }
  0x51   : > { %v1294_v41 = vunpack.c.l.bf16 %v1293_v39  ;;  %v1210_v47 = vperm.slane %v1208_v43, 3  ;;  %v1035_v51 = vpack.i.b16 %v1034_v48, %v1034_v48  ;;  %v1129_v52 = vunpack.c.l.bf16 %v1128_v49  ;;  %v624_v63 = vld [vmem:[%s529_s19 + $0x10] sm:$0xff]  ;;  %v625_v0 = vld [vmem:[%s529_s19 + $0x18] sm:$0xff]  ;;  %v622_v3 = vld [vmem:[%s529_s19] sm:$0xff]  ;;  %s2350_s22 = scalar_lea.vmem [#allocation7], %s2126_s15  ;;  %p587_p6 = scmp.lt.s32.totalorder %s2027_s11, 3 }
  0x52   : > { %653 = vrot.lane.b32.xlu1 %v651_v31, %s1938_s9  ;;  %v676_v36 = vunpack.c.l.bf16 %v675_v32  ;;  %v890_v42 = vunpack.c.l.bf16 %v889_v37  ;;  %v604_v57 = vpack.c.bf16 %v600_v55, %v600_v55  ;;  %v605_v58 = vpack.c.bf16 %v601_v56, %v601_v56  ;;  %v623_v4 = vld [vmem:[%s529_s19 + $0x8] sm:$0xff]  ;;  %s2427_s13 = sld [smem:[#allocation14_spill]] }
  0x53   : > { %1296 = vrot.lane.b32.xlu2 %v1294_v41, %s1940_s20  ;;  %v1211_v50 = vunpack.c.l.bf16 %v1210_v47  ;;  %v1037_v53 = vperm.slane %v1035_v51, 2  ;;  %v602_v61 = vpack.c.bf16 %v598_v59, %v598_v59  ;;  %v603_v62 = vpack.c.bf16 %v599_v60, %v599_v60  ;;  %s588_s15 = scalar_select %p587_p6, %s2027_s11, 3 }
  0x54   : > { %678 = vrot.lane.b32.xlu0 %v676_v36, %s1939_s10  ;;  %608 = vst [vmem:[#allocation2 + $0x18] sm:$0xf] %v604_v57  ;;  %v628_v1 = vpack.c.bf16 %v624_v63, %v624_v63  ;;  %v629_v2 = vpack.c.bf16 %v625_v0, %v625_v0  ;;  %v626_v5 = vpack.c.bf16 %v622_v3, %v622_v3  ;;  %vm725_vm2 = vcmask 261120  }
  0x55   : > { %v1046_v54 = vunpack.c.l.bf16 %v1037_v53  ;;  %609 = vst [vmem:[#allocation2 + $0x24] sm:$0xf] %v605_v58  ;;  %v627_v6 = vpack.c.bf16 %v623_v4, %v623_v4  ;;  %vm773_vm3 = vcmask 138240   ;;  %vm934_vm4 = vcmask 7168   ;;  %s1794_s25 = sshll.u32 %s588_s15, 5 }
  0x56   : > { %606 = vst [vmem:[#allocation2] sm:$0xf] %v602_v61  ;;  %vm1173_vm5 = vcmask 924672   ;;  %vm1090_vm6 = vcmask 1039360   ;;  %vm1338_vm7 = vcmask 908288   ;;  %vm1255_vm8 = vcmask 916480   ;;  %s591_s27 = scalar_lea.vmem %s2411_s7, %s1794_s25 }
  0x57   : > { %607 = vst [vmem:[#allocation2 + $0xc] sm:$0xf] %v603_v62 }
  0x58   : > { %632 = vst [vmem:[#allocation2 + $0x20] sm:$0xf] %v628_v1  ;;  %s596_s12 = scalar_lea.vmem %s2427_s13, %s1794_s25 }
  0x59   : > { %633 = vst [vmem:[#allocation2 + $0x2c] sm:$0xf] %v629_v2 }
  0x5a   : > { %892 = vrot.lane.b32.xlu1 %v890_v42, %s1941_s24  ;;  %630 = vst [vmem:[#allocation2 + $0x8] sm:$0xf] %v626_v5 }
  0x5b   : > { %631 = vst [vmem:[#allocation2 + $0x14] sm:$0xf] %v627_v6  ;;  %v636_v7 = vld [vmem:[#allocation2 + $0x18] sm:$0xff] }
  0x5c   : > { %810 = vrot.lane.b32.xlu0 %v808_v45, %s1942_s14  ;;  %v637_v8 = vld [vmem:[#allocation2 + $0x24] sm:$0xff]  ;;  %v2146_v9 = vunpack.c.h.bf16 %v636_v7  ;;  %v647_v23 = vunpack.c.l.bf16 %v636_v7 }
  0x5d   : > { %v2148_v10 = vunpack.c.h.bf16 %v637_v8  ;;  %v634_v12 = vld [vmem:[#allocation2] sm:$0xff]  ;;  %v649_v24 = vunpack.c.l.bf16 %v637_v8 }
  0x5e   : > { %v635_v13 = vld [vmem:[#allocation2 + $0xc] sm:$0xff]  ;;  %v2152_v18 = vunpack.c.h.bf16 %v634_v12  ;;  %v2162_v32 = vunpack.c.l.bf16 %v634_v12 }
  0x5f   : > { %v2154_v19 = vunpack.c.h.bf16 %v635_v13  ;;  %v645_v36 = vunpack.c.l.bf16 %v635_v13  ;;  %v1030_v38 = vld [vmem:[#allocation2 + $0x1c] sm:$0xff] }
  0x60   : > { %v1031_v39 = vld [vmem:[#allocation2 + $0x28] sm:$0xff]  ;;  %v2167_v44 = vunpack.c.l.bf16 %v1030_v38  ;;  %v2191_v1 = vunpack.c.h.bf16 %v1030_v38 }
  0x61   : > { %v2169_v45 = vunpack.c.l.bf16 %v1031_v39  ;;  %v2193_v2 = vunpack.c.h.bf16 %v1031_v39 }
  0x62   : > { %1213 = vrot.lane.b32.xlu1 %v1211_v50, %s1943_s17 }
  0x64   : > { %1131 = vrot.lane.b32.xlu0 %v1129_v52, %s1944_s6 }
  0x6a   : > { %1048 = vrot.lane.b32.xlu1 %v1046_v54, %s1945_s8 }
  0xad   : > { %v1297_v39 = vpop.permute.xlu2 %1296 }
  0xc4   : > { %v654_v11 = vpop.permute.xlu1 %653 }
  0xc5   : > { %v661_v14 = vmul.f32 %v654_v11, %v2146_v9  ;;  %v663_v15 = vmul.f32 %v654_v11, %v2148_v10  ;;  %v657_v20 = vmul.f32 %v654_v11, %v2152_v18  ;;  %v659_v21 = vmul.f32 %v654_v11, %v2154_v19 }
  0xc6   : > { %v679_v16 = vpop.permute.xlu0 %678  ;;  %v660_v33 = vmul.f32 %v654_v11, %v647_v23  ;;  %v662_v37 = vmul.f32 %v654_v11, %v649_v24  ;;  %v656_v61 = vmul.f32 %v654_v11, %v2162_v32  ;;  %v658_v62 = vmul.f32 %v654_v11, %v645_v36 }
  0xc7   : > { %v667_v17 = vpack.c.bf16 %v663_v15, %v661_v14  ;;  %v665_v22 = vpack.c.bf16 %v659_v21, %v657_v20  ;;  %v685_v34 = vmul.f32 %v679_v16, %v647_v23  ;;  %v687_v35 = vmul.f32 %v679_v16, %v649_v24  ;;  %v1028_v15 = vld [vmem:[#allocation2 + $0x4] sm:$0xff] }
  0xc8   : > { %v666_v43 = vpack.c.bf16 %v662_v37, %v660_v33  ;;  %v686_v48 = vmul.f32 %v679_v16, %v2146_v9  ;;  %v688_v49 = vmul.f32 %v679_v16, %v2148_v10  ;;  %v681_v57 = vmul.f32 %v679_v16, %v2162_v32 }
  0xc9   : > { %771 = vrot.lane.b32.xlu2 %v667_v17, %s1940_s20  ;;  %v691_v42 = vpack.c.bf16 %v687_v35, %v685_v34  ;;  %v683_v58 = vmul.f32 %v679_v16, %v645_v36  ;;  %v682_v59 = vmul.f32 %v679_v16, %v2152_v18  ;;  %v684_v60 = vmul.f32 %v679_v16, %v2154_v19  ;;  %v1029_v16 = vld [vmem:[#allocation2 + $0x10] sm:$0xff] }
  0xca   : > { %v692_v54 = vpack.c.bf16 %v688_v49, %v686_v48  ;;  %v664_v4 = vpack.c.bf16 %v658_v62, %v656_v61  ;;  %v2207_v21 = vunpack.c.h.bf16 %v1028_v15 }
  0xcb   : > { %v689_v0 = vpack.c.bf16 %v683_v58, %v681_v57  ;;  %v690_v3 = vpack.c.bf16 %v684_v60, %v682_v59 }
  0xcc   : > { %v893_v63 = vpop.permute.xlu1 %892 }
  0xcd   : > { %v899_v5 = vmul.f32 %v893_v63, %v647_v23  ;;  %v901_v6 = vmul.f32 %v893_v63, %v649_v24  ;;  %v900_v7 = vmul.f32 %v893_v63, %v2146_v9  ;;  %v902_v8 = vmul.f32 %v893_v63, %v2148_v10 }
  0xce   : > { %v811_v25 = vpop.permute.xlu0 %810 }
  0xcf   : > { %v817_v26 = vmul.f32 %v811_v25, %v647_v23  ;;  %v819_v27 = vmul.f32 %v811_v25, %v649_v24  ;;  %v818_v28 = vmul.f32 %v811_v25, %v2146_v9  ;;  %v820_v29 = vmul.f32 %v811_v25, %v2148_v10 }
  0xd0   : > { %v813_v40 = vmul.f32 %v811_v25, %v2162_v32  ;;  %v815_v41 = vmul.f32 %v811_v25, %v645_v36  ;;  %v814_v52 = vmul.f32 %v811_v25, %v2152_v18  ;;  %v816_v53 = vmul.f32 %v811_v25, %v2154_v19 }
  0xd1   : > { %767 = vrot.lane.b32.xlu2 %v665_v22, %s1940_s20  ;;  %v823_v30 = vpack.c.bf16 %v819_v27, %v817_v26  ;;  %v824_v31 = vpack.c.bf16 %v820_v29, %v818_v28  ;;  %v905_v11 = vpack.c.bf16 %v901_v6, %v899_v5  ;;  %v906_v17 = vpack.c.bf16 %v902_v8, %v900_v7 }
  0xd2   : > { %v821_v47 = vpack.c.bf16 %v815_v41, %v813_v40  ;;  %v822_v56 = vpack.c.bf16 %v816_v53, %v814_v52  ;;  %v2209_v9 = vunpack.c.h.bf16 %v1029_v16  ;;  %v895_v10 = vmul.f32 %v893_v63, %v2162_v32 }
  0xd3   : > { %848 = vrot.lane.b32.xlu0 %v823_v30, %s1944_s6  ;;  %850 = vrot.lane.b32.xlu1 %v824_v31, %s1944_s6  ;;  %v897_v22 = vmul.f32 %v893_v63, %v645_v36  ;;  %v896_v25 = vmul.f32 %v893_v63, %v2152_v18  ;;  %v898_v26 = vmul.f32 %v893_v63, %v2154_v19  ;;  %v1038_v29 = vunpack.c.l.bf16 %v1028_v15 }
  0xd4   : > { %v2204_v14 = vpop.permute.xlu1 %1213  ;;  %v1040_v30 = vunpack.c.l.bf16 %v1029_v16 }
  0xd5   : > { %v903_v27 = vpack.c.bf16 %v897_v22, %v895_v10  ;;  %v904_v33 = vpack.c.bf16 %v898_v26, %v896_v25  ;;  %v1220_v32 = vmul.f32 %v2204_v14, %v2167_v44  ;;  %v1222_v34 = vmul.f32 %v2204_v14, %v2169_v45  ;;  %v1800_v25 = vld [vmem:[%s2408_s4 + $0x20] sm:$0xff]  ;;  %v1730_v26 = vld [vmem:[#allocation2 + $0x1c] sm:$0xf] }
  0xd6   : > { %v2171_v46 = vpop.permute.xlu0 %1131  ;;  %v1216_v52 = vmul.f32 %v2204_v14, %v1038_v29  ;;  %v1221_v53 = vmul.f32 %v2204_v14, %v2191_v1  ;;  %v1217_v61 = vmul.f32 %v2204_v14, %v2207_v21  ;;  %v1219_v62 = vmul.f32 %v2204_v14, %v2209_v9 }
  0xd7   : > { %v1138_v50 = vmul.f32 %v2171_v46, %v2167_v44  ;;  %v1140_v51 = vmul.f32 %v2171_v46, %v2169_v45  ;;  %v1139_v12 = vmul.f32 %v2171_v46, %v2191_v1  ;;  %v1141_v13 = vmul.f32 %v2171_v46, %v2193_v2 }
  0xd8   : > { %v1135_v23 = vmul.f32 %v2171_v46, %v2207_v21  ;;  %v1137_v24 = vmul.f32 %v2171_v46, %v2209_v9  ;;  %v1226_v35 = vpack.c.bf16 %v1222_v34, %v1220_v32  ;;  %v1134_v36 = vmul.f32 %v2171_v46, %v1038_v29 }
  0xd9   : > { %716 = vrot.lane.b32.xlu2 %v691_v42, %s1943_s17  ;;  %v1144_v55 = vpack.c.bf16 %v1140_v51, %v1138_v50  ;;  %v1145_v20 = vpack.c.bf16 %v1141_v13, %v1139_v12  ;;  %v1136_v37 = vmul.f32 %v2171_v46, %v1040_v30 }
  0xda   : > { %v1143_v31 = vpack.c.bf16 %v1137_v24, %v1135_v23 }
  0xdb   : > { %844 = vrot.lane.b32.xlu0 %v821_v47, %s1944_s6  ;;  %769 = vrot.lane.b32.xlu1 %v666_v43, %s1940_s20  ;;  %v1142_v40 = vpack.c.bf16 %v1136_v37, %v1134_v36  ;;  %v1303_v43 = vmul.f32 %v1297_v39, %v2167_v44  ;;  %v1305_v47 = vmul.f32 %v1297_v39, %v2169_v45 }
  0xdc   : > { %v1049_v28 = vpop.permute.xlu1 %1048 }
  0xdd   : > { %v1055_v18 = vmul.f32 %v1049_v28, %v2167_v44  ;;  %v1057_v19 = vmul.f32 %v1049_v28, %v2169_v45  ;;  %v1056_v41 = vmul.f32 %v1049_v28, %v2191_v1  ;;  %v1058_v42 = vmul.f32 %v1049_v28, %v2193_v2 }
  0xde   : > { %v1051_v48 = vmul.f32 %v1049_v28, %v1038_v29  ;;  %v1053_v49 = vmul.f32 %v1049_v28, %v1040_v30  ;;  %v1309_v50 = vpack.c.bf16 %v1305_v47, %v1303_v43  ;;  %v1218_v44 = vmul.f32 %v2204_v14, %v1040_v30 }
  0xdf   : > { %v1061_v38 = vpack.c.bf16 %v1057_v19, %v1055_v18  ;;  %v1062_v46 = vpack.c.bf16 %v1058_v42, %v1056_v41  ;;  %v1223_v45 = vmul.f32 %v2204_v14, %v2193_v2  ;;  %v1052_v59 = vmul.f32 %v1049_v28, %v2207_v21  ;;  %v1799_v18 = vld [vmem:[%s2408_s4 + $0x18] sm:$0xff]  ;;  %v1798_v19 = vld [vmem:[%s2408_s4 + $0x10] sm:$0xff]  ;;  %v1801_v42 = vld [vmem:[%s2408_s4 + $0x28] sm:$0xff] }
  0xe0   : > { %v1059_v51 = vpack.c.bf16 %v1053_v49, %v1051_v48  ;;  %v1054_v60 = vmul.f32 %v1049_v28, %v2209_v9 }
  0xe1   : > { %718 = vrot.lane.b32.xlu2 %v692_v54, %s1943_s17  ;;  %v1304_v54 = vmul.f32 %v1297_v39, %v2191_v1  ;;  %v1227_v57 = vpack.c.bf16 %v1223_v45, %v1221_v53  ;;  %v1299_v1 = vmul.f32 %v1297_v39, %v1038_v29 }
  0xe2   : > { %v1060_v63 = vpack.c.bf16 %v1054_v60, %v1052_v59  ;;  %v1797_v60 = vld [vmem:[%s2408_s4 + $0x8] sm:$0xff] }
  0xe3   : > { %1169 = vrot.lane.b32.xlu0 %v1144_v55, %s1942_s14  ;;  %846 = vrot.lane.b32.xlu1 %v822_v56, %s1944_s6  ;;  %v1306_v55 = vmul.f32 %v1297_v39, %v2193_v2  ;;  %v1224_v56 = vpack.c.bf16 %v1218_v44, %v1216_v52  ;;  %v1301_v2 = vmul.f32 %v1297_v39, %v1040_v30 }
  0xe5   : > { %v1310_v58 = vpack.c.bf16 %v1306_v55, %v1304_v54  ;;  %v1307_v5 = vpack.c.bf16 %v1301_v2, %v1299_v1  ;;  %v1810_v55 = vld [vmem:[%s2408_s4 + $0x60] sm:$0xff] }
  0xe9   : > { %712 = vrot.lane.b32.xlu2 %v689_v0, %s1943_s17  ;;  %v1225_v0 = vpack.c.bf16 %v1219_v62, %v1217_v61  ;;  %v1803_v61 = vld [vmem:[%s2408_s4 + $0x38] sm:$0xff]  ;;  %v1807_v62 = vld [vmem:[%s2408_s4 + $0x48] sm:$0xff] }
  0xeb   : > { %714 = vrot.lane.b32.xlu0 %v690_v3, %s1943_s17  ;;  %765 = vrot.lane.b32.xlu1 %v664_v4, %s1940_s20  ;;  %v1300_v3 = vmul.f32 %v1297_v39, %v2207_v21  ;;  %v1302_v4 = vmul.f32 %v1297_v39, %v2209_v9 }
  0xed   : > { %v1308_v6 = vpack.c.bf16 %v1302_v4, %v1300_v3  ;;  %v1811_v3 = vld [vmem:[%s2408_s4 + $0x68] sm:$0xff] }
  0xf1   : > { %930 = vrot.lane.b32.xlu2 %v905_v11, %s1945_s8 }
  0xf3   : > { %1171 = vrot.lane.b32.xlu1 %v1145_v20, %s1942_s14  ;;  %932 = vrot.lane.b32.xlu0 %v906_v17, %s1945_s8 }
  0xf9   : > { %926 = vrot.lane.b32.xlu2 %v903_v27, %s1945_s8  ;;  %v1805_v27 = vld [vmem:[#allocation2 + $0x24] sm:$0xf0] }
  0xfa   : > { %v1731_v28 = vor.u32 %v1805_v27, %v1730_v26 }
  0xfb   : > { %1167 = vrot.lane.b32.xlu1 %v1143_v31, %s1942_s14  ;;  %928 = vrot.lane.b32.xlu0 %v904_v33, %s1945_s8  ;;  %v1726_v31 = vld [vmem:[#allocation2 + $0x4] sm:$0xf]  ;;  %v1804_v33 = vld [vmem:[#allocation2 + $0xc] sm:$0xf0] }
  0xfc   : > { %v1727_v36 = vor.u32 %v1804_v33, %v1726_v31 }
 0x101   : > { %1251 = vrot.lane.b32.xlu2 %v1226_v35, %s1939_s10 }
 0x103   : > { %1165 = vrot.lane.b32.xlu0 %v1142_v40, %s1942_s14  ;;  %1086 = vrot.lane.b32.xlu1 %v1061_v38, %s1941_s24 }
 0x109   : > { %1088 = vrot.lane.b32.xlu2 %v1062_v46, %s1941_s24  ;;  %v1796_v46 = vld [vmem:[%s2408_s4] sm:$0xff] }
 0x10b   : > { %1334 = vrot.lane.b32.xlu0 %v1309_v50, %s1938_s9  ;;  %1082 = vrot.lane.b32.xlu1 %v1059_v51, %s1941_s24  ;;  %v1802_v50 = vld [vmem:[%s2408_s4 + $0x30] sm:$0xff]  ;;  %v1806_v51 = vld [vmem:[%s2408_s4 + $0x40] sm:$0xff] }
 0x111   : > { %1247 = vrot.lane.b32.xlu2 %v1224_v56, %s1939_s10 }
 0x113   : > { %1253 = vrot.lane.b32.xlu0 %v1227_v57, %s1939_s10  ;;  %1336 = vrot.lane.b32.xlu1 %v1310_v58, %s1938_s9 }
 0x119   : > { %1084 = vrot.lane.b32.xlu2 %v1060_v63, %s1941_s24  ;;  %s2429_s24 = sld [smem:[#allocation13_spill]] (%p2087_p3) }
 0x11b   : > { %1249 = vrot.lane.b32.xlu0 %v1225_v0, %s1939_s10 }
 0x121   : > { %1330 = vrot.lane.b32.xlu2 %v1307_v5, %s1938_s9 }
 0x123   : > { %v772_v7 = vpop.permute.xlu2 %771  ;;  %1332 = vrot.lane.b32.xlu0 %v1308_v6, %s1938_s9  ;;  %v1808_v6 = vld [vmem:[%s2408_s4 + $0x50] sm:$0xff]  ;;  %s1791_s9 = sshll.u32 (%p2087_p3), %s2027_s11, 3 }
 0x124   : > { %s1423_s14 = scalar_lea.vmem (%p2087_p3), %s2429_s24, %s1791_s9 }
 0x12b   : > { %v768_v8 = vpop.permute.xlu2 %767 }
 0x133   : > { %v717_v11 = vpop.permute.xlu2 %716 }
 0x13b   : > { %v719_v12 = vpop.permute.xlu2 %718 }
 0x13c   : > { %v722_v13 = vsel %vm720_vm0, %v717_v11, %v719_v12 }
 0x13d   : > { %738 = vmatpush.bf16.msra.mxu0 %v722_v13  ;;  %1816 = vmatpush.bf16.msra.mxu1 %v722_v13  ;;  %v1814_v13 = vld [vmem:[%s2408_s4 + $0x80] sm:$0xff] }
 0x143   : > { %v713_v14 = vpop.permute.xlu2 %712 }
 0x145   : > { %v849_v15 = vpop.permute.xlu0 %848  ;;  %v851_v16 = vpop.permute.xlu1 %850 }
 0x146   : > { %v854_v17 = vsel %vm852_vm1, %v849_v15, %v851_v16  ;;  %v1813_v15 = vld [vmem:[%s2408_s4 + $0x78] sm:$0xff]  ;;  %v1815_v16 = vld [vmem:[%s2408_s4 + $0x88] sm:$0xff] }
 0x147   : > { %869 = vmatpush.bf16.msra.mxu2 %v854_v17 }
 0x14b   : > { %v931_v20 = vpop.permute.xlu2 %930 }
 0x14d   : > { %v845_v21 = vpop.permute.xlu0 %844  ;;  %v770_v9 = vpop.permute.xlu1 %769 }
 0x14e   : > { %v775_v35 = vsel %vm773_vm3, %v770_v9, %v772_v7  ;;  %v1812_v7 = vld [vmem:[%s2408_s4 + $0x70] sm:$0xff] }
 0x153   : > { %v927_v10 = vpop.permute.xlu2 %926 }
 0x155   : > { %v1170_v22 = vpop.permute.xlu0 %1169  ;;  %v847_v23 = vpop.permute.xlu1 %846 }
 0x156   : > { %v853_v24 = vsel %vm852_vm1, %v845_v21, %v847_v23 }
 0x157   : > { %870 = vmatpush.bf16.msra.mxu2 %v853_v24 }
 0x15a   : > { %1696 = vmatmul.msk.bf16.vlgmr.msra.gmra.mxu2 %vm725_vm2, %v1800_v25 }
 0x15b   : > { %v2269_v32 = vpop.permute.xlu2 %1251 }
 0x15d   : > { %v715_v29 = vpop.permute.xlu0 %714  ;;  %v766_v30 = vpop.permute.xlu1 %765 }
 0x15e   : > { %v721_v34 = vsel %vm720_vm0, %v713_v14, %v715_v29  ;;  %v774_v37 = vsel %vm773_vm3, %v766_v30, %v768_v8  ;;  %v1809_v14 = vld [vmem:[%s2408_s4 + $0x58] sm:$0xff] }
 0x15f   : > { %739 = vmatpush.bf16.msra.mxu0 %v721_v34  ;;  %1817 = vmatpush.bf16.msra.mxu1 %v721_v34 }
 0x162   : > { %1673 = vmatmul.msk.bf16.vlgmr.msra.gmra.mxu1 %vm725_vm2, %v1799_v18  ;;  %1672 = vmatmul.msk.bf16.vlgmr.msra.gmra.mxu0 %vm725_vm2, %v1798_v19 }
 0x163   : > { %790 = vmatpush.bf16.msrb.mxu1 %v775_v35  ;;  %1011 = vmatpush.bf16.msrb.mxu0 %v1731_v28  ;;  %v1089_v43 = vpop.permute.xlu2 %1088 }
 0x165   : > { %v933_v38 = vpop.permute.xlu0 %932  ;;  %v1172_v39 = vpop.permute.xlu1 %1171 }
 0x166   : > { %v936_v40 = vsel %vm934_vm4, %v931_v20, %v933_v38  ;;  %v1175_v41 = vsel %vm1173_vm5, %v1170_v22, %v1172_v39 }
 0x167   : > { %791 = vmatpush.bf16.msrb.mxu1 %v774_v37  ;;  %1012 = vmatpush.bf16.msrb.mxu0 %v1727_v36 }
 0x168   : > { %951 = vmatpush.bf16.msra.mxu3 %v936_v40  ;;  %1190 = vmatpush.bf16.msrb.mxu2 %v1175_v41 }
 0x16a   : > { %1697 = vmatmul.msk.bf16.gmra.mxu2 %vm725_vm2, %v1801_v42 }
 0x16b   : > { %v1248_v52 = vpop.permute.xlu2 %1247 }
 0x16d   : > { %v929_v47 = vpop.permute.xlu0 %928  ;;  %v1168_v48 = vpop.permute.xlu1 %1167 }
 0x16e   : > { %v935_v49 = vsel %vm934_vm4, %v927_v10, %v929_v47 }
 0x16f   : > { %952 = vmatpush.bf16.msra.mxu3 %v935_v49 }
 0x172   : > { %1682 = vmatmul.msk.bf16.vlgmr.msrb.gmra.mxu1 %vm725_vm2, %v1796_v46  ;;  %1710 = vmatmul.msk.bf16.vlgmr.msra.gmra.mxu3 %vm725_vm2, %v1802_v50 }
 0x173   : > { %1732 = vmatmul.msk.bf16.vlgmr.msrb.gmra.mxu0 %vm725_vm2, %v1806_v51  ;;  %v1085_v56 = vpop.permute.xlu2 %1084 }
 0x175   : > { %v1166_v44 = vpop.permute.xlu0 %1165  ;;  %v1087_v53 = vpop.permute.xlu1 %1086 }
 0x176   : > { %v1092_v45 = vsel %vm1090_vm6, %v1087_v53, %v1089_v43  ;;  %v1174_v54 = vsel %vm1173_vm5, %v1166_v44, %v1168_v48 }
 0x177   : > { %1107 = vmatpush.bf16.msra.mxu1 %v1092_v45  ;;  %1191 = vmatpush.bf16.msrb.mxu2 %v1174_v54 }
 0x17a   : > { %1760 = vmatmul.msk.bf16.vlgmr.msrb.gmra.mxu2 %vm725_vm2, %v1810_v55 }
 0x17b   : > { %v1331_v8 = vpop.permute.xlu2 %1330 }
 0x17d   : > { %v1335_v57 = vpop.permute.xlu0 %1334  ;;  %v1083_v58 = vpop.permute.xlu1 %1082 }
 0x17e   : > { %v1091_v59 = vsel %vm1090_vm6, %v1083_v58, %v1085_v56 }
 0x17f   : > { %1108 = vmatpush.bf16.msra.mxu1 %v1091_v59 }
 0x182   : > { %1683 = vmatmul.msk.bf16.gmra.mxu1 %vm725_vm2, %v1797_v60  ;;  %1711 = vmatmul.msk.bf16.gmra.mxu3 %vm725_vm2, %v1803_v61 }
 0x183   : > { %1733 = vmatmul.msk.bf16.gmra.mxu0 %vm725_vm2, %v1807_v62 }
 0x185   : > { %v1254_v63 = vpop.permute.xlu0 %1253  ;;  %v1337_v0 = vpop.permute.xlu1 %1336 }
 0x186   : > { %v1340_v1 = vsel %vm1338_vm7, %v1335_v57, %v1337_v0  ;;  %v1257_v2 = vsel %vm1255_vm8, %v2269_v32, %v1254_v63 }
 0x187   : > { %1272 = vmatpush.bf16.msrb.mxu3 %v1257_v2  ;;  %1355 = vmatpush.bf16.msra.mxu0 %v1340_v1 }
 0x18a   : > { %1761 = vmatmul.msk.bf16.gmra.mxu2 %vm725_vm2, %v1811_v3 }
 0x18d   : > { %v1250_v4 = vpop.permute.xlu0 %1249 }
 0x18e   : > { %v1256_v5 = vsel %vm1255_vm8, %v1248_v52, %v1250_v4 }
 0x18f   : > { %1273 = vmatpush.bf16.msrb.mxu3 %v1256_v5 }
 0x192   : > { %1746 = vmatmul.msk.bf16.vlgmr.msra.gmra.mxu1 %vm725_vm2, %v1808_v6  ;;  %1774 = vmatmul.msk.bf16.vlgmr.msrb.gmra.mxu3 %vm725_vm2, %v1812_v7 }
 0x195   : > { %v1333_v11 = vpop.permute.xlu0 %1332 }
 0x196   : > { %v1339_v12 = vsel %vm1338_vm7, %v1331_v8, %v1333_v11 }
 0x197   : > { %1356 = vmatpush.bf16.msra.mxu0 %v1339_v12 }
 0x19a   : > { %1788 = vmatmul.msk.bf16.vlgmr.msra.gmra.mxu0 %vm725_vm2, %v1814_v13 }
 0x1a2   : > { %1747 = vmatmul.msk.bf16.gmra.mxu1 %vm725_vm2, %v1809_v14  ;;  %1775 = vmatmul.msk.bf16.gmra.mxu3 %vm725_vm2, %v1813_v15 }
 0x1aa   : > { %1789 = vmatmul.msk.bf16.gmra.mxu0 %vm725_vm2, %v1815_v16 }
 0x1dd   : > { %v872_v21 = vpop.f32.mrf.mxu2 }
 0x1df   : > { %v746_v17 = vpop.f32.mrf.mxu1  ;;  %v741_v20 = vpop.f32.mrf.mxu0 }
 0x1e5   : > { %v874_v22 = vpop.f32.mrf.mxu2 }
 0x1e7   : > { %v748_v9 = vpop.f32.mrf.mxu1  ;;  %v743_v10 = vpop.f32.mrf.mxu0 }
 0x1ed   : > { %v877_v27 = vpop.f32.mrf.mxu2 }
 0x1ef   : > { %v793_v23 = vpop.f32.mrf.mxu1 }
 0x1f0   : > { %v1014_v24 = vpop.f32.mrf.mxu0  ;;  %v794_v33 = vadd.f32 %v793_v23, %v741_v20 }
 0x1f2   : > { %v882_v19 = vadd.f32 %v872_v21, %v794_v33 }
 0x1f5   : > { %v954_v25 = vpop.f32.mrf.mxu3  ;;  %v879_v31 = vpop.f32.mrf.mxu2 }
 0x1f6   : > { %v964_v35 = vadd.f32 %v954_v25, %v882_v19 }
 0x1f7   : > { %v795_v26 = vpop.f32.mrf.mxu1 }
 0x1f8   : > { %v1016_v28 = vpop.f32.mrf.mxu0  ;;  %v796_v36 = vadd.f32 %v795_v26, %v743_v10  ;;  %v1024_v39 = vadd.f32 %v1014_v24, %v964_v35 }
 0x1fa   : > { %v883_v42 = vadd.f32 %v874_v22, %v796_v36 }
 0x1fd   : > { %v956_v29 = vpop.f32.mrf.mxu3  ;;  %v1193_v37 = vpop.f32.mrf.mxu2 }
 0x1fe   : > { %v965_v47 = vadd.f32 %v956_v29, %v883_v42 }
 0x1ff   : > { %v798_v30 = vpop.f32.mrf.mxu1 }
 0x200   : > { %v1019_v34 = vpop.f32.mrf.mxu0  ;;  %v799_v48 = vadd.f32 %v798_v30, %v746_v17  ;;  %v1025_v50 = vadd.f32 %v1016_v28, %v965_v47 }
 0x202   : > { %v884_v45 = vadd.f32 %v877_v27, %v799_v48 }
 0x205   : > { %v959_v32 = vpop.f32.mrf.mxu3  ;;  %v1195_v52 = vpop.f32.mrf.mxu2 }
 0x206   : > { %v966_v56 = vadd.f32 %v959_v32, %v884_v45 }
 0x207   : > { %v800_v18 = vpop.f32.mrf.mxu1 }
 0x208   : > { %v1021_v40 = vpop.f32.mrf.mxu0  ;;  %v801_v57 = vadd.f32 %v800_v18, %v748_v9  ;;  %v1026_v60 = vadd.f32 %v1019_v34, %v966_v56 }
 0x20a   : > { %v885_v0 = vadd.f32 %v879_v31, %v801_v57 }
 0x20d   : > { %v961_v38 = vpop.f32.mrf.mxu3  ;;  %v1198_v4 = vpop.f32.mrf.mxu2 }
 0x20e   : > { %v967_v5 = vadd.f32 %v961_v38, %v885_v0 }
 0x20f   : > { %v1110_v41 = vpop.f32.mrf.mxu1 }
 0x210   : > { %v1120_v43 = vadd.f32 %v1110_v41, %v1024_v39  ;;  %v1027_v8 = vadd.f32 %v1021_v40, %v967_v5 }
 0x212   : > { %v1203_v49 = vadd.f32 %v1193_v37, %v1120_v43 }
 0x215   : > { %v1275_v46 = vpop.f32.mrf.mxu3  ;;  %v1200_v16 = vpop.f32.mrf.mxu2 }
 0x216   : > { %v1285_v51 = vadd.f32 %v1275_v46, %v1203_v49 }
 0x217   : > { %v1112_v44 = vpop.f32.mrf.mxu1  ;;  %v1358_v53 = vpop.f32.mrf.mxu0 }
 0x218   : > { %v1121_v54 = vadd.f32 %v1112_v44, %v1025_v50  ;;  %v1368_v55 = vadd.f32 %v1358_v53, %v1285_v51 }
 0x21a   : > { %1372 = vst [vmem:[%s2350_s22] sm:$0xff] %v1368_v55  ;;  %1376 = vadd.xlane.f32.xlu1 %v1368_v55  ;;  %v1204_v58 = vadd.f32 %v1195_v52, %v1121_v54  ;;  %v1389_v3 = vmul.f32 %v1368_v55, %v1368_v55 }
 0x21d   : > { %v1277_v59 = vpop.f32.mrf.mxu3 }
 0x21e   : > { %v1286_v61 = vadd.f32 %v1277_v59, %v1204_v58 }
 0x21f   : > { %v1115_v62 = vpop.f32.mrf.mxu1  ;;  %v1360_v63 = vpop.f32.mrf.mxu0 }
 0x220   : > { %v1122_v1 = vadd.f32 %v1115_v62, %v1026_v60  ;;  %v1369_v2 = vadd.f32 %v1360_v63, %v1286_v61 }
 0x221   : > { %v1458_v32 = vld [vmem:[%s2350_s22] sm:$0xff] (%p2087_p3) }
 0x222   : > { %1373 = vst [vmem:[%s2350_s22 + $0x8] sm:$0xff] %v1369_v2  ;;  %1393 = vadd.xlane.f32.xlu1 %v1389_v3  ;;  %1378 = vadd.xlane.f32.xlu2 %v1369_v2  ;;  %v1205_v6 = vadd.f32 %v1198_v4, %v1122_v1  ;;  %v1390_v24 = vmul.f32 %v1369_v2, %v1369_v2 }
 0x223   : > { %1459 = vst [vmem:[%s1423_s14] sm:$0xff] (%p2087_p3), %v1458_v32 }
 0x225   : > { %v1280_v7 = vpop.f32.mrf.mxu3 }
 0x226   : > { %v1287_v11 = vadd.f32 %v1280_v7, %v1205_v6 }
 0x227   : > { %v1117_v12 = vpop.f32.mrf.mxu1  ;;  %v1363_v13 = vpop.f32.mrf.mxu0 }
 0x228   : > { %v1123_v14 = vadd.f32 %v1117_v12, %v1027_v8  ;;  %v1370_v15 = vadd.f32 %v1363_v13, %v1287_v11 }
 0x229   : > { %v1460_v34 = vld [vmem:[%s2350_s22 + $0x8] sm:$0xff] (%p2087_p3) }
 0x22a   : > { %1374 = vst [vmem:[%s2350_s22 + $0x10] sm:$0xff] %v1370_v15  ;;  %1380 = vadd.xlane.f32.xlu0 %v1370_v15  ;;  %v1206_v17 = vadd.f32 %v1200_v16, %v1123_v14  ;;  %v1391_v22 = vmul.f32 %v1370_v15, %v1370_v15 }
 0x22b   : > { %1461 = vst [vmem:[%s1423_s14 + $0x20] sm:$0xff] (%p2087_p3), %v1460_v34 }
 0x22d   : > { %v1282_v20 = vpop.f32.mrf.mxu3 }
 0x22e   : > { %v1288_v21 = vadd.f32 %v1282_v20, %v1206_v17 }
 0x22f   : > { %v1365_v9 = vpop.f32.mrf.mxu0 }
 0x230   : > { %v1371_v10 = vadd.f32 %v1365_v9, %v1288_v21 }
 0x231   : > { %v1462_v18 = vld [vmem:[%s2350_s22 + $0x10] sm:$0xff] (%p2087_p3) }
 0x232   : > { %1375 = vst [vmem:[%s2350_s22 + $0x18] sm:$0xff] %v1371_v10  ;;  %1397 = vadd.xlane.f32.xlu0 %v1391_v22  ;;  %1382 = vadd.xlane.f32.xlu2 %v1371_v10  ;;  %v1392_v23 = vmul.f32 %v1371_v10, %v1371_v10 }
 0x233   : > { %1463 = vst [vmem:[%s1423_s14 + $0x40] sm:$0xff] (%p2087_p3), %v1462_v18 }
 0x234   : > { %1399 = vadd.xlane.f32.xlu1 %v1392_v23 }
 0x239   : > { %v1464_v19 = vld [vmem:[%s2350_s22 + $0x18] sm:$0xff] (%p2087_p3) }
 0x23a   : > { %1395 = vadd.xlane.f32.xlu2 %v1390_v24  ;;  %1465 = vst [vmem:[%s1423_s14 + $0x60] sm:$0xff] (%p2087_p3), %v1464_v19 }
 0x28d   : > { %v1377_v25 = vpop.xlane.xlu1 %1376 }
 0x28e   : > { %1385 = vst.msk [vmem:[%s591_s27] sm:$0xff] %vm934_vm4, %v1377_v25 }
 0x295   : > { %v1394_v26 = vpop.xlane.xlu1 %1393  ;;  %v1379_v27 = vpop.xlane.xlu2 %1378 }
 0x296   : > { %1401 = vst.msk [vmem:[%s596_s12] sm:$0xff] %vm934_vm4, %v1394_v26 }
 0x297   : > { %1386 = vst.msk [vmem:[%s591_s27 + $0x8] sm:$0xff] %vm934_vm4, %v1379_v27 }
 0x29d   : > { %v1381_v28 = vpop.xlane.xlu0 %1380 }
 0x29e   : > { %1387 = vst.msk [vmem:[%s591_s27 + $0x10] sm:$0xff] %vm934_vm4, %v1381_v28 }
 0x2a5   : > { %v1398_v29 = vpop.xlane.xlu0 %1397  ;;  %v1383_v30 = vpop.xlane.xlu2 %1382 }
 0x2a6   : > { %1403 = vst.msk [vmem:[%s596_s12 + $0x10] sm:$0xff] %vm934_vm4, %v1398_v29 }
 0x2a7   : > { %1388 = vst.msk [vmem:[%s591_s27 + $0x18] sm:$0xff] %vm934_vm4, %v1383_v30  ;;  %v1400_v31 = vpop.xlane.xlu1 %1399 }
 0x2a8   : > { %1404 = vst.msk [vmem:[%s596_s12 + $0x18] sm:$0xff] %vm934_vm4, %v1400_v31 }
 0x2aa   : > { %1421 = sbr.rel (!%p2087_p3) target bundleno = 687 (0x2af), region = 203 }
 0x2ad   : > { %v1396_v33 = vpop.xlane.xlu2 %1395 }
 0x2ae   : > { %1402 = vst.msk [vmem:[%s596_s12 + $0x8] sm:$0xff] %vm934_vm4, %v1396_v33 }
 0x2af PF: > { %s2430_s10 = sld [smem:[#allocation8_spill]]  ;;  %s2434_s27 = smov %s1916_s28 }
 0x2b0   : > { %s2431_s17 = sld [smem:[#allocation12_spill]]  ;;  %s2436_s29 = smov %s1924_s30 }
 0x2b1   : > { %s2432_s6 = sld [smem:[#allocation10_spill]]  ;;  %s2438_s9 = smov %s1932_s5 }
 0x2b2   : > { %s2433_s11 = sld [smem:[#allocation9_spill]] }
 0x2b5   : > { %p16_p7 = scmp.ge.s32.totalorder %s2430_s10, 6  }
 0x2b6   : > { %s2435_s28 = smov %s2431_s17 }
 0x2b7   : > { %s2437_s30 = smov %s2432_s6  ;;  %18 = sbr.rel (!%p16_p7) target bundleno = 7 (0x7), region = 328 }
 0x2b8   : > { %s2439_s5 = smov %s2433_s11 }

</bundles_post_ra>
